<compile_context>
chip_gen: v7x
topology: tpu7x:2x2x1
jax: 0.10.0
libtpu: 0.0.40
codegen_flags: <defaults>
</compile_context>

<pallas_src>
import jax
import jax.numpy as jnp
from jax.experimental import pallas as pl
from jax.experimental.pallas import tpu as pltpu


def _round_up(x, m):
    return (x + m - 1) // m * m


def _hw_hints():
    """Returns (generation, vmem_capacity_bytes, max_batch_tile, min_grid_steps)."""
    kind = ""
    try:
        kind = jax.devices()[0].device_kind.lower()
    except Exception:
        pass
    vmem_cap = None
    try:
        vmem_cap = int(pltpu.get_tpu_info().vmem_capacity_bytes)
    except Exception:
        pass
    if "7" in kind:
        gen = "v7x"
    elif "v6" in kind:
        gen = "v6e"
    elif "v5" in kind:
        gen = "v5e"
    else:
        gen = "other"
    if vmem_cap is None:
        vmem_cap = (64 << 20) if gen == "v7x" else (128 << 20)
    if gen == "v6e":
        tb_cap, min_grid = 256, 1      # 256x256 MXU, 1 TC, 128 MiB VMEM
    elif gen == "v7x":
        tb_cap, min_grid = 256, 2      # 2 TCs/chip: want >=2 grid steps; 64 MiB VMEM
    else:                              # v5e (128-row MXU) and unknown chips: conservative
        tb_cap, min_grid = 128, 1
    return gen, vmem_cap, tb_cap, min_grid


# ---------------------------------------------------------------------------
# Kernel: one decoder step for a batch tile.
# ---------------------------------------------------------------------------
def _attn_decoder_kernel(
    xh_ref, c0_ref, ctx_ref, mask_ref,
    w_gates_ref, b_gates_ref, w_in_ref, w_out_a_ref, w_out_b_ref, w_dec_ref, b_dec_ref,
    h1_ref, c1_ref, alpha_ref, logit_ref,
):
    f32 = jnp.float32
    H = c0_ref.shape[-1]                       # padded hidden size (multiple of 128)
    cdt = w_gates_ref.dtype                    # MXU input dtype (bf16 or f32)

    xh = xh_ref[...]                           # (TB, Inp+Hp)  cdt — [x ; h0], lane-aligned concat
    c0 = c0_ref[...].astype(f32)               # (TB, Hp)      f32 (elementwise only)

    # ---- LSTMCell, single fused MXU pass: gates = [x;h0] @ [W_ih^T;W_hh^T] + (b_ih+b_hh) ----
    gates = jnp.dot(xh, w_gates_ref[...], preferred_element_type=f32) + b_gates_ref[...]
    i_g = jax.nn.sigmoid(gates[:, 0:H])
    f_g = jax.nn.sigmoid(gates[:, H:2 * H])
    g_g = jnp.tanh(gates[:, 2 * H:3 * H])
    o_g = jax.nn.sigmoid(gates[:, 3 * H:4 * H])
    c1 = f_g * c0 + i_g * g_g
    h1 = o_g * jnp.tanh(c1)
    h1_ref[...] = h1.astype(h1_ref.dtype)
    c1_ref[...] = c1.astype(c1_ref.dtype)

    # ---- SoftDotAttention (dropout on h1 is identity in eval mode) ----
    h1_c = h1.astype(cdt)
    ctx = ctx_ref[...]                                              # (TB, Sp, Hp)  cdt

    # linear_in stays in-kernel: a (TB,Hp)x(Hp,Hp) matmul is ~1% of the gate matmul, whereas a
    # hoisted ctx_key would double the dominant per-tile ctx DMA on every decode step.
    target = jnp.dot(h1_c, w_in_ref[...], preferred_element_type=f32)   # (TB, Hp) f32

    # Attention scores / weighted context on the MXU via 3-D batched einsums (flash-attn pattern).
    # TODO(synk): bundle-audit these n=1 batched matmuls; if Mosaic serializes them per batch row,
    # reformulate as VPU broadcast-mul + XLU reduce looped over Sp.
    attn = jnp.einsum('bnh,bsh->bns', target.astype(cdt)[:, None, :], ctx,
                      preferred_element_type=f32)[:, 0, :]          # (TB, Sp) f32

    # PyTorch: mask = 1 - ctx_mask; masked_fill_(mask.bool(), -inf).  Large finite negative keeps
    # fully-masked rows (incl. batch-padding rows) NaN-free.
    attn = jnp.where(mask_ref[...] > 0, attn, jnp.float32(-1e30))

    # softmax over seq_len (dim=1) — exact divide: alpha is a user-visible output (must sum to 1).
    attn_max = jnp.max(attn, axis=1, keepdims=True)
    e = jnp.exp(attn - attn_max)
    alpha = e / jnp.sum(e, axis=1, keepdims=True)                   # (TB, Sp)
    alpha_ref[...] = alpha.astype(alpha_ref.dtype)

    weighted = jnp.einsum('bns,bsh->bnh', alpha.astype(cdt)[:, None, :], ctx,
                          preferred_element_type=f32)[:, 0, :]      # (TB, Hp) f32

    # h_tilde = tanh(Linear_out([weighted ; h1]))  -- concat eliminated via split weights.
    h_tilde = jnp.tanh(
        jnp.dot(weighted.astype(cdt), w_out_a_ref[...], preferred_element_type=f32)
        + jnp.dot(h1_c, w_out_b_ref[...], preferred_element_type=f32))

    # logits = decoder2action(h_tilde)   (output dim padded to 128 -> lane-dense store)
    logit = (jnp.dot(h_tilde.astype(cdt), w_dec_ref[...], preferred_element_type=f32)
             + b_dec_ref[...])
    logit_ref[...] = logit.astype(logit_ref.dtype)


# ---------------------------------------------------------------------------
# Parameter preparation (one-time): transpose, fuse, fold, split, pad, cast.
# ---------------------------------------------------------------------------
def prepare_params(params, compute_dtype=jnp.bfloat16):
    H = params["w_hh"].shape[1]
    In = params["w_ih"].shape[1]
    A = params["w_dec"].shape[0]
    Hp = _round_up(H, 128)
    Inp = _round_up(In, 128)
    Ap = _round_up(A, 128)

    def pad2(w, r, c):
        return jnp.pad(w, ((0, r - w.shape[0]), (0, c - w.shape[1])))

    def per_gate_pad_t(w, in_pad):
        # w: (4H, in) torch layout -> transposed + per-gate zero-padded: (in_pad, 4*Hp)
        wt = w.T
        return jnp.concatenate(
            [pad2(wt[:, g * H:(g + 1) * H], in_pad, Hp) for g in range(4)], axis=1)

    # Fused gate weight: [x ; h0] @ w_gates == x @ W_ih^T + h0 @ W_hh^T  (one MXU pass)
    w_gates = jnp.concatenate(
        [per_gate_pad_t(params["w_ih"], Inp), per_gate_pad_t(params["w_hh"], Hp)],
        axis=0).astype(compute_dtype)                                         # (Inp+Hp, 4Hp)

    b_sum = params["b_ih"].reshape(-1) + params["b_hh"].reshape(-1)           # (4H,)
    b_gates = jnp.concatenate(
        [jnp.pad(b_sum[g * H:(g + 1) * H], (0, Hp - H)) for g in range(4)]
    ).reshape(1, 4 * Hp).astype(jnp.float32)

    w_out = params["w_out"]                                                   # (H, 2H)

    return {
        "embedding": params["embedding"].astype(jnp.float32),
        "H": H, "Hp": Hp, "In": In, "Inp": Inp, "A": A, "Ap": Ap,
        "compute_dtype": compute_dtype,
        "w_gates": w_gates,                                                   # (Inp+Hp, 4Hp)
        "b_gates": b_gates,                                                   # (1, 4Hp) f32
        "w_in_t": pad2(params["w_in"].T, Hp, Hp).astype(compute_dtype),       # (Hp, Hp)
        "w_out_a_t": pad2(w_out[:, :H].T, Hp, Hp).astype(compute_dtype),      # weighted half
        "w_out_b_t": pad2(w_out[:, H:].T, Hp, Hp).astype(compute_dtype),      # h1 half
        "w_dec_t": pad2(params["w_dec"].T, Hp, Ap).astype(compute_dtype),     # (Hp, Ap)
        "b_dec": jnp.pad(params["b_dec"].reshape(-1), (0, Ap - A))
                    .reshape(1, Ap).astype(jnp.float32),
    }


# ---------------------------------------------------------------------------
# pallas_call builder + wrapper
# ---------------------------------------------------------------------------
_WEIGHT_SINGLE_BUFFER_OK = [None]   # lazily resolved: can pl.Buffered(1) be used for weights?


def _pallas_forward(xh_p, c0_p, ctx_p, mask_p, prepared, TB, Sp, Bp,
                    single_buffer_weights, vmem_limit, cost):
    Hp, Inp, Ap = prepared["Hp"], prepared["Inp"], prepared["Ap"]
    grid = (Bp // TB,)
    bmap = lambda i: (i, 0)
    bmap3 = lambda i: (i, 0, 0)

    def wspec(arr):
        # Grid-invariant weight: full block, constant index_map.  Single-buffer it so it is not
        # double-buffered out of VMEM (biggest saving on v7x's 64 MiB).
        if single_buffer_weights:
            return pl.BlockSpec(arr.shape, lambda i: (0, 0), pipeline_mode=pl.Buffered(1))
        return pl.BlockSpec(arr.shape, lambda i: (0, 0))

    in_specs = [
        pl.BlockSpec((TB, Inp + Hp), bmap),      # [x ; h0]
        pl.BlockSpec((TB, Hp), bmap),            # c0
        pl.BlockSpec((TB, Sp, Hp), bmap3),       # ctx
        pl.BlockSpec((TB, Sp), bmap),            # mask
        wspec(prepared["w_gates"]),
        wspec(prepared["b_gates"]),
        wspec(prepared["w_in_t"]),
        wspec(prepared["w_out_a_t"]),
        wspec(prepared["w_out_b_t"]),
        wspec(prepared["w_dec_t"]),
        wspec(prepared["b_dec"]),
    ]
    out_specs = (
        pl.BlockSpec((TB, Hp), bmap),
        pl.BlockSpec((TB, Hp), bmap),
        pl.BlockSpec((TB, Sp), bmap),
        pl.BlockSpec((TB, Ap), bmap),
    )
    out_shape = (
        jax.ShapeDtypeStruct((Bp, Hp), jnp.float32),   # h_1
        jax.ShapeDtypeStruct((Bp, Hp), jnp.float32),   # c_1
        jax.ShapeDtypeStruct((Bp, Sp), jnp.float32),   # alpha
        jax.ShapeDtypeStruct((Bp, Ap), jnp.float32),   # logit
    )
    return pl.pallas_call(
        _attn_decoder_kernel,
        out_shape=out_shape,
        grid=grid,
        in_specs=in_specs,
        out_specs=out_specs,
        compiler_params=pltpu.CompilerParams(
            dimension_semantics=("parallel",),
            vmem_limit_bytes=vmem_limit),
        cost_estimate=cost,
    )(xh_p, c0_p, ctx_p, mask_p,
      prepared["w_gates"], prepared["b_gates"], prepared["w_in_t"],
      prepared["w_out_a_t"], prepared["w_out_b_t"],
      prepared["w_dec_t"], prepared["b_dec"])


def attn_decoder_lstm(action, feature, h_0, c_0, ctx, ctx_mask, prepared, *, block_batch=None):
    cdt = prepared["compute_dtype"]
    H, Hp = prepared["H"], prepared["Hp"]
    Inp = prepared["Inp"]
    A, Ap = prepared["A"], prepared["Ap"]

    B = h_0.shape[0]
    S = ctx.shape[1]
    Sp = _round_up(S, 8)

    # ---- per-generation batch tile (TB) and VMEM budgeting ----
    _, vmem_cap, tb_cap, min_grid = _hw_hints()
    itemsize = jnp.dtype(cdt).itemsize
    # bytes of batch-tiled (pipelined) data per batch row: inputs + outputs
    row_bytes = ((Inp + Hp) * itemsize + Hp * 4 + Sp * Hp * itemsize + Sp * 4
                 + 2 * Hp * 4 + Sp * 4 + Ap * 4)
    weight_arrays = (prepared["w_gates"], prepared["b_gates"], prepared["w_in_t"],
                     prepared["w_out_a_t"], prepared["w_out_b_t"],
                     prepared["w_dec_t"], prepared["b_dec"])
    weight_bytes = sum(int(a.size) * a.dtype.itemsize for a in weight_arrays)

    if block_batch is not None:
        TB = max(8, _round_up(block_batch, 8))
    else:
        TB = min(tb_cap, _round_up(B, 8))
        if min_grid > 1:   # v7x: >=2 grid steps so both TensorCores get work / ctx DMA pipelines
            TB = min(TB, _round_up(pl.cdiv(B, min_grid), 8))
        TB = max(TB, 8)
        vmem_budget = vmem_cap * 3 // 4
        while TB > 8 and weight_bytes + 2 * TB * row_bytes > vmem_budget:
            TB = max(8, _round_up(TB // 2, 8))
    Bp = _round_up(B, TB)

    # vmem limit derived from actual needs (2x weights covers the non-single-buffered fallback)
    footprint = 2 * weight_bytes + 2 * TB * row_bytes
    vmem_limit = int(min(vmem_cap - (4 << 20), 128 << 20,
                         max(footprint + (16 << 20), 48 << 20)))

    # ---- glue (plain JAX): embedding lookup + squeeze + concat([emb, feature]) ----
    action_embeds = prepared["embedding"][action[:, 0]]                  # (B, emb)
    x = jnp.concatenate([action_embeds, feature.astype(jnp.float32)], axis=1)   # (B, In)

    def pad2(a, r, c):
        return jnp.pad(a, ((0, r - a.shape[0]), (0, c - a.shape[1])))

    # [x ; h0] concat is lane-aligned (both widths are multiples of 128) -> fused gate matmul.
    xh_p = jnp.concatenate([pad2(x, Bp, Inp), pad2(h_0, Bp, Hp)], axis=1).astype(cdt)
    c0_p = pad2(c_0, Bp, Hp).astype(jnp.float32)
    ctx_p = jnp.pad(ctx, ((0, Bp - B), (0, Sp - S), (0, Hp - H))).astype(cdt)
    if ctx_mask is None:
        ctx_mask = jnp.ones((B, S), jnp.float32)
    mask_p = pad2(ctx_mask.astype(jnp.float32), Bp, Sp)                  # padded cols/rows = 0

    # ---- advisory cost estimate for XLA scheduling of the surrounding glue ----
    flops = (2 * Bp * (Inp + Hp) * 4 * Hp        # fused LSTM gates
             + 2 * Bp * Hp * Hp                  # linear_in
             + 2 * Bp * Sp * Hp * 2              # attention scores + weighted context
             + 2 * Bp * Hp * Hp * 2              # linear_out (two halves)
             + 2 * Bp * Hp * Ap)                 # decoder2action
    transcendentals = Bp * (6 * Hp + Sp)
    bytes_accessed = (int(xh_p.size) * itemsize + int(c0_p.size) * 4
                      + int(ctx_p.size) * itemsize + int(mask_p.size) * 4
                      + weight_bytes + 4 * (Bp * Hp * 2 + Bp * Sp + Bp * Ap))
    cost = pl.CostEstimate(flops=int(flops), transcendentals=int(transcendentals),
                           bytes_accessed=int(bytes_accessed))

    args = (xh_p, c0_p, ctx_p, mask_p, prepared, TB, Sp, Bp)
    if _WEIGHT_SINGLE_BUFFER_OK[0] is None:
        try:
            outs = _pallas_forward(*args, True, vmem_limit, cost)
            jax.block_until_ready(outs)
            _WEIGHT_SINGLE_BUFFER_OK[0] = True
        except Exception:
            _WEIGHT_SINGLE_BUFFER_OK[0] = False
            outs = _pallas_forward(*args, False, vmem_limit, cost)
    else:
        outs = _pallas_forward(*args, _WEIGHT_SINGLE_BUFFER_OK[0], vmem_limit, cost)
    h1, c1, alpha, logit = outs

    # un-pad (exactness: all padded rows/cols are zero-propagated inside the kernel)
    return h1[:B, :H], c1[:B, :H], alpha[:B, :S], logit[:B, :A]


# ---------------------------------------------------------------------------
# PyTorch-layout parameter init + pure-JAX reference for validation.
# ---------------------------------------------------------------------------
def init_params(key, input_action_size, output_action_size,
                embedding_size, hidden_size, feature_size):
    ks = jax.random.split(key, 9)
    in_dim = embedding_size + feature_size
    scale = 0.1
    return {
        "embedding": scale * jax.random.normal(ks[0], (input_action_size, embedding_size), jnp.float32),
        "w_ih": scale * jax.random.normal(ks[1], (4 * hidden_size, in_dim), jnp.float32),
        "w_hh": scale * jax.random.normal(ks[2], (4 * hidden_size, hidden_size), jnp.float32),
        "b_ih": scale * jax.random.normal(ks[3], (1, 4 * hidden_size), jnp.float32),
        "b_hh": scale * jax.random.normal(ks[4], (1, 4 * hidden_size), jnp.float32),
        "w_in": scale * jax.random.normal(ks[5], (hidden_size, hidden_size), jnp.float32),
        "w_out": scale * jax.random.normal(ks[6], (hidden_size, 2 * hidden_size), jnp.float32),
        "w_dec": scale * jax.random.normal(ks[7], (output_action_size, hidden_size), jnp.float32),
        "b_dec": scale * jax.random.normal(ks[8], (1, output_action_size), jnp.float32),
    }


def _reference(action, feature, h0, c0, ctx, mask, params):
    emb = params["embedding"][action[:, 0]]
    x = jnp.concatenate([emb, feature], axis=1)
    H = h0.shape[1]
    gates = x @ params["w_ih"].T + params["b_ih"] + h0 @ params["w_hh"].T + params["b_hh"]
    i = jax.nn.sigmoid(gates[:, :H]); f = jax.nn.sigmoid(gates[:, H:2 * H])
    g = jnp.tanh(gates[:, 2 * H:3 * H]); o = jax.nn.sigmoid(gates[:, 3 * H:])
    c1 = f * c0 + i * g
    h1 = o * jnp.tanh(c1)
    target = h1 @ params["w_in"].T
    attn = jnp.einsum('bsh,bh->bs', ctx, target)
    attn = jnp.where(mask > 0, attn, -jnp.inf)
    alpha = jax.nn.softmax(attn, axis=1)
    weighted = jnp.einsum('bs,bsh->bh', alpha, ctx)
    h_tilde = jnp.tanh(jnp.concatenate([weighted, h1], axis=1) @ params["w_out"].T)
    logit = h_tilde @ params["w_dec"].T + params["b_dec"]
    return h1, c1, alpha, logit


if __name__ == "__main__":
    # Small, module-consistent shapes
    batch = 2
    seq_len = 8
    hidden_size = 32
    embedding_size = 16
    feature_size = 64          # stand-in for the 2048-dim image feature
    input_action_size = 8
    output_action_size = 6

    key = jax.random.PRNGKey(0)
    k_par, k_act, k_feat, k_h, k_c, k_ctx = jax.random.split(key, 6)

    params = init_params(k_par, input_action_size, output_action_size,
                         embedding_size, hidden_size, feature_size)
    prepared = prepare_params(params, compute_dtype=jnp.bfloat16)

    action = jax.random.randint(k_act, (batch, 1), 0, input_action_size, dtype=jnp.int32)
    feature = jax.random.normal(k_feat, (batch, feature_size), jnp.float32)
    h_0 = jax.random.normal(k_h, (batch, hidden_size), jnp.float32)
    c_0 = jax.random.normal(k_c, (batch, hidden_size), jnp.float32)
    ctx = jax.random.normal(k_ctx, (batch, seq_len, hidden_size), jnp.float32)
    # 1.0 = valid token (attend), 0.0 = padding (masked); each row has >=1 valid token
    ctx_mask = jnp.array(
        [[1, 1, 1, 1, 1, 1, 1, 1],
         [1, 1, 1, 1, 1, 0, 0, 0]], dtype=jnp.float32)

    h_1, c_1, alpha, logit = attn_decoder_lstm(
        action, feature, h_0, c_0, ctx, ctx_mask, prepared)
    jax.block_until_ready((h_1, c_1, alpha, logit))

    assert h_1.shape == (batch, hidden_size)
    assert c_1.shape == (batch, hidden_size)
    assert alpha.shape == (batch, seq_len)
    assert logit.shape == (batch, output_action_size)
    # masked positions of row 1 must carry zero attention
    assert float(jnp.max(jnp.abs(alpha[1, 5:]))) == 0.0
    assert bool(jnp.all(jnp.isfinite(logit)))
    # exact softmax: rows sum to 1
    assert float(jnp.max(jnp.abs(jnp.sum(alpha, axis=1) - 1.0))) < 1e-5

    # numerical check against the pure-JAX f32 reference (bf16 MXU inputs -> loose tolerance)
    r_h1, r_c1, r_alpha, r_logit = _reference(action, feature, h_0, c_0, ctx, ctx_mask, params)
    for got, ref in ((h_1, r_h1), (c_1, r_c1), (alpha, r_alpha), (logit, r_logit)):
        assert float(jnp.max(jnp.abs(got - ref))) < 0.1

    print("KERNEL_OK")
</pallas_src>

<mosaic_0001>
module attributes {stable_mosaic.version = 11 : i64} {
  func.func @_attn_decoder_kernel(%arg0: i32, %arg1: memref<8x256xbf16, #tpu.memory_space<vmem>>, %arg2: memref<8x128xf32, #tpu.memory_space<vmem>>, %arg3: memref<8x8x128xbf16, #tpu.memory_space<vmem>>, %arg4: memref<8x8xf32, #tpu.memory_space<vmem>>, %arg5: memref<256x512xbf16, #tpu.memory_space<vmem>>, %arg6: memref<1x512xf32, #tpu.memory_space<vmem>>, %arg7: memref<128x128xbf16, #tpu.memory_space<vmem>>, %arg8: memref<128x128xbf16, #tpu.memory_space<vmem>>, %arg9: memref<128x128xbf16, #tpu.memory_space<vmem>>, %arg10: memref<128x128xbf16, #tpu.memory_space<vmem>>, %arg11: memref<1x128xf32, #tpu.memory_space<vmem>>, %arg12: memref<8x128xf32, #tpu.memory_space<vmem>>, %arg13: memref<8x128xf32, #tpu.memory_space<vmem>>, %arg14: memref<8x8xf32, #tpu.memory_space<vmem>>, %arg15: memref<8x128xf32, #tpu.memory_space<vmem>>) attributes {dimension_semantics = [#tpu.dimension_semantics<parallel>], iteration_bounds = array<i64: 1>, scalar_prefetch = 0 : i64, scratch_operands = 0 : i64, tpu.core_type = #tpu.core_type<tc>, window_params = [{transform_indices = @transform_0, window_bounds = array<i64: 8, 256>}, {transform_indices = @transform_1, window_bounds = array<i64: 8, 128>}, {transform_indices = @transform_2, window_bounds = array<i64: 8, 8, 128>}, {transform_indices = @transform_3, window_bounds = array<i64: 8, 8>}, {pipeline_mode = #tpu.pipeline_mode<synchronous>, transform_indices = @transform_4, window_bounds = array<i64: 256, 512>}, {pipeline_mode = #tpu.pipeline_mode<synchronous>, transform_indices = @transform_5, window_bounds = array<i64: 1, 512>}, {pipeline_mode = #tpu.pipeline_mode<synchronous>, transform_indices = @transform_6, window_bounds = array<i64: 128, 128>}, {pipeline_mode = #tpu.pipeline_mode<synchronous>, transform_indices = @transform_7, window_bounds = array<i64: 128, 128>}, {pipeline_mode = #tpu.pipeline_mode<synchronous>, transform_indices = @transform_8, window_bounds = array<i64: 128, 128>}, {pipeline_mode = #tpu.pipeline_mode<synchronous>, transform_indices = @transform_9, window_bounds = array<i64: 128, 128>}, {pipeline_mode = #tpu.pipeline_mode<synchronous>, transform_indices = @transform_10, window_bounds = array<i64: 1, 128>}, {transform_indices = @transform_11, window_bounds = array<i64: 8, 128>}, {transform_indices = @transform_12, window_bounds = array<i64: 8, 128>}, {transform_indices = @transform_13, window_bounds = array<i64: 8, 8>}, {transform_indices = @transform_14, window_bounds = array<i64: 8, 128>}]} {
    %c0 = arith.constant 0 : index
    %c0_0 = arith.constant 0 : index
    %0 = vector.load %arg1[%c0, %c0_0] : memref<8x256xbf16, #tpu.memory_space<vmem>>, vector<8x256xbf16>
    %c0_1 = arith.constant 0 : index
    %c0_2 = arith.constant 0 : index
    %1 = vector.load %arg2[%c0_1, %c0_2] : memref<8x128xf32, #tpu.memory_space<vmem>>, vector<8x128xf32>
    %c0_3 = arith.constant 0 : index
    %c0_4 = arith.constant 0 : index
    %2 = vector.load %arg5[%c0_3, %c0_4] : memref<256x512xbf16, #tpu.memory_space<vmem>>, vector<256x512xbf16>
    %cst = arith.constant dense<0.000000e+00> : vector<8x512xf32>
    %3 = tpu.matmul %0, %2, %cst {dimension_numbers = #tpu.dot_dimension_numbers<[1], [0], [0], [1], [0, 0, 1, 1], [], []>} : vector<8x256xbf16>, vector<256x512xbf16>, vector<8x512xf32> -> vector<8x512xf32>
    %c0_5 = arith.constant 0 : index
    %c0_6 = arith.constant 0 : index
    %4 = vector.load %arg6[%c0_5, %c0_6] : memref<1x512xf32, #tpu.memory_space<vmem>>, vector<1x512xf32>
    %5 = vector.broadcast %4 : vector<1x512xf32> to vector<8x512xf32>
    %6 = arith.addf %3, %5 : vector<8x512xf32>
    %7 = vector.extract_strided_slice %6 {offsets = [0, 0], sizes = [8, 128], strides = [1, 1]} : vector<8x512xf32> to vector<8x128xf32>
    %8 = arith.negf %7 : vector<8x128xf32>
    %9 = math.exp %8 : vector<8x128xf32>
    %cst_7 = arith.constant 1.000000e+00 : f32
    %10 = vector.broadcast %cst_7 : f32 to vector<8x128xf32>
    %11 = arith.addf %10, %9 : vector<8x128xf32>
    %12 = arith.divf %10, %11 : vector<8x128xf32>
    %13 = vector.extract_strided_slice %6 {offsets = [0, 128], sizes = [8, 128], strides = [1, 1]} : vector<8x512xf32> to vector<8x128xf32>
    %14 = arith.negf %13 : vector<8x128xf32>
    %15 = math.exp %14 : vector<8x128xf32>
    %cst_8 = arith.constant 1.000000e+00 : f32
    %16 = vector.broadcast %cst_8 : f32 to vector<8x128xf32>
    %17 = arith.addf %16, %15 : vector<8x128xf32>
    %18 = arith.divf %16, %17 : vector<8x128xf32>
    %19 = vector.extract_strided_slice %6 {offsets = [0, 256], sizes = [8, 128], strides = [1, 1]} : vector<8x512xf32> to vector<8x128xf32>
    %20 = math.tanh %19 : vector<8x128xf32>
    %21 = vector.extract_strided_slice %6 {offsets = [0, 384], sizes = [8, 128], strides = [1, 1]} : vector<8x512xf32> to vector<8x128xf32>
    %22 = arith.negf %21 : vector<8x128xf32>
    %23 = math.exp %22 : vector<8x128xf32>
    %cst_9 = arith.constant 1.000000e+00 : f32
    %24 = vector.broadcast %cst_9 : f32 to vector<8x128xf32>
    %25 = arith.addf %24, %23 : vector<8x128xf32>
    %26 = arith.divf %24, %25 : vector<8x128xf32>
    %27 = arith.mulf %18, %1 : vector<8x128xf32>
    %28 = arith.mulf %12, %20 : vector<8x128xf32>
    %29 = arith.addf %27, %28 : vector<8x128xf32>
    %30 = math.tanh %29 : vector<8x128xf32>
    %31 = arith.mulf %26, %30 : vector<8x128xf32>
    %c0_10 = arith.constant 0 : index
    %c0_11 = arith.constant 0 : index
    %32 = vector.load %arg12[%c0_10, %c0_11] : memref<8x128xf32, #tpu.memory_space<vmem>>, vector<8x128xf32>
    tpu.vector_store %arg12[%c0_10, %c0_11], %31 {strides = array<i32>} : memref<8x128xf32, #tpu.memory_space<vmem>>, vector<8x128xf32>,
    %c0_12 = arith.constant 0 : index
    %c0_13 = arith.constant 0 : index
    %33 = vector.load %arg13[%c0_12, %c0_13] : memref<8x128xf32, #tpu.memory_space<vmem>>, vector<8x128xf32>
    tpu.vector_store %arg13[%c0_12, %c0_13], %29 {strides = array<i32>} : memref<8x128xf32, #tpu.memory_space<vmem>>, vector<8x128xf32>,
    %34 = arith.truncf %31 : vector<8x128xf32> to vector<8x128xbf16>
    %c0_14 = arith.constant 0 : index
    %c0_15 = arith.constant 0 : index
    %c0_16 = arith.constant 0 : index
    %35 = vector.load %arg3[%c0_14, %c0_15, %c0_16] : memref<8x8x128xbf16, #tpu.memory_space<vmem>>, vector<8x8x128xbf16>
    %c0_17 = arith.constant 0 : index
    %c0_18 = arith.constant 0 : index
    %36 = vector.load %arg7[%c0_17, %c0_18] : memref<128x128xbf16, #tpu.memory_space<vmem>>, vector<128x128xbf16>
    %cst_19 = arith.constant dense<0.000000e+00> : vector<8x128xf32>
    %37 = tpu.matmul %34, %36, %cst_19 {dimension_numbers = #tpu.dot_dimension_numbers<[1], [0], [0], [1], [0, 0, 1, 1], [], []>} : vector<8x128xbf16>, vector<128x128xbf16>, vector<8x128xf32> -> vector<8x128xf32>
    %38 = arith.truncf %37 : vector<8x128xf32> to vector<8x128xbf16>
    %39 = vector.shape_cast %38 : vector<8x128xbf16> to vector<8x1x128xbf16>
    "tpu.trace_start"() <{level = 10 : i32, message = "bnh,bsh->bns"}> : () -> ()
    %cst_20 = arith.constant dense<0.000000e+00> : vector<8x1x8xf32>
    %40 = tpu.matmul %39, %35, %cst_20 {dimension_numbers = #tpu.dot_dimension_numbers<[2], [2], [1], [1], [0, 0, 0, 1, 1, 1], [0], [0]>} : vector<8x1x128xbf16>, vector<8x8x128xbf16>, vector<8x1x8xf32> -> vector<8x1x8xf32>
    "tpu.trace_stop"() : () -> ()
    %41 = vector.shape_cast %40 : vector<8x1x8xf32> to vector<8x8xf32>
    %c0_21 = arith.constant 0 : index
    %c0_22 = arith.constant 0 : index
    %42 = vector.load %arg4[%c0_21, %c0_22] : memref<8x8xf32, #tpu.memory_space<vmem>>, vector<8x8xf32>
    %cst_23 = arith.constant 0.000000e+00 : f32
    %43 = vector.broadcast %cst_23 : f32 to vector<8x8xf32>
    %44 = arith.cmpf ogt, %42, %43 : vector<8x8xf32>
    %cst_24 = arith.constant -1.000000e+30 : f32
    %45 = vector.broadcast %cst_24 : f32 to vector<8x8xf32>
    %46 = arith.select %44, %41, %45 : vector<8x8xi1>, vector<8x8xf32>
    %cst_25 = arith.constant dense<0xFF800000> : vector<8xf32>
    %47 = vector.multi_reduction <maximumf>, %46, %cst_25 [1] : vector<8x8xf32> to vector<8xf32>
    %48 = vector.shape_cast %47 : vector<8xf32> to vector<8x1xf32>
    %49 = vector.broadcast %48 : vector<8x1xf32> to vector<8x8xf32>
    %50 = arith.subf %46, %49 : vector<8x8xf32>
    %51 = math.exp %50 : vector<8x8xf32>
    %cst_26 = arith.constant dense<0.000000e+00> : vector<8xf32>
    %52 = vector.multi_reduction <add>, %51, %cst_26 [1] : vector<8x8xf32> to vector<8xf32>
    %53 = vector.shape_cast %52 : vector<8xf32> to vector<8x1xf32>
    %54 = vector.broadcast %53 : vector<8x1xf32> to vector<8x8xf32>
    %55 = arith.divf %51, %54 : vector<8x8xf32>
    %c0_27 = arith.constant 0 : index
    %c0_28 = arith.constant 0 : index
    %56 = vector.load %arg14[%c0_27, %c0_28] : memref<8x8xf32, #tpu.memory_space<vmem>>, vector<8x8xf32>
    tpu.vector_store %arg14[%c0_27, %c0_28], %55 {strides = array<i32>} : memref<8x8xf32, #tpu.memory_space<vmem>>, vector<8x8xf32>,
    %57 = arith.truncf %55 : vector<8x8xf32> to vector<8x8xbf16>
    %58 = vector.shape_cast %57 : vector<8x8xbf16> to vector<8x1x8xbf16>
    "tpu.trace_start"() <{level = 10 : i32, message = "bns,bsh->bnh"}> : () -> ()
    %cst_29 = arith.constant dense<0.000000e+00> : vector<8x1x128xf32>
    %59 = tpu.matmul %58, %35, %cst_29 {dimension_numbers = #tpu.dot_dimension_numbers<[2], [1], [1], [2], [0, 0, 0, 1, 1, 2], [0], [0]>} : vector<8x1x8xbf16>, vector<8x8x128xbf16>, vector<8x1x128xf32> -> vector<8x1x128xf32>
    "tpu.trace_stop"() : () -> ()
    %60 = vector.shape_cast %59 : vector<8x1x128xf32> to vector<8x128xf32>
    %61 = arith.truncf %60 : vector<8x128xf32> to vector<8x128xbf16>
    %c0_30 = arith.constant 0 : index
    %c0_31 = arith.constant 0 : index
    %62 = vector.load %arg8[%c0_30, %c0_31] : memref<128x128xbf16, #tpu.memory_space<vmem>>, vector<128x128xbf16>
    %cst_32 = arith.constant dense<0.000000e+00> : vector<8x128xf32>
    %63 = tpu.matmul %61, %62, %cst_32 {dimension_numbers = #tpu.dot_dimension_numbers<[1], [0], [0], [1], [0, 0, 1, 1], [], []>} : vector<8x128xbf16>, vector<128x128xbf16>, vector<8x128xf32> -> vector<8x128xf32>
    %c0_33 = arith.constant 0 : index
    %c0_34 = arith.constant 0 : index
    %64 = vector.load %arg9[%c0_33, %c0_34] : memref<128x128xbf16, #tpu.memory_space<vmem>>, vector<128x128xbf16>
    %cst_35 = arith.constant dense<0.000000e+00> : vector<8x128xf32>
    %65 = tpu.matmul %34, %64, %cst_35 {dimension_numbers = #tpu.dot_dimension_numbers<[1], [0], [0], [1], [0, 0, 1, 1], [], []>} : vector<8x128xbf16>, vector<128x128xbf16>, vector<8x128xf32> -> vector<8x128xf32>
    %66 = arith.addf %63, %65 : vector<8x128xf32>
    %67 = math.tanh %66 : vector<8x128xf32>
    %68 = arith.truncf %67 : vector<8x128xf32> to vector<8x128xbf16>
    %c0_36 = arith.constant 0 : index
    %c0_37 = arith.constant 0 : index
    %69 = vector.load %arg10[%c0_36, %c0_37] : memref<128x128xbf16, #tpu.memory_space<vmem>>, vector<128x128xbf16>
    %cst_38 = arith.constant dense<0.000000e+00> : vector<8x128xf32>
    %70 = tpu.matmul %68, %69, %cst_38 {dimension_numbers = #tpu.dot_dimension_numbers<[1], [0], [0], [1], [0, 0, 1, 1], [], []>} : vector<8x128xbf16>, vector<128x128xbf16>, vector<8x128xf32> -> vector<8x128xf32>
    %c0_39 = arith.constant 0 : index
    %c0_40 = arith.constant 0 : index
    %71 = vector.load %arg11[%c0_39, %c0_40] : memref<1x128xf32, #tpu.memory_space<vmem>>, vector<1x128xf32>
    %72 = vector.broadcast %71 : vector<1x128xf32> to vector<8x128xf32>
    %73 = arith.addf %70, %72 : vector<8x128xf32>
    %c0_41 = arith.constant 0 : index
    %c0_42 = arith.constant 0 : index
    %74 = vector.load %arg15[%c0_41, %c0_42] : memref<8x128xf32, #tpu.memory_space<vmem>>, vector<8x128xf32>
    tpu.vector_store %arg15[%c0_41, %c0_42], %73 {strides = array<i32>} : memref<8x128xf32, #tpu.memory_space<vmem>>, vector<8x128xf32>,
    return
  }
  func.func @transform_0(%arg0: i32) -> (i32, i32) {
    %c0_i32 = arith.constant 0 : i32
    %c0_i32_0 = arith.constant 0 : i32
    return %arg0, %c0_i32 : i32, i32
  }
  func.func @transform_1(%arg0: i32) -> (i32, i32) {
    %c0_i32 = arith.constant 0 : i32
    %c0_i32_0 = arith.constant 0 : i32
    return %arg0, %c0_i32 : i32, i32
  }
  func.func @transform_2(%arg0: i32) -> (i32, i32, i32) {
    %c0_i32 = arith.constant 0 : i32
    %c0_i32_0 = arith.constant 0 : i32
    %c0_i32_1 = arith.constant 0 : i32
    return %arg0, %c0_i32, %c0_i32_0 : i32, i32, i32
  }
  func.func @transform_3(%arg0: i32) -> (i32, i32) {
    %c0_i32 = arith.constant 0 : i32
    %c0_i32_0 = arith.constant 0 : i32
    return %arg0, %c0_i32 : i32, i32
  }
  func.func @transform_4(%arg0: i32) -> (i32, i32) {
    %c0_i32 = arith.constant 0 : i32
    %c0_i32_0 = arith.constant 0 : i32
    %c0_i32_1 = arith.constant 0 : i32
    return %c0_i32, %c0_i32_0 : i32, i32
  }
  func.func @transform_5(%arg0: i32) -> (i32, i32) {
    %c0_i32 = arith.constant 0 : i32
    %c0_i32_0 = arith.constant 0 : i32
    %c0_i32_1 = arith.constant 0 : i32
    return %c0_i32, %c0_i32_0 : i32, i32
  }
  func.func @transform_6(%arg0: i32) -> (i32, i32) {
    %c0_i32 = arith.constant 0 : i32
    %c0_i32_0 = arith.constant 0 : i32
    %c0_i32_1 = arith.constant 0 : i32
    return %c0_i32, %c0_i32_0 : i32, i32
  }
  func.func @transform_7(%arg0: i32) -> (i32, i32) {
    %c0_i32 = arith.constant 0 : i32
    %c0_i32_0 = arith.constant 0 : i32
    %c0_i32_1 = arith.constant 0 : i32
    return %c0_i32, %c0_i32_0 : i32, i32
  }
  func.func @transform_8(%arg0: i32) -> (i32, i32) {
    %c0_i32 = arith.constant 0 : i32
    %c0_i32_0 = arith.constant 0 : i32
    %c0_i32_1 = arith.constant 0 : i32
    return %c0_i32, %c0_i32_0 : i32, i32
  }
  func.func @transform_9(%arg0: i32) -> (i32, i32) {
    %c0_i32 = arith.constant 0 : i32
    %c0_i32_0 = arith.constant 0 : i32
    %c0_i32_1 = arith.constant 0 : i32
    return %c0_i32, %c0_i32_0 : i32, i32
  }
  func.func @transform_10(%arg0: i32) -> (i32, i32) {
    %c0_i32 = arith.constant 0 : i32
    %c0_i32_0 = arith.constant 0 : i32
    %c0_i32_1 = arith.constant 0 : i32
    return %c0_i32, %c0_i32_0 : i32, i32
  }
  func.func @transform_11(%arg0: i32) -> (i32, i32) {
    %c0_i32 = arith.constant 0 : i32
    %c0_i32_0 = arith.constant 0 : i32
    return %arg0, %c0_i32 : i32, i32
  }
  func.func @transform_12(%arg0: i32) -> (i32, i32) {
    %c0_i32 = arith.constant 0 : i32
    %c0_i32_0 = arith.constant 0 : i32
    return %arg0, %c0_i32 : i32, i32
  }
  func.func @transform_13(%arg0: i32) -> (i32, i32) {
    %c0_i32 = arith.constant 0 : i32
    %c0_i32_0 = arith.constant 0 : i32
    return %arg0, %c0_i32 : i32, i32
  }
  func.func @transform_14(%arg0: i32) -> (i32, i32) {
    %c0_i32 = arith.constant 0 : i32
    %c0_i32_0 = arith.constant 0 : i32
    return %arg0, %c0_i32 : i32, i32
  }
}

module attributes {stable_mosaic.version = 11 : i64} {
  func.func @_attn_decoder_kernel(%arg0: i32, %arg1: memref<8x256xbf16, #tpu.memory_space<vmem>>, %arg2: memref<8x128xf32, #tpu.memory_space<vmem>>, %arg3: memref<8x8x128xbf16, #tpu.memory_space<vmem>>, %arg4: memref<8x8xf32, #tpu.memory_space<vmem>>, %arg5: memref<256x512xbf16, #tpu.memory_space<vmem>>, %arg6: memref<1x512xf32, #tpu.memory_space<vmem>>, %arg7: memref<128x128xbf16, #tpu.memory_space<vmem>>, %arg8: memref<128x128xbf16, #tpu.memory_space<vmem>>, %arg9: memref<128x128xbf16, #tpu.memory_space<vmem>>, %arg10: memref<128x128xbf16, #tpu.memory_space<vmem>>, %arg11: memref<1x128xf32, #tpu.memory_space<vmem>>, %arg12: memref<8x128xf32, #tpu.memory_space<vmem>>, %arg13: memref<8x128xf32, #tpu.memory_space<vmem>>, %arg14: memref<8x8xf32, #tpu.memory_space<vmem>>, %arg15: memref<8x128xf32, #tpu.memory_space<vmem>>) attributes {dimension_semantics = [#tpu.dimension_semantics<parallel>], iteration_bounds = array<i64: 1>, scalar_prefetch = 0 : i64, scratch_operands = 0 : i64, tpu.core_type = #tpu.core_type<tc>, window_params = [{transform_indices = @transform_0, window_bounds = array<i64: 8, 256>}, {transform_indices = @transform_1, window_bounds = array<i64: 8, 128>}, {transform_indices = @transform_2, window_bounds = array<i64: 8, 8, 128>}, {transform_indices = @transform_3, window_bounds = array<i64: 8, 8>}, {pipeline_mode = #tpu.pipeline_mode<synchronous>, transform_indices = @transform_4, window_bounds = array<i64: 256, 512>}, {pipeline_mode = #tpu.pipeline_mode<synchronous>, transform_indices = @transform_5, window_bounds = array<i64: 1, 512>}, {pipeline_mode = #tpu.pipeline_mode<synchronous>, transform_indices = @transform_6, window_bounds = array<i64: 128, 128>}, {pipeline_mode = #tpu.pipeline_mode<synchronous>, transform_indices = @transform_7, window_bounds = array<i64: 128, 128>}, {pipeline_mode = #tpu.pipeline_mode<synchronous>, transform_indices = @transform_8, window_bounds = array<i64: 128, 128>}, {pipeline_mode = #tpu.pipeline_mode<synchronous>, transform_indices = @transform_9, window_bounds = array<i64: 128, 128>}, {pipeline_mode = #tpu.pipeline_mode<synchronous>, transform_indices = @transform_10, window_bounds = array<i64: 1, 128>}, {transform_indices = @transform_11, window_bounds = array<i64: 8, 128>}, {transform_indices = @transform_12, window_bounds = array<i64: 8, 128>}, {transform_indices = @transform_13, window_bounds = array<i64: 8, 8>}, {transform_indices = @transform_14, window_bounds = array<i64: 8, 128>}]} {
    %c0 = arith.constant 0 : index
    %c0_0 = arith.constant 0 : index
    %0 = vector.load %arg1[%c0, %c0_0] : memref<8x256xbf16, #tpu.memory_space<vmem>>, vector<8x256xbf16>
    %c0_1 = arith.constant 0 : index
    %c0_2 = arith.constant 0 : index
    %1 = vector.load %arg2[%c0_1, %c0_2] : memref<8x128xf32, #tpu.memory_space<vmem>>, vector<8x128xf32>
    %c0_3 = arith.constant 0 : index
    %c0_4 = arith.constant 0 : index
    %2 = vector.load %arg5[%c0_3, %c0_4] : memref<256x512xbf16, #tpu.memory_space<vmem>>, vector<256x512xbf16>
    %cst = arith.constant dense<0.000000e+00> : vector<8x512xf32>
    %3 = tpu.matmul %0, %2, %cst {dimension_numbers = #tpu.dot_dimension_numbers<[1], [0], [0], [1], [0, 0, 1, 1], [], []>} : vector<8x256xbf16>, vector<256x512xbf16>, vector<8x512xf32> -> vector<8x512xf32>
    %c0_5 = arith.constant 0 : index
    %c0_6 = arith.constant 0 : index
    %4 = vector.load %arg6[%c0_5, %c0_6] : memref<1x512xf32, #tpu.memory_space<vmem>>, vector<1x512xf32>
    %5 = vector.broadcast %4 : vector<1x512xf32> to vector<8x512xf32>
    %6 = arith.addf %3, %5 : vector<8x512xf32>
    %7 = vector.extract_strided_slice %6 {offsets = [0, 0], sizes = [8, 128], strides = [1, 1]} : vector<8x512xf32> to vector<8x128xf32>
    %8 = arith.negf %7 : vector<8x128xf32>
    %9 = math.exp %8 : vector<8x128xf32>
    %cst_7 = arith.constant 1.000000e+00 : f32
    %10 = vector.broadcast %cst_7 : f32 to vector<8x128xf32>
    %11 = arith.addf %10, %9 : vector<8x128xf32>
    %12 = arith.divf %10, %11 : vector<8x128xf32>
    %13 = vector.extract_strided_slice %6 {offsets = [0, 128], sizes = [8, 128], strides = [1, 1]} : vector<8x512xf32> to vector<8x128xf32>
    %14 = arith.negf %13 : vector<8x128xf32>
    %15 = math.exp %14 : vector<8x128xf32>
    %cst_8 = arith.constant 1.000000e+00 : f32
    %16 = vector.broadcast %cst_8 : f32 to vector<8x128xf32>
    %17 = arith.addf %16, %15 : vector<8x128xf32>
    %18 = arith.divf %16, %17 : vector<8x128xf32>
    %19 = vector.extract_strided_slice %6 {offsets = [0, 256], sizes = [8, 128], strides = [1, 1]} : vector<8x512xf32> to vector<8x128xf32>
    %20 = math.tanh %19 : vector<8x128xf32>
    %21 = vector.extract_strided_slice %6 {offsets = [0, 384], sizes = [8, 128], strides = [1, 1]} : vector<8x512xf32> to vector<8x128xf32>
    %22 = arith.negf %21 : vector<8x128xf32>
    %23 = math.exp %22 : vector<8x128xf32>
    %cst_9 = arith.constant 1.000000e+00 : f32
    %24 = vector.broadcast %cst_9 : f32 to vector<8x128xf32>
    %25 = arith.addf %24, %23 : vector<8x128xf32>
    %26 = arith.divf %24, %25 : vector<8x128xf32>
    %27 = arith.mulf %18, %1 : vector<8x128xf32>
    %28 = arith.mulf %12, %20 : vector<8x128xf32>
    %29 = arith.addf %27, %28 : vector<8x128xf32>
    %30 = math.tanh %29 : vector<8x128xf32>
    %31 = arith.mulf %26, %30 : vector<8x128xf32>
    %c0_10 = arith.constant 0 : index
    %c0_11 = arith.constant 0 : index
    %32 = vector.load %arg12[%c0_10, %c0_11] : memref<8x128xf32, #tpu.memory_space<vmem>>, vector<8x128xf32>
    tpu.vector_store %arg12[%c0_10, %c0_11], %31 {strides = array<i32>} : memref<8x128xf32, #tpu.memory_space<vmem>>, vector<8x128xf32>,
    %c0_12 = arith.constant 0 : index
    %c0_13 = arith.constant 0 : index
    %33 = vector.load %arg13[%c0_12, %c0_13] : memref<8x128xf32, #tpu.memory_space<vmem>>, vector<8x128xf32>
    tpu.vector_store %arg13[%c0_12, %c0_13], %29 {strides = array<i32>} : memref<8x128xf32, #tpu.memory_space<vmem>>, vector<8x128xf32>,
    %34 = arith.truncf %31 : vector<8x128xf32> to vector<8x128xbf16>
    %c0_14 = arith.constant 0 : index
    %c0_15 = arith.constant 0 : index
    %c0_16 = arith.constant 0 : index
    %35 = vector.load %arg3[%c0_14, %c0_15, %c0_16] : memref<8x8x128xbf16, #tpu.memory_space<vmem>>, vector<8x8x128xbf16>
    %c0_17 = arith.constant 0 : index
    %c0_18 = arith.constant 0 : index
    %36 = vector.load %arg7[%c0_17, %c0_18] : memref<128x128xbf16, #tpu.memory_space<vmem>>, vector<128x128xbf16>
    %cst_19 = arith.constant dense<0.000000e+00> : vector<8x128xf32>
    %37 = tpu.matmul %34, %36, %cst_19 {dimension_numbers = #tpu.dot_dimension_numbers<[1], [0], [0], [1], [0, 0, 1, 1], [], []>} : vector<8x128xbf16>, vector<128x128xbf16>, vector<8x128xf32> -> vector<8x128xf32>
    %38 = arith.truncf %37 : vector<8x128xf32> to vector<8x128xbf16>
    %39 = vector.shape_cast %38 : vector<8x128xbf16> to vector<8x1x128xbf16>
    "tpu.trace_start"() <{level = 10 : i32, message = "bnh,bsh->bns"}> : () -> ()
    %cst_20 = arith.constant dense<0.000000e+00> : vector<8x1x8xf32>
    %40 = tpu.matmul %39, %35, %cst_20 {dimension_numbers = #tpu.dot_dimension_numbers<[2], [2], [1], [1], [0, 0, 0, 1, 1, 1], [0], [0]>} : vector<8x1x128xbf16>, vector<8x8x128xbf16>, vector<8x1x8xf32> -> vector<8x1x8xf32>
    "tpu.trace_stop"() : () -> ()
    %41 = vector.shape_cast %40 : vector<8x1x8xf32> to vector<8x8xf32>
    %c0_21 = arith.constant 0 : index
    %c0_22 = arith.constant 0 : index
    %42 = vector.load %arg4[%c0_21, %c0_22] : memref<8x8xf32, #tpu.memory_space<vmem>>, vector<8x8xf32>
    %cst_23 = arith.constant 0.000000e+00 : f32
    %43 = vector.broadcast %cst_23 : f32 to vector<8x8xf32>
    %44 = arith.cmpf ogt, %42, %43 : vector<8x8xf32>
    %cst_24 = arith.constant -1.000000e+30 : f32
    %45 = vector.broadcast %cst_24 : f32 to vector<8x8xf32>
    %46 = arith.select %44, %41, %45 : vector<8x8xi1>, vector<8x8xf32>
    %cst_25 = arith.constant dense<0xFF800000> : vector<8xf32>
    %47 = vector.multi_reduction <maximumf>, %46, %cst_25 [1] : vector<8x8xf32> to vector<8xf32>
    %48 = vector.shape_cast %47 : vector<8xf32> to vector<8x1xf32>
    %49 = vector.broadcast %48 : vector<8x1xf32> to vector<8x8xf32>
    %50 = arith.subf %46, %49 : vector<8x8xf32>
    %51 = math.exp %50 : vector<8x8xf32>
    %cst_26 = arith.constant dense<0.000000e+00> : vector<8xf32>
    %52 = vector.multi_reduction <add>, %51, %cst_26 [1] : vector<8x8xf32> to vector<8xf32>
    %53 = vector.shape_cast %52 : vector<8xf32> to vector<8x1xf32>
    %54 = vector.broadcast %53 : vector<8x1xf32> to vector<8x8xf32>
    %55 = arith.divf %51, %54 : vector<8x8xf32>
    %c0_27 = arith.constant 0 : index
    %c0_28 = arith.constant 0 : index
    %56 = vector.load %arg14[%c0_27, %c0_28] : memref<8x8xf32, #tpu.memory_space<vmem>>, vector<8x8xf32>
    tpu.vector_store %arg14[%c0_27, %c0_28], %55 {strides = array<i32>} : memref<8x8xf32, #tpu.memory_space<vmem>>, vector<8x8xf32>,
    %57 = arith.truncf %55 : vector<8x8xf32> to vector<8x8xbf16>
    %58 = vector.shape_cast %57 : vector<8x8xbf16> to vector<8x1x8xbf16>
    "tpu.trace_start"() <{level = 10 : i32, message = "bns,bsh->bnh"}> : () -> ()
    %cst_29 = arith.constant dense<0.000000e+00> : vector<8x1x128xf32>
    %59 = tpu.matmul %58, %35, %cst_29 {dimension_numbers = #tpu.dot_dimension_numbers<[2], [1], [1], [2], [0, 0, 0, 1, 1, 2], [0], [0]>} : vector<8x1x8xbf16>, vector<8x8x128xbf16>, vector<8x1x128xf32> -> vector<8x1x128xf32>
    "tpu.trace_stop"() : () -> ()
    %60 = vector.shape_cast %59 : vector<8x1x128xf32> to vector<8x128xf32>
    %61 = arith.truncf %60 : vector<8x128xf32> to vector<8x128xbf16>
    %c0_30 = arith.constant 0 : index
    %c0_31 = arith.constant 0 : index
    %62 = vector.load %arg8[%c0_30, %c0_31] : memref<128x128xbf16, #tpu.memory_space<vmem>>, vector<128x128xbf16>
    %cst_32 = arith.constant dense<0.000000e+00> : vector<8x128xf32>
    %63 = tpu.matmul %61, %62, %cst_32 {dimension_numbers = #tpu.dot_dimension_numbers<[1], [0], [0], [1], [0, 0, 1, 1], [], []>} : vector<8x128xbf16>, vector<128x128xbf16>, vector<8x128xf32> -> vector<8x128xf32>
    %c0_33 = arith.constant 0 : index
    %c0_34 = arith.constant 0 : index
    %64 = vector.load %arg9[%c0_33, %c0_34] : memref<128x128xbf16, #tpu.memory_space<vmem>>, vector<128x128xbf16>
    %cst_35 = arith.constant dense<0.000000e+00> : vector<8x128xf32>
    %65 = tpu.matmul %34, %64, %cst_35 {dimension_numbers = #tpu.dot_dimension_numbers<[1], [0], [0], [1], [0, 0, 1, 1], [], []>} : vector<8x128xbf16>, vector<128x128xbf16>, vector<8x128xf32> -> vector<8x128xf32>
    %66 = arith.addf %63, %65 : vector<8x128xf32>
    %67 = math.tanh %66 : vector<8x128xf32>
    %68 = arith.truncf %67 : vector<8x128xf32> to vector<8x128xbf16>
    %c0_36 = arith.constant 0 : index
    %c0_37 = arith.constant 0 : index
    %69 = vector.load %arg10[%c0_36, %c0_37] : memref<128x128xbf16, #tpu.memory_space<vmem>>, vector<128x128xbf16>
    %cst_38 = arith.constant dense<0.000000e+00> : vector<8x128xf32>
    %70 = tpu.matmul %68, %69, %cst_38 {dimension_numbers = #tpu.dot_dimension_numbers<[1], [0], [0], [1], [0, 0, 1, 1], [], []>} : vector<8x128xbf16>, vector<128x128xbf16>, vector<8x128xf32> -> vector<8x128xf32>
    %c0_39 = arith.constant 0 : index
    %c0_40 = arith.constant 0 : index
    %71 = vector.load %arg11[%c0_39, %c0_40] : memref<1x128xf32, #tpu.memory_space<vmem>>, vector<1x128xf32>
    %72 = vector.broadcast %71 : vector<1x128xf32> to vector<8x128xf32>
    %73 = arith.addf %70, %72 : vector<8x128xf32>
    %c0_41 = arith.constant 0 : index
    %c0_42 = arith.constant 0 : index
    %74 = vector.load %arg15[%c0_41, %c0_42] : memref<8x128xf32, #tpu.memory_space<vmem>>, vector<8x128xf32>
    tpu.vector_store %arg15[%c0_41, %c0_42], %73 {strides = array<i32>} : memref<8x128xf32, #tpu.memory_space<vmem>>, vector<8x128xf32>,
    return
  }
  func.func @transform_0(%arg0: i32) -> (i32, i32) {
    %c0_i32 = arith.constant 0 : i32
    %c0_i32_0 = arith.constant 0 : i32
    return %arg0, %c0_i32 : i32, i32
  }
  func.func @transform_1(%arg0: i32) -> (i32, i32) {
    %c0_i32 = arith.constant 0 : i32
    %c0_i32_0 = arith.constant 0 : i32
    return %arg0, %c0_i32 : i32, i32
  }
  func.func @transform_2(%arg0: i32) -> (i32, i32, i32) {
    %c0_i32 = arith.constant 0 : i32
    %c0_i32_0 = arith.constant 0 : i32
    %c0_i32_1 = arith.constant 0 : i32
    return %arg0, %c0_i32, %c0_i32_0 : i32, i32, i32
  }
  func.func @transform_3(%arg0: i32) -> (i32, i32) {
    %c0_i32 = arith.constant 0 : i32
    %c0_i32_0 = arith.constant 0 : i32
    return %arg0, %c0_i32 : i32, i32
  }
  func.func @transform_4(%arg0: i32) -> (i32, i32) {
    %c0_i32 = arith.constant 0 : i32
    %c0_i32_0 = arith.constant 0 : i32
    %c0_i32_1 = arith.constant 0 : i32
    return %c0_i32, %c0_i32_0 : i32, i32
  }
  func.func @transform_5(%arg0: i32) -> (i32, i32) {
    %c0_i32 = arith.constant 0 : i32
    %c0_i32_0 = arith.constant 0 : i32
    %c0_i32_1 = arith.constant 0 : i32
    return %c0_i32, %c0_i32_0 : i32, i32
  }
  func.func @transform_6(%arg0: i32) -> (i32, i32) {
    %c0_i32 = arith.constant 0 : i32
    %c0_i32_0 = arith.constant 0 : i32
    %c0_i32_1 = arith.constant 0 : i32
    return %c0_i32, %c0_i32_0 : i32, i32
  }
  func.func @transform_7(%arg0: i32) -> (i32, i32) {
    %c0_i32 = arith.constant 0 : i32
    %c0_i32_0 = arith.constant 0 : i32
    %c0_i32_1 = arith.constant 0 : i32
    return %c0_i32, %c0_i32_0 : i32, i32
  }
  func.func @transform_8(%arg0: i32) -> (i32, i32) {
    %c0_i32 = arith.constant 0 : i32
    %c0_i32_0 = arith.constant 0 : i32
    %c0_i32_1 = arith.constant 0 : i32
    return %c0_i32, %c0_i32_0 : i32, i32
  }
  func.func @transform_9(%arg0: i32) -> (i32, i32) {
    %c0_i32 = arith.constant 0 : i32
    %c0_i32_0 = arith.constant 0 : i32
    %c0_i32_1 = arith.constant 0 : i32
    return %c0_i32, %c0_i32_0 : i32, i32
  }
  func.func @transform_10(%arg0: i32) -> (i32, i32) {
    %c0_i32 = arith.constant 0 : i32
    %c0_i32_0 = arith.constant 0 : i32
    %c0_i32_1 = arith.constant 0 : i32
    return %c0_i32, %c0_i32_0 : i32, i32
  }
  func.func @transform_11(%arg0: i32) -> (i32, i32) {
    %c0_i32 = arith.constant 0 : i32
    %c0_i32_0 = arith.constant 0 : i32
    return %arg0, %c0_i32 : i32, i32
  }
  func.func @transform_12(%arg0: i32) -> (i32, i32) {
    %c0_i32 = arith.constant 0 : i32
    %c0_i32_0 = arith.constant 0 : i32
    return %arg0, %c0_i32 : i32, i32
  }
  func.func @transform_13(%arg0: i32) -> (i32, i32) {
    %c0_i32 = arith.constant 0 : i32
    %c0_i32_0 = arith.constant 0 : i32
    return %arg0, %c0_i32 : i32, i32
  }
  func.func @transform_14(%arg0: i32) -> (i32, i32) {
    %c0_i32 = arith.constant 0 : i32
    %c0_i32_0 = arith.constant 0 : i32
    return %arg0, %c0_i32 : i32, i32
  }
}

</mosaic_0001>

<bundles_post_ra>
// kernel: tpu_custom_call.1
= control target key start
LH: loop header
LB: loop body
LE: loop exit
PB: predicated region body
PF: predicated region fallthrough
CT: control target
= control target key end

     0   :  { %20 = vsyncpa [#allocation3], 0  ;;  %s3384_s0 = inlined_call_operand.hbm [shape: bf16[8,256], index: 0, kind: input, shape index: {}]   ;;  %s3385_s1 = inlined_call_operand.hbm [shape: f32[8,128], index: 1, kind: input, shape index: {}]   ;;  %s3386_s2 = inlined_call_operand.hbm [shape: bf16[8,8,128], index: 2, kind: input, shape index: {}]   ;;  %s3387_s3 = inlined_call_operand.vmem [shape: f32[8,8], index: 3, kind: input, shape index: {}]   ;;  %s3388_s4 = inlined_call_operand.hbm [shape: bf16[256,512], index: 4, kind: input, shape index: {}]   ;;  %s3389_s5 = inlined_call_operand.vmem [shape: f32[1,512], index: 5, kind: input, shape index: {}]   ;;  %s3390_s6 = inlined_call_operand.hbm [shape: bf16[128,128], index: 6, kind: input, shape index: {}]   ;;  %s3391_s7 = inlined_call_operand.hbm [shape: bf16[128,128], index: 7, kind: input, shape index: {}]   ;;  %s3392_s8 = inlined_call_operand.hbm [shape: bf16[128,128], index: 8, kind: input, shape index: {}]   ;;  %s3393_s9 = inlined_call_operand.hbm [shape: bf16[128,128], index: 9, kind: input, shape index: {}]   ;;  %s3394_s10 = inlined_call_operand.vmem [shape: f32[1,128], index: 10, kind: input, shape index: {}]   ;;  %s3395_s11 = inlined_call_operand.hbm [shape: f32[8,128], index: 11, kind: output, shape index: {0}]   ;;  %s3396_s12 = inlined_call_operand.hbm [shape: f32[8,128], index: 12, kind: output, shape index: {1}]   ;;  %s3397_s13 = inlined_call_operand.hbm [shape: f32[8,8], index: 13, kind: output, shape index: {2}]   ;;  %s3398_s14 = inlined_call_operand.hbm [shape: f32[8,128], index: 14, kind: output, shape index: {3}]  }
   0x1   :  { %21 = vsyncpa [#allocation6], 0 }
   0x2   :  { %22 = vsyncpa [#allocation9], 0 }
   0x3   :  { %23 = vsyncpa [#allocation12], 0 }
   0x4   :  { %24 = vsyncpa [#allocation15], 0 }
   0x5   :  { %25 = vsyncpa [#allocation4], 0 }
   0x6   :  { %26 = vsyncpa [#allocation18], 0 }
   0x7   :  { %27 = vsyncpa [#allocation21], 0  ;;  %s2917_s29 = smov [#allocation5]   ;;  %s2918_s15 = smov [#allocation8]  }
   0x8   :  { %s44_s30 = sshll.u32 %s2917_s29, 4  ;;  %s67_s16 = sshll.u32 %s2918_s15, 4  ;;  %s45_s30 = int_to_ptr.vmem [resolvable:$true] %s44_s30  ;;  %s3011_s16 = int_to_ptr.vmem [resolvable:$true] %s67_s16 }
   0x9   :  { %s2637_s19 = scalar_lea.hbm %s3385_s1, 128 }
   0xa   :  { %p2638_p0 = scmp.ne.s32.totalorder %s3385_s1, %s2637_s19  ;;  %p2641_p1 = scmp.lt.u32.totalorder %s2637_s19, %s3385_s1 }
   0xc   :  { %p2643_p2 = pnand %p2641_p1, %p2638_p0 }
   0xe   :  { %2646 = shalt.err (!%p2643_p2)
}
   0xf   :  { %s2647_s24 = scalar_lea.vmem %s45_s30, 128  ;;  %p2652_p4 = scmp.lt.s32.totalorder %s45_s30, %s45_s30 }
  0x10   :  { %p2648_p3 = scmp.ne.s32.totalorder %s45_s30, %s2647_s24  ;;  %p2653_p5 = scmp.lt.s32.totalorder %s2647_s24, %s2647_s24 }
  0x12   :  { %p2654_p6 = por %p2653_p5, %p2652_p4 }
  0x14   :  { %p2655_p7 = pnand %p2654_p6, %p2648_p3 }
  0x16   :  { %2658 = shalt.err (!%p2655_p7)
}
  0x17   :  { %47 = dma.hbm_to_vmem [thread:$0]  %s3385_s1, 128, %s45_s30, [#allocation6]  }
  0x18   :  { %s2659_s29 = scalar_lea.hbm %s3388_s4, 8192 }
  0x19   :  { %p2660_p8 = scmp.ne.s32.totalorder %s3388_s4, %s2659_s29  ;;  %p2663_p9 = scmp.lt.u32.totalorder %s2659_s29, %s3388_s4 }
  0x1b   :  { %p2665_p10 = pnand %p2663_p9, %p2660_p8 }
  0x1d   :  { %2668 = shalt.err (!%p2665_p10)
}
  0x1e   :  { %s2669_s20 = scalar_lea.vmem %s3011_s16, 8192  ;;  %p2674_p12 = scmp.lt.s32.totalorder %s3011_s16, %s3011_s16 }
  0x1f   :  { %p2670_p11 = scmp.ne.s32.totalorder %s3011_s16, %s2669_s20  ;;  %p2675_p13 = scmp.lt.s32.totalorder %s2669_s20, %s2669_s20 }
  0x21   :  { %p2676_p0 = por %p2675_p13, %p2674_p12 }
  0x23   :  { %p2677_p1 = pnand %p2676_p0, %p2670_p11 }
  0x25   :  { %2680 = shalt.err (!%p2677_p1)
}
  0x26   :  { %s2919_s1 = smov 256   ;;  %s2920_s30 = smov 16  }
  0x27   :  { %73 = dma.hbm_to_vmem [thread:$0]  %s3388_s4, 8192, %s3011_s16, [#allocation9], %s2919_s1, %s2919_s1, %s2920_s30  }
  0x28   :  { %s2921_s23 = smov [#allocation11]   ;;  %s2922_s25 = smov [#allocation2]  }
  0x29   :  { %s93_s24 = sshll.u32 %s2921_s23, 4  ;;  %s34_s26 = sshll.u32 %s2922_s25, 4  ;;  %s94_s24 = int_to_ptr.vmem [resolvable:$true] %s93_s24  ;;  %s35_s26 = int_to_ptr.vmem [resolvable:$true] %s34_s26 }
  0x2a   :  { %s2681_s29 = scalar_lea.hbm %s3391_s7, 1024 }
  0x2b   :  { %p2682_p2 = scmp.ne.s32.totalorder %s3391_s7, %s2681_s29  ;;  %p2685_p3 = scmp.lt.u32.totalorder %s2681_s29, %s3391_s7 }
  0x2d   :  { %p2687_p4 = pnand %p2685_p3, %p2682_p2 }
  0x2f   :  { %2690 = shalt.err (!%p2687_p4)
}
  0x30   :  { %s2691_s4 = scalar_lea.vmem %s94_s24, 1024  ;;  %p2696_p6 = scmp.lt.s32.totalorder %s94_s24, %s94_s24 }
  0x31   :  { %p2692_p5 = scmp.ne.s32.totalorder %s94_s24, %s2691_s4  ;;  %p2697_p7 = scmp.lt.s32.totalorder %s2691_s4, %s2691_s4 }
  0x33   :  { %p2698_p8 = por %p2697_p7, %p2696_p6 }
  0x35   :  { %p2699_p9 = pnand %p2698_p8, %p2692_p5 }
  0x37   :  { %2702 = shalt.err (!%p2699_p9)
}
  0x38   :  { %s2923_s16 = smov 64   ;;  %s2924_s20 = smov 4  }
  0x39   :  { %99 = dma.hbm_to_vmem [thread:$0]  %s3391_s7, 1024, %s94_s24, [#allocation12], %s2923_s16, %s2923_s16, %s2924_s20  }
  0x3a   :  { %s2703_s23 = scalar_lea.hbm %s3384_s0, 128 }
  0x3b   :  { %p2704_p10 = scmp.ne.s32.totalorder %s3384_s0, %s2703_s23  ;;  %p2707_p11 = scmp.lt.u32.totalorder %s2703_s23, %s3384_s0 }
  0x3d   :  { %p2709_p12 = pnand %p2707_p11, %p2704_p10 }
  0x3f   :  { %2712 = shalt.err (!%p2709_p12)
}
  0x40   :  { %s2713_s15 = scalar_lea.vmem %s35_s26, 128  ;;  %p2718_p0 = scmp.lt.s32.totalorder %s35_s26, %s35_s26 }
  0x41   :  { %p2714_p13 = scmp.ne.s32.totalorder %s35_s26, %s2713_s15  ;;  %p2719_p1 = scmp.lt.s32.totalorder %s2713_s15, %s2713_s15 }
  0x43   :  { %p2720_p2 = por %p2719_p1, %p2718_p0 }
  0x45   :  { %p2721_p3 = pnand %p2720_p2, %p2714_p13 }
  0x47   :  { %2724 = shalt.err (!%p2721_p3)
}
  0x48   :  { %37 = dma.hbm_to_vmem [thread:$0]  %s3384_s0, 128, %s35_s26, [#allocation3]  }
  0x49   :  { %s2925_s17 = smov [#allocation7]   ;;  %s2926_s19 = smov [#allocation10]  }
  0x4a   :  { %s53_s18 = sshll.u32 %s2925_s17, 4  ;;  %s81_s4 = sshll.u32 %s2926_s19, 4  ;;  %s54_s18 = int_to_ptr.vmem [resolvable:$true] %s53_s18  ;;  %s3069_s4 = int_to_ptr.vmem [resolvable:$true] %s81_s4 }
  0x4b   :  { %s2725_s21 = scalar_lea.hbm %s3386_s2, 512 }
  0x4c   :  { %p2726_p4 = scmp.ne.s32.totalorder %s3386_s2, %s2725_s21  ;;  %p2729_p5 = scmp.lt.u32.totalorder %s2725_s21, %s3386_s2 }
  0x4e   :  { %p2731_p6 = pnand %p2729_p5, %p2726_p4 }
  0x50   :  { %2734 = shalt.err (!%p2731_p6)
}
  0x51   :  { %s2735_s0 = scalar_lea.vmem %s54_s18, 512  ;;  %p2740_p8 = scmp.lt.s32.totalorder %s54_s18, %s54_s18 }
  0x52   :  { %p2736_p7 = scmp.ne.s32.totalorder %s54_s18, %s2735_s0  ;;  %p2741_p9 = scmp.lt.s32.totalorder %s2735_s0, %s2735_s0 }
  0x54   :  { %p2742_p10 = por %p2741_p9, %p2740_p8 }
  0x56   :  { %p2743_p11 = pnand %p2742_p10, %p2736_p7 }
  0x58   :  { %2746 = shalt.err (!%p2743_p11)
}
  0x59   :  { %59 = dma.hbm_to_vmem [thread:$0]  %s3386_s2, 512, %s54_s18, [#allocation6], %s2923_s16, %s2923_s16, %s2924_s20  }
  0x5a   :  { %s2747_s7 = scalar_lea.hbm %s3390_s6, 1024 }
  0x5b   :  { %p2748_p12 = scmp.ne.s32.totalorder %s3390_s6, %s2747_s7  ;;  %p2751_p13 = scmp.lt.u32.totalorder %s2747_s7, %s3390_s6 }
  0x5d   :  { %p2753_p0 = pnand %p2751_p13, %p2748_p12 }
  0x5f   :  { %2756 = shalt.err (!%p2753_p0)
}
  0x60   :  { %s2757_s30 = scalar_lea.vmem %s3069_s4, 1024  ;;  %p2762_p2 = scmp.lt.s32.totalorder %s3069_s4, %s3069_s4 }
  0x61   :  { %p2758_p1 = scmp.ne.s32.totalorder %s3069_s4, %s2757_s30  ;;  %p2763_p3 = scmp.lt.s32.totalorder %s2757_s30, %s2757_s30 }
  0x63   :  { %p2764_p4 = por %p2763_p3, %p2762_p2 }
  0x65   :  { %p2765_p5 = pnand %p2764_p4, %p2758_p1 }
  0x67   :  { %2768 = shalt.err (!%p2765_p5)
}
  0x68   :  { %87 = dma.hbm_to_vmem [thread:$0]  %s3390_s6, 1024, %s3069_s4, [#allocation9], %s2923_s16, %s2923_s16, %s2924_s20  }
  0x69   :  { %s2927_s21 = smov [#allocation13]   ;;  %s2928_s23 = smov [#allocation14]  }
  0x6a   :  { %s105_s22 = sshll.u32 %s2927_s21, 4  ;;  %s117_s25 = sshll.u32 %s2928_s23, 4  ;;  %s106_s22 = int_to_ptr.vmem [resolvable:$true] %s105_s22  ;;  %s3106_s25 = int_to_ptr.vmem [resolvable:$true] %s117_s25 }
  0x6b   :  { %s2769_s26 = scalar_lea.hbm %s3392_s8, 1024 }
  0x6c   :  { %p2770_p6 = scmp.ne.s32.totalorder %s3392_s8, %s2769_s26  ;;  %p2773_p7 = scmp.lt.u32.totalorder %s2769_s26, %s3392_s8 }
  0x6e   :  { %p2775_p8 = pnand %p2773_p7, %p2770_p6 }
  0x70   :  { %2778 = shalt.err (!%p2775_p8)
}
  0x71   :  { %s2779_s6 = scalar_lea.vmem %s106_s22, 1024  ;;  %p2784_p10 = scmp.lt.s32.totalorder %s106_s22, %s106_s22 }
  0x72   :  { %p2780_p9 = scmp.ne.s32.totalorder %s106_s22, %s2779_s6  ;;  %p2785_p11 = scmp.lt.s32.totalorder %s2779_s6, %s2779_s6 }
  0x74   :  { %p2786_p12 = por %p2785_p11, %p2784_p10 }
  0x76   :  { %p2787_p13 = pnand %p2786_p12, %p2780_p9 }
  0x78   :  { %2790 = shalt.err (!%p2787_p13)
}
  0x79   :  { %111 = dma.hbm_to_vmem [thread:$0]  %s3392_s8, 1024, %s106_s22, [#allocation12], %s2923_s16, %s2923_s16, %s2924_s20  }
  0x7a   :  { %s2791_s1 = scalar_lea.hbm %s3393_s9, 1024 }
  0x7b   :  { %p2792_p0 = scmp.ne.s32.totalorder %s3393_s9, %s2791_s1  ;;  %p2795_p1 = scmp.lt.u32.totalorder %s2791_s1, %s3393_s9 }
  0x7d   :  { %p2797_p2 = pnand %p2795_p1, %p2792_p0 }
  0x7f   :  { %2800 = shalt.err (!%p2797_p2)
}
  0x80   :  { %s2801_s23 = scalar_lea.vmem %s3106_s25, 1024  ;;  %p2806_p4 = scmp.lt.s32.totalorder %s3106_s25, %s3106_s25 }
  0x81   :  { %p2802_p3 = scmp.ne.s32.totalorder %s3106_s25, %s2801_s23  ;;  %p2807_p5 = scmp.lt.s32.totalorder %s2801_s23, %s2801_s23 }
  0x83   :  { %p2808_p6 = por %p2807_p5, %p2806_p4 }
  0x85   :  { %p2809_p7 = pnand %p2808_p6, %p2802_p3 }
  0x87   :  { %2812 = shalt.err (!%p2809_p7)
}
  0x88   :  { %123 = dma.hbm_to_vmem [thread:$0]  %s3393_s9, 1024, %s3106_s25, [#allocation15], %s2923_s16, %s2923_s16, %s2924_s20  }
  0x89   :  { %2901 = dma.done.wait [#allocation3], 128  }
  0x8a   :  { %2902 = vsyncadd [#allocation3], 4294967168 }
  0x8b   :  { %2903 = dma.done.wait [#allocation6], 640  }
  0x8c   :  { %2904 = vsyncadd [#allocation6], 4294966656 }
  0x8d   :  { %2905 = dma.done.wait [#allocation9], 9216  }
  0x8e   :  { %2906 = vsyncadd [#allocation9], 4294958080 }
  0x8f   :  { %2907 = dma.done.wait [#allocation12], 2048  }
  0x90   :  { %2908 = vsyncadd [#allocation12], 4294965248 }
  0x91   :  { %2909 = dma.done.wait [#allocation15], 1024  }
  0x92   :  { %2910 = vsyncadd [#allocation15], 4294966272  ;;  %v2485_v0 = vld [vmem:[#allocation8 + $0x4] ss:$16 sps:$4 sm:$0xff]   ;;  %v2487_v1 = vld [vmem:[#allocation8] ss:$16 sps:$4 sm:$0xff]  }
  0x93   :  { %566 = vmatprep.subr.bf16.mxu0 %v2485_v0  ;;  %v2488_v2 = vld [vmem:[#allocation8 + $0x24] ss:$16 sps:$4 sm:$0xff]   ;;  %v2490_v3 = vld [vmem:[#allocation8 + $0x20] ss:$16 sps:$4 sm:$0xff]   ;;  %v2496_v5 = vld [vmem:[#allocation8 + $0xc] ss:$16 sps:$4 sm:$0xff]  }
  0x94   :  { %567 = vmatpush1.bf16.msra.mxu0 %v2487_v1  ;;  %v2491_v4 = vld [vmem:[#allocation8 + $0x44] ss:$16 sps:$4 sm:$0xff]   ;;  %v2499_v6 = vld [vmem:[#allocation8 + $0x8] ss:$16 sps:$4 sm:$0xff]   ;;  %v2493_v7 = vld [vmem:[#allocation8 + $0x40] ss:$16 sps:$4 sm:$0xff]   ;;  %607 = vmatprep.subr.bf16.mxu1 %v2496_v5 }
  0x95   :  { %568 = vmatprep.subr.bf16.mxu0 %v2488_v2  ;;  %v2494_v8 = vld [vmem:[#allocation8 + $0x64] ss:$16 sps:$4 sm:$0xff]   ;;  %608 = vmatpush1.bf16.msra.mxu1 %v2499_v6  ;;  %v2502_v9 = vld [vmem:[#allocation8 + $0x2c] ss:$16 sps:$4 sm:$0xff]   ;;  %v2505_v10 = vld [vmem:[#allocation8 + $0x28] ss:$16 sps:$4 sm:$0xff]  }
  0x96   :  { %609 = vmatprep.subr.bf16.mxu1 %v2502_v9  ;;  %v2498_v11 = vld [vmem:[#allocation8 + $0x60] ss:$16 sps:$4 sm:$0xff]   ;;  %v2500_v12 = vld [vmem:[#allocation8 + $0x84] ss:$16 sps:$4 sm:$0xff]   ;;  %v2508_v13 = vld [vmem:[#allocation8 + $0x4c] ss:$16 sps:$4 sm:$0xff]  }
  0x97   :  { %v2511_v14 = vld [vmem:[#allocation8 + $0x48] ss:$16 sps:$4 sm:$0xff]   ;;  %v2514_v15 = vld [vmem:[#allocation8 + $0x6c] ss:$16 sps:$4 sm:$0xff]   ;;  %v2504_v16 = vld [vmem:[#allocation8 + $0x80] ss:$16 sps:$4 sm:$0xff]  }
  0x98   :  { %569 = vmatpush1.bf16.msra.mxu0 %v2490_v3  ;;  %v2506_v17 = vld [vmem:[#allocation8 + $0xa4] ss:$16 sps:$4 sm:$0xff]   ;;  %v2517_v18 = vld [vmem:[#allocation8 + $0x68] ss:$16 sps:$4 sm:$0xff]   ;;  %v2520_v19 = vld [vmem:[#allocation8 + $0x8c] ss:$16 sps:$4 sm:$0xff]  }
  0x99   :  { %570 = vmatprep.subr.bf16.mxu0 %v2491_v4  ;;  %610 = vmatpush1.bf16.msra.mxu1 %v2505_v10  ;;  %v2510_v20 = vld [vmem:[#allocation8 + $0xa0] ss:$16 sps:$4 sm:$0xff]   ;;  %v2512_v21 = vld [vmem:[#allocation8 + $0xc4] ss:$16 sps:$4 sm:$0xff]   ;;  %v2523_v22 = vld [vmem:[#allocation8 + $0x88] ss:$16 sps:$4 sm:$0xff]  }
  0x9a   :  { %611 = vmatprep.subr.bf16.mxu1 %v2508_v13  ;;  %v2526_v23 = vld [vmem:[#allocation8 + $0xac] ss:$16 sps:$4 sm:$0xff]   ;;  %v2516_v24 = vld [vmem:[#allocation8 + $0xc0] ss:$16 sps:$4 sm:$0xff]   ;;  %v2518_v25 = vld [vmem:[#allocation8 + $0xe4] ss:$16 sps:$4 sm:$0xff]  }
  0x9b   :  { %v2529_v26 = vld [vmem:[#allocation8 + $0xa8] ss:$16 sps:$4 sm:$0xff]   ;;  %v2532_v27 = vld [vmem:[#allocation8 + $0xcc] ss:$16 sps:$4 sm:$0xff]   ;;  %v2522_v28 = vld [vmem:[#allocation8 + $0xe0] ss:$16 sps:$4 sm:$0xff]  }
  0x9c   :  { %571 = vmatpush1.bf16.msra.mxu0 %v2493_v7  ;;  %v2524_v29 = vld [vmem:[#allocation8 + $0x104] ss:$16 sps:$4 sm:$0xff]   ;;  %v2535_v30 = vld [vmem:[#allocation8 + $0xc8] ss:$16 sps:$4 sm:$0xff]   ;;  %v2538_v31 = vld [vmem:[#allocation8 + $0xec] ss:$16 sps:$4 sm:$0xff]  }
  0x9d   :  { %572 = vmatprep.subr.bf16.mxu0 %v2494_v8  ;;  %612 = vmatpush1.bf16.msra.mxu1 %v2511_v14  ;;  %v2528_v32 = vld [vmem:[#allocation8 + $0x100] ss:$16 sps:$4 sm:$0xff]   ;;  %v2530_v33 = vld [vmem:[#allocation8 + $0x124] ss:$16 sps:$4 sm:$0xff]   ;;  %v2541_v34 = vld [vmem:[#allocation8 + $0xe8] ss:$16 sps:$4 sm:$0xff]  }
  0x9e   :  { %613 = vmatprep.subr.bf16.mxu1 %v2514_v15  ;;  %v2544_v35 = vld [vmem:[#allocation8 + $0x10c] ss:$16 sps:$4 sm:$0xff]   ;;  %v2534_v36 = vld [vmem:[#allocation8 + $0x120] ss:$16 sps:$4 sm:$0xff]   ;;  %v2536_v37 = vld [vmem:[#allocation8 + $0x144] ss:$16 sps:$4 sm:$0xff]  }
  0x9f   :  { %v2547_v38 = vld [vmem:[#allocation8 + $0x108] ss:$16 sps:$4 sm:$0xff]   ;;  %v2550_v39 = vld [vmem:[#allocation8 + $0x12c] ss:$16 sps:$4 sm:$0xff]   ;;  %v2540_v40 = vld [vmem:[#allocation8 + $0x140] ss:$16 sps:$4 sm:$0xff]  }
  0xa0   :  { %573 = vmatpush1.bf16.msra.mxu0 %v2498_v11  ;;  %v151_v41 = vld [vmem:[#allocation2] sm:$0xff]  ;;  %v2553_v44 = vld [vmem:[#allocation8 + $0x128] ss:$16 sps:$4 sm:$0xff]   ;;  %v2556_v46 = vld [vmem:[#allocation8 + $0x14c] ss:$16 sps:$4 sm:$0xff]   ;;  %v2929_v4 = vmov 0.0  }
  0xa1   :  { %574 = vmatprep.subr.bf16.mxu0 %v2500_v12  ;;  %614 = vmatpush1.bf16.msra.mxu1 %v2517_v18  ;;  %v2542_v42 = vld [vmem:[#allocation8 + $0x164] ss:$16 sps:$4 sm:$0xff]   ;;  %v2101_v43 = vcombine.high %v151_v41, %v151_v41  ;;  %v2546_v45 = vld [vmem:[#allocation8 + $0x160] ss:$16 sps:$4 sm:$0xff]   ;;  %v2559_v48 = vld [vmem:[#allocation8 + $0x148] ss:$16 sps:$4 sm:$0xff]   ;;  %v2100_v1 = vcombine.low %v151_v41, %v151_v41  ;;  %v219_v12 = vlaneseq }
  0xa2   :  { %615 = vmatprep.subr.bf16.mxu1 %v2520_v19  ;;  %v2548_v47 = vld [vmem:[#allocation8 + $0x184] ss:$16 sps:$4 sm:$0xff]   ;;  %v2562_v49 = vld [vmem:[#allocation8 + $0x16c] ss:$16 sps:$4 sm:$0xff]   ;;  %v2552_v50 = vld [vmem:[#allocation8 + $0x180] ss:$16 sps:$4 sm:$0xff]  }
  0xa3   :  { %598 = vmatprep.mubr.bf16.mxu0 %v2101_v43  ;;  %639 = vmatprep.mubr.bf16.mxu1 %v2101_v43  ;;  %v2554_v51 = vld [vmem:[#allocation8 + $0x1a4] ss:$16 sps:$4 sm:$0xff]   ;;  %v2565_v52 = vld [vmem:[#allocation8 + $0x168] ss:$16 sps:$4 sm:$0xff]   ;;  %v2568_v53 = vld [vmem:[#allocation8 + $0x18c] ss:$16 sps:$4 sm:$0xff]  }
  0xa4   :  { %575 = vmatpush1.bf16.msra.mxu0 %v2504_v16  ;;  %v2558_v54 = vld [vmem:[#allocation8 + $0x1a0] ss:$16 sps:$4 sm:$0xff]   ;;  %v2560_v55 = vld [vmem:[#allocation8 + $0x1c4] ss:$16 sps:$4 sm:$0xff]   ;;  %v2571_v56 = vld [vmem:[#allocation8 + $0x188] ss:$16 sps:$4 sm:$0xff]  }
  0xa5   :  { %576 = vmatprep.subr.bf16.mxu0 %v2506_v17  ;;  %616 = vmatpush1.bf16.msra.mxu1 %v2523_v22  ;;  %v2574_v57 = vld [vmem:[#allocation8 + $0x1ac] ss:$16 sps:$4 sm:$0xff]   ;;  %v2564_v58 = vld [vmem:[#allocation8 + $0x1c0] ss:$16 sps:$4 sm:$0xff]   ;;  %v2566_v59 = vld [vmem:[#allocation8 + $0x1e4] ss:$16 sps:$4 sm:$0xff]  }
  0xa6   :  { %617 = vmatprep.subr.bf16.mxu1 %v2526_v23  ;;  %v2576_v60 = vld [vmem:[#allocation8 + $0x1a8] ss:$16 sps:$4 sm:$0xff]   ;;  %v2577_v61 = vld [vmem:[#allocation8 + $0x1cc] ss:$16 sps:$4 sm:$0xff]   ;;  %v2570_v62 = vld [vmem:[#allocation8 + $0x1e0] ss:$16 sps:$4 sm:$0xff]  }
  0xa7   :  { %v2579_v63 = vld [vmem:[#allocation8 + $0x1c8] ss:$16 sps:$4 sm:$0xff]   ;;  %v2580_v0 = vld [vmem:[#allocation8 + $0x1ec] ss:$16 sps:$4 sm:$0xff]   ;;  %v2583_v3 = vld [vmem:[#allocation10] sm:$0xff]   ;;  %vm2930_vm0 = vmmov 0  }
  0xa8   :  { %577 = vmatpush1.bf16.msra.mxu0 %v2510_v20  ;;  %v2582_v2 = vld [vmem:[#allocation8 + $0x1e8] ss:$16 sps:$4 sm:$0xff]   ;;  %v2585_v6 = vld [vmem:[#allocation10 + $0x10] sm:$0xff]   ;;  %v2587_v8 = vld [vmem:[#allocation10 + $0x20] sm:$0xff]   ;;  %v220_v13 = vshrl.u32 %v219_v12, 7  ;;  %vm1200_vm1 = vcmask 1041409  }
  0xa9   :  { %578 = vmatprep.subr.bf16.mxu0 %v2512_v21  ;;  %618 = vmatpush1.bf16.msra.mxu1 %v2529_v26  ;;  %v2584_v5 = vld [vmem:[#allocation10 + $0x8] sm:$0xff]   ;;  %v2586_v7 = vld [vmem:[#allocation10 + $0x18] sm:$0xff]   ;;  %v2589_v10 = vld [vmem:[#allocation10 + $0x30] sm:$0xff]   ;;  %vm1203_vm2 = vcmask 1042434   ;;  %vm1206_vm3 = vcmask 1043459   ;;  %vm1209_vm4 = vcmask 1044484  }
  0xaa   :  { %619 = vmatprep.subr.bf16.mxu1 %v2532_v27  ;;  %v2588_v9 = vld [vmem:[#allocation10 + $0x28] sm:$0xff]   ;;  %v2590_v11 = vld [vmem:[#allocation10 + $0x38] sm:$0xff]   ;;  %v3157_v14 = vsub.s32 0, %v220_v13  ;;  %v217_v15 = vld [vmem:[%s3389_s5] sm:$0xf]  ;;  %v225_v16 = vsub.s32 1, %v220_v13 }
  0xab   :  { %v233_v19 = vsub.s32 3, %v220_v13  ;;  %v3185_v12 = vld [vmem:[#allocation7 + $0x8] sm:$0xf]  ;;  %vm1212_vm5 = vcmask 1045509   ;;  %vm1215_vm6 = vcmask 1046534   ;;  %vm1218_vm7 = vcmask 1047559  }
  0xac   :  { %579 = vmatpush1.bf16.msra.mxu0 %v2516_v24  ;;  %v222_v17 = vrot.slane %v217_v15, %v3157_v14  ;;  %v226_v18 = vrot.slane %v217_v15, %v225_v16  ;;  %v3192_v16 = vld [vmem:[#allocation7 + $0xc] sm:$0xf]  ;;  %vm1222_vm9 = vcmask 64512   ;;  %vm1277_vm10 = vcmask 1043456   ;;  %s2933_s27 = smov [#allocation16]  }
  0xad   :  { %580 = vmatprep.subr.bf16.mxu0 %v2518_v25  ;;  %620 = vmatpush1.bf16.msra.mxu1 %v2535_v30  ;;  %v234_v27 = vrot.slane %v217_v15, %v233_v19  ;;  %s2046_s0 = sshll.u32 %s2933_s27, 4  ;;  %s2047_s0 = int_to_ptr.vmem [resolvable:$true] %s2046_s0 }
  0xae   :  { %621 = vmatprep.subr.bf16.mxu1 %v2538_v31 }
  0xb0   :  { %581 = vmatpush1.bf16.msra.mxu0 %v2522_v28 }
  0xb1   :  { %582 = vmatprep.subr.bf16.mxu0 %v2524_v29  ;;  %622 = vmatpush1.bf16.msra.mxu1 %v2541_v34  ;;  %v229_v29 = vsub.s32 2, %v220_v13 }
  0xb2   :  { %623 = vmatprep.subr.bf16.mxu1 %v2544_v35 }
  0xb3   :  { %v230_v34 = vrot.slane %v217_v15, %v229_v29  ;;  %v3213_v29 = vld [vmem:[#allocation7 + $0x18] sm:$0xf] }
  0xb4   :  { %583 = vmatpush1.bf16.msra.mxu0 %v2528_v32 }
  0xb5   :  { %584 = vmatprep.subr.bf16.mxu0 %v2530_v33  ;;  %624 = vmatpush1.bf16.msra.mxu1 %v2547_v38 }
  0xb6   :  { %625 = vmatprep.subr.bf16.mxu1 %v2550_v39 }
  0xb8   :  { %585 = vmatpush1.bf16.msra.mxu0 %v2534_v36 }
  0xb9   :  { %586 = vmatprep.subr.bf16.mxu0 %v2536_v37  ;;  %626 = vmatpush1.bf16.msra.mxu1 %v2553_v44  ;;  %v152_v44 = vld [vmem:[#allocation5] sm:$0xff] }
  0xba   :  { %627 = vmatprep.subr.bf16.mxu1 %v2556_v46 }
  0xbc   :  { %587 = vmatpush1.bf16.msra.mxu0 %v2540_v40 }
  0xbd   :  { %588 = vmatprep.subr.bf16.mxu0 %v2542_v42  ;;  %628 = vmatpush1.bf16.msra.mxu1 %v2559_v48 }
  0xbe   :  { %629 = vmatprep.subr.bf16.mxu1 %v2562_v49 }
  0xc0   :  { %589 = vmatpush1.bf16.msra.mxu0 %v2546_v45 }
  0xc1   :  { %590 = vmatprep.subr.bf16.mxu0 %v2548_v47  ;;  %630 = vmatpush1.bf16.msra.mxu1 %v2565_v52 }
  0xc2   :  { %631 = vmatprep.subr.bf16.mxu1 %v2568_v53 }
  0xc4   :  { %591 = vmatpush1.bf16.msra.mxu0 %v2552_v50 }
  0xc5   :  { %592 = vmatprep.subr.bf16.mxu0 %v2554_v51  ;;  %632 = vmatpush1.bf16.msra.mxu1 %v2571_v56  ;;  %v2931_v56 = vmov 1966171168  }
  0xc6   :  { %633 = vmatprep.subr.bf16.mxu1 %v2574_v57  ;;  %v790_v57 = vunpack.c.l.s4 %v2931_v56 }
  0xc8   :  { %593 = vmatpush1.bf16.msra.mxu0 %v2558_v54 }
  0xc9   :  { %594 = vmatprep.subr.bf16.mxu0 %v2560_v55  ;;  %634 = vmatpush1.bf16.msra.mxu1 %v2576_v60  ;;  %v3168_v55 = vld [vmem:[#allocation7] sm:$0xf] }
  0xca   :  { %635 = vmatprep.subr.bf16.mxu1 %v2577_v61 }
  0xcc   :  { %595 = vmatpush1.bf16.msra.mxu0 %v2564_v58  ;;  %v791_v58 = vunpack.c.0.s8 %v790_v57 }
  0xcd   :  { %596 = vmatprep.subr.bf16.mxu0 %v2566_v59  ;;  %636 = vmatpush1.bf16.msra.mxu1 %v2579_v63 }
  0xce   :  { %637 = vmatprep.subr.bf16.mxu1 %v2580_v0  ;;  %v3172_v59 = vsub.s32 %v791_v58, %v220_v13 }
  0xd0   :  { %597 = vmatpush1.bf16.msra.mxu0 %v2570_v62 }
  0xd1   :  { %638 = vmatpush1.bf16.msra.mxu1 %v2582_v2  ;;  %2286 = vmatprep.subr.bf16.mxu0 %v2929_v4 }
  0xd2   :  { %2306 = vmatprep.subr.bf16.mxu1 %v2929_v4 }
  0xd3   :  { %599 = vmatmul.mubr.bf16.vlgmr.msra.gmra.mrb[0].mxu0 %v2100_v1 }
  0xd4   :  { %640 = vmatmul.mubr.bf16.vlgmr.msra.gmra.mrb[0].mxu1 %v2100_v1  ;;  %2287 = vmatpush3.bf16.msra.mxu0 %v2583_v3 }
  0xd5   :  { %2288 = vmatprep.subr.bf16.mxu0 %v2929_v4  ;;  %2302 = vmatprep.mubr.msk.bf16.mxu0 %vm2930_vm0, %v2929_v4 }
  0xd6   :  { %2308 = vmatprep.mubr.msk.bf16.mxu1 %vm2930_vm0, %v2929_v4 }
  0xd8   :  { %2289 = vmatpush3.bf16.msra.mxu0 %v2584_v5 }
  0xd9   :  { %2290 = vmatprep.subr.bf16.mxu0 %v2929_v4 }
  0xda   :  { %2307 = vmatpush3.bf16.xpose.msra.mxu1 %v3168_v55 }
  0xdb   :  { %2312 = vmatprep.subr.bf16.mxu1 %v2929_v4 }
  0xdc   :  { %2291 = vmatpush3.bf16.msra.mxu0 %v2585_v6 }
  0xdd   :  { %2292 = vmatprep.subr.bf16.mxu0 %v2929_v4 }
  0xe0   :  { %2293 = vmatpush3.bf16.msra.mxu0 %v2586_v7  ;;  %v3177_v7 = vld [vmem:[#allocation7 + $0x4] sm:$0xf] }
  0xe1   :  { %2294 = vmatprep.subr.bf16.mxu0 %v2929_v4 }
  0xe4   :  { %2295 = vmatpush3.bf16.msra.mxu0 %v2587_v8 }
  0xe5   :  { %2296 = vmatprep.subr.bf16.mxu0 %v2929_v4 }
  0xe8   :  { %2297 = vmatpush3.bf16.msra.mxu0 %v2588_v9 }
  0xe9   :  { %2298 = vmatprep.subr.bf16.mxu0 %v2929_v4 }
  0xec   :  { %2299 = vmatpush3.bf16.msra.mxu0 %v2589_v10 }
  0xed   :  { %2300 = vmatprep.subr.bf16.mxu0 %v2929_v4 }
  0xf0   :  { %2301 = vmatpush3.bf16.msra.mxu0 %v2590_v11 }
  0xf1   :  { %2354 = vmatprep.subr.bf16.mxu0 %v2929_v4 }
 0x1a6   :  { %v600_v20 = vpop.f32.mrb[0].mxu0 }
 0x1a7   :  { %v601_v21 = vadd.f32 %v600_v20, %v222_v17  ;;  %v602_v22 = vpop.f32.mrb[1].mxu0  ;;  %v641_v30 = vpop.f32.mrb[0].mxu1 }
 0x1a8   :  { %v603_v23 = vadd.f32 %v602_v22, %v226_v18  ;;  %v604_v24 = vpop.f32.mrb[2].mxu0  ;;  %v643_v31 = vpop.f32.mrb[1].mxu1  ;;  %v642_v37 = vadd.f32 %v641_v30, %v230_v34 }
 0x1a9   :  { %v2166_v25 = vmul.f32 -1.442695, %v601_v21  ;;  %v605_v26 = vpop.f32.mrb[3].mxu0  ;;  %v644_v32 = vadd.f32 %v643_v31, %v234_v27  ;;  %v645_v33 = vpop.f32.mrb[2].mxu1  ;;  %v3199_v21 = vld [vmem:[#allocation7 + $0x10] sm:$0xf] }
 0x1aa   :  { %v2167_v28 = vmul.f32 -1.442695, %v603_v23  ;;  %v646_v35 = vpop.f32.mrb[3].mxu1  ;;  %v3206_v24 = vld [vmem:[#allocation7 + $0x14] sm:$0xf] }
 0x1ab   :  { %2615 = vpow2.f32 %v2166_v25  ;;  %v2168_v36 = vmul.f32 -1.442695, %v644_v32  ;;  %v3220_v32 = vld [vmem:[#allocation7 + $0x1c] sm:$0xf] }
 0x1ac   :  { %2617 = vpow2.f32 %v2167_v28 }
 0x1ad   :  { %2619 = vpow2.f32 %v2168_v36 }
 0x1ae   :  { %2621 = vtanh.f32 %v642_v37 }
 0x1b5   :  { %v2616_v38 = vpop.eup %2615 }
 0x1b6   :  { %v2618_v39 = vpop.eup %2617  ;;  %v651_v40 = vadd.f32 1.0, %v2616_v38 }
 0x1b7   :  { %v657_v41 = vadd.f32 1.0, %v2618_v39  ;;  %v2620_v42 = vpop.eup %2619 }
 0x1b8   :  { %2623 = vrcp.f32 %v651_v40  ;;  %v2622_v43 = vpop.eup %2621  ;;  %v664_v46 = vadd.f32 1.0, %v2620_v42 }
 0x1b9   :  { %2625 = vrcp.f32 %v657_v41 }
 0x1ba   :  { %2627 = vrcp.f32 %v664_v46 }
 0x1c2   :  { %v2624_v45 = vpop.eup %2623 }
 0x1c3   :  { %v2626_v47 = vpop.eup %2625  ;;  %v668_v48 = vmul.f32 %v2624_v45, %v2622_v43 }
 0x1c4   :  { %v667_v49 = vmul.f32 %v2626_v47, %v152_v44  ;;  %v2628_v51 = vpop.eup %2627 }
 0x1c6   :  { %v669_v50 = vadd.f32 %v668_v48, %v667_v49 }
 0x1c8   :  { %2629 = vtanh.f32 %v669_v50  ;;  %673 = vst [vmem:[#allocation17] sm:$0xff] %v669_v50 }
 0x1d2   :  { %v2630_v52 = vpop.eup %2629 }
 0x1d3   :  { %v671_v53 = vmul.f32 %v2630_v52, %v2628_v51 }
 0x1d5   :  { %v3163_v54 = vpack.c.bf16 %v671_v53, %v671_v53  ;;  %672 = vst [vmem:[#allocation16] sm:$0xff] %v671_v53 }
 0x1d7   :  { %2303 = vmatmul.mubr.bf16.vlgmr.msra.gmra.mrb[4].mxu0 %v3163_v54 }
 0x1d8   :  { %2356 = vmatprep.mubr.msk.bf16.mxu0 %vm2930_vm0, %v2929_v4 }
 0x2aa   :  { %v781_v60 = vpop.f32.mrb[4].mxu0 }
 0x2ab   :  { %v787_v61 = vpack.c.bf16 %v781_v60, %v781_v60  ;;  %v2304_v62 = vpop.f32.mrb[5].mxu0 }
 0x2ac   :  { %v784_v63 = vpop.f32.mrb[6].mxu0 }
 0x2ad   :  { %v795_v0 = vrot.slane %v787_v61, %v3172_v59  ;;  %v2305_v1 = vpop.f32.mrb[7].mxu0 }
 0x2af   :  { %v803_v2 = vrot.slane %v795_v0, %v3172_v59  ;;  %v796_v8 = vcombine.high %v795_v0, %v795_v0 }
 0x2b1   :  { %v2177_v3 = vpack.i.b16 %v803_v2, %v803_v2  ;;  %v814_v5 = vunpack.i.h.s16 %v803_v2  ;;  %v810_v10 = vrot.slane %v796_v8, %v3172_v59  ;;  %v811_v19 = vcombine.high %v803_v2, %v803_v2 }
 0x2b3   :  { %v825_v6 = vrot.slane %v2177_v3, %v3157_v14  ;;  %v867_v9 = vpack.i.b16 %v814_v5, %v814_v5  ;;  %v2178_v13 = vpack.i.b16 %v810_v10, %v810_v10  ;;  %v816_v17 = vunpack.i.h.s16 %v810_v10 }
 0x2b4   :  { %v2179_v22 = vpack.i.b16 %v811_v19, %v811_v19  ;;  %v818_v25 = vunpack.i.h.s16 %v811_v19  ;;  %v812_v27 = vcombine.high %v810_v10, %v810_v10 }
 0x2b5   :  { %2309 = vmatmul.mubr.bf16.vlgmr.msra.gmra.mrb[4].mxu1 %v825_v6  ;;  %v871_v11 = vrot.slane %v867_v9, %v3157_v14  ;;  %v917_v15 = vrot.slane %v2178_v13, %v3157_v14  ;;  %v959_v18 = vpack.i.b16 %v816_v17, %v816_v17 }
 0x2b6   :  { %2313 = vmatpush3.bf16.xpose.msra.mxu1 %v3177_v7  ;;  %2314 = vmatprep.mubr.msk.bf16.mxu1 %vm2930_vm0, %v2929_v4  ;;  %v1009_v23 = vrot.slane %v2179_v22, %v3157_v14  ;;  %v1051_v26 = vpack.i.b16 %v818_v25, %v818_v25  ;;  %v2180_v30 = vpack.i.b16 %v812_v27, %v812_v27  ;;  %v820_v33 = vunpack.i.h.s16 %v812_v27 }
 0x2b7   :  { %2318 = vmatprep.subr.bf16.mxu1 %v2929_v4  ;;  %v963_v20 = vrot.slane %v959_v18, %v3157_v14 }
 0x2b8   :  { %v1055_v28 = vrot.slane %v1051_v26, %v3157_v14  ;;  %v1101_v31 = vrot.slane %v2180_v30, %v3157_v14  ;;  %v1143_v34 = vpack.i.b16 %v820_v33, %v820_v33 }
 0x2ba   :  { %v1147_v35 = vrot.slane %v1143_v34, %v3157_v14 }
 0x2bd   :  { %2315 = vmatmul.mubr.bf16.vlgmr.msra.gmra.mrb[8].mxu1 %v871_v11 }
 0x2be   :  { %2319 = vmatpush3.bf16.xpose.msra.mxu1 %v3185_v12  ;;  %2320 = vmatprep.mubr.msk.bf16.mxu1 %vm2930_vm0, %v2929_v4 }
 0x2bf   :  { %2324 = vmatprep.subr.bf16.mxu1 %v2929_v4 }
 0x2c5   :  { %2321 = vmatmul.mubr.bf16.vlgmr.msra.gmra.mrb[12].mxu1 %v917_v15 }
 0x2c6   :  { %2325 = vmatpush3.bf16.xpose.msra.mxu1 %v3192_v16  ;;  %2326 = vmatprep.mubr.msk.bf16.mxu1 %vm2930_vm0, %v2929_v4 }
 0x2c7   :  { %2330 = vmatprep.subr.bf16.mxu1 %v2929_v4 }
 0x2cd   :  { %2327 = vmatmul.mubr.bf16.vlgmr.msra.gmra.mrb[16].mxu1 %v963_v20  ;;  %v1189_v20 = vld [vmem:[%s3387_s3] sm:$0xff]  ;;  %s2932_s3 = smov [#allocation17]  }
 0x2ce   :  { %2331 = vmatpush3.bf16.xpose.msra.mxu1 %v3199_v21  ;;  %2332 = vmatprep.mubr.msk.bf16.mxu1 %vm2930_vm0, %v2929_v4  ;;  %vm1190_vm8 = vcmp.gt.f32.partialorder %v1189_v20, 0.0  ;;  %v2601_v20 = vld [vmem:[#allocation11 + $0x10] sm:$0xff]   ;;  %s2056_s25 = sshll.u32 %s2932_s3, 4  ;;  %s2057_s25 = int_to_ptr.vmem [resolvable:$true] %s2056_s25 }
 0x2cf   :  { %2336 = vmatprep.subr.bf16.mxu1 %v2929_v4  ;;  %s2813_s26 = scalar_lea.vmem %s2057_s25, 128  ;;  %p2818_p9 = scmp.lt.s32.totalorder %s2057_s25, %s2057_s25 }
 0x2d0   :  { %p2814_p8 = scmp.ne.s32.totalorder %s2057_s25, %s2813_s26  ;;  %p2819_p10 = scmp.lt.s32.totalorder %s2813_s26, %s2813_s26 }
 0x2d2   :  { %p2820_p11 = por %p2819_p10, %p2818_p9 }
 0x2d4   :  { %p2821_p12 = pnand %p2820_p11, %p2814_p8 }
 0x2d5   :  { %2333 = vmatmul.mubr.bf16.vlgmr.msra.gmra.mrb[20].mxu1 %v1009_v23 }
 0x2d6   :  { %2337 = vmatpush3.bf16.xpose.msra.mxu1 %v3206_v24  ;;  %2338 = vmatprep.mubr.msk.bf16.mxu1 %vm2930_vm0, %v2929_v4 }
 0x2d7   :  { %2342 = vmatprep.subr.bf16.mxu1 %v2929_v4 }
 0x2dd   :  { %2339 = vmatmul.mubr.bf16.vlgmr.msra.gmra.mrb[24].mxu1 %v1055_v28 }
 0x2de   :  { %2343 = vmatpush3.bf16.xpose.msra.mxu1 %v3213_v29  ;;  %2344 = vmatprep.mubr.msk.bf16.mxu1 %vm2930_vm0, %v2929_v4 }
 0x2df   :  { %2348 = vmatprep.subr.bf16.mxu1 %v2929_v4 }
 0x2e5   :  { %2345 = vmatmul.mubr.bf16.vlgmr.msra.gmra.mrb[28].mxu1 %v1101_v31 }
 0x2e6   :  { %2349 = vmatpush3.bf16.xpose.msra.mxu1 %v3220_v32  ;;  %2350 = vmatprep.mubr.msk.bf16.mxu1 %vm2930_vm0, %v2929_v4 }
 0x2e7   :  { %2360 = vmatprep.subr.bf16.mxu1 %v2929_v4 }
 0x2ed   :  { %2351 = vmatmul.mubr.bf16.vlgmr.msra.gmra.mrb[32].mxu1 %v1147_v35 }
 0x2ee   :  { %2362 = vmatprep.mubr.msk.bf16.mxu1 %vm2930_vm0, %v2929_v4 }
 0x388   :  { %v861_v36 = vpop.f32.mrb[4].mxu1 }
 0x389   :  { %v2310_v37 = vpop.f32.mrb[5].mxu1 }
 0x38a   :  { %v864_v38 = vpop.f32.mrb[6].mxu1 }
 0x38b   :  { %v2311_v39 = vpop.f32.mrb[7].mxu1  ;;  %v1279_v38 = vsel %vm1277_vm10, %v3168_v55, 0 }
 0x38c   :  { %v1330_v39 = vsel %vm1277_vm10, %v3177_v7, 0  ;;  %2355 = vmatpush3.bf16.msra.mxu0 %v1279_v38 }
 0x38d   :  { %2361 = vmatpush3.bf16.msra.mxu1 %v1330_v39  ;;  %2366 = vmatprep.subr.bf16.mxu0 %v2929_v4 }
 0x38e   :  { %2372 = vmatprep.subr.bf16.mxu1 %v2929_v4 }
 0x390   :  { %v907_v40 = vpop.f32.mrb[8].mxu1 }
 0x391   :  { %v1199_v41 = vrot.slane %v907_v40, 7  ;;  %v2316_v42 = vpop.f32.mrb[9].mxu1 }
 0x392   :  { %v910_v43 = vpop.f32.mrb[10].mxu1 }
 0x393   :  { %v1201_v44 = vsel %vm1200_vm1, %v1199_v41, %v861_v36  ;;  %v2317_v45 = vpop.f32.mrb[11].mxu1 }
 0x398   :  { %v953_v46 = vpop.f32.mrb[12].mxu1 }
 0x399   :  { %v1202_v47 = vrot.slane %v953_v46, 6  ;;  %v2322_v48 = vpop.f32.mrb[13].mxu1 }
 0x39a   :  { %v956_v49 = vpop.f32.mrb[14].mxu1 }
 0x39b   :  { %v1204_v50 = vsel %vm1203_vm2, %v1202_v47, %v1201_v44  ;;  %v2323_v51 = vpop.f32.mrb[15].mxu1  ;;  %v1381_v49 = vsel %vm1277_vm10, %v3185_v12, 0 }
 0x3a0   :  { %v999_v52 = vpop.f32.mrb[16].mxu1 }
 0x3a1   :  { %v1205_v53 = vrot.slane %v999_v52, 5  ;;  %v2328_v56 = vpop.f32.mrb[17].mxu1  ;;  %v1432_v52 = vsel %vm1277_vm10, %v3192_v16, 0 }
 0x3a2   :  { %v1002_v57 = vpop.f32.mrb[18].mxu1 }
 0x3a3   :  { %v1207_v58 = vsel %vm1206_vm3, %v1205_v53, %v1204_v50  ;;  %v2329_v60 = vpop.f32.mrb[19].mxu1  ;;  %v1483_v57 = vsel %vm1277_vm10, %v3199_v21, 0 }
 0x3a4   :  { %v1534_v60 = vsel %vm1277_vm10, %v3206_v24, 0 }
 0x3a8   :  { %v1045_v61 = vpop.f32.mrb[20].mxu1 }
 0x3a9   :  { %v1208_v62 = vrot.slane %v1045_v61, 4  ;;  %v2334_v63 = vpop.f32.mrb[21].mxu1 }
 0x3aa   :  { %v1048_v0 = vpop.f32.mrb[22].mxu1 }
 0x3ab   :  { %v1210_v1 = vsel %vm1209_vm4, %v1208_v62, %v1207_v58  ;;  %v2335_v2 = vpop.f32.mrb[23].mxu1  ;;  %v1585_v0 = vsel %vm1277_vm10, %v3213_v29, 0 }
 0x3ac   :  { %v1636_v2 = vsel %vm1277_vm10, %v3220_v32, 0 }
 0x3b0   :  { %v1091_v3 = vpop.f32.mrb[24].mxu1 }
 0x3b1   :  { %v1211_v5 = vrot.slane %v1091_v3, 3  ;;  %v2340_v6 = vpop.f32.mrb[25].mxu1 }
 0x3b2   :  { %v1094_v8 = vpop.f32.mrb[26].mxu1  ;;  %v2591_v6 = vld [vmem:[#allocation13] sm:$0xff]  }
 0x3b3   :  { %v1213_v9 = vsel %vm1212_vm5, %v1211_v5, %v1210_v1  ;;  %v2341_v10 = vpop.f32.mrb[27].mxu1 }
 0x3b4   :  { %v2593_v10 = vld [vmem:[#allocation13 + $0x10] sm:$0xff]  }
 0x3b8   :  { %v1137_v11 = vpop.f32.mrb[28].mxu1 }
 0x3b9   :  { %v1214_v13 = vrot.slane %v1137_v11, 2  ;;  %v2346_v15 = vpop.f32.mrb[29].mxu1  ;;  %v2594_v11 = vld [vmem:[#allocation13 + $0x18] sm:$0xff]  }
 0x3ba   :  { %v1140_v17 = vpop.f32.mrb[30].mxu1  ;;  %v2597_v15 = vld [vmem:[#allocation13 + $0x30] sm:$0xff]  }
 0x3bb   :  { %v2347_v18 = vpop.f32.mrb[31].mxu1  ;;  %v1216_v19 = vsel %vm1215_vm6, %v1214_v13, %v1213_v9  ;;  %v2592_v9 = vld [vmem:[#allocation13 + $0x8] sm:$0xff]   ;;  %v2598_v17 = vld [vmem:[#allocation13 + $0x38] sm:$0xff]  }
 0x3bc   :  { %v2596_v13 = vld [vmem:[#allocation13 + $0x28] sm:$0xff]   ;;  %v2599_v18 = vld [vmem:[#allocation11] sm:$0xff]  }
 0x3c0   :  { %v1183_v22 = vpop.f32.mrb[32].mxu1 }
 0x3c1   :  { %v1217_v23 = vrot.slane %v1183_v22, 1  ;;  %v2352_v25 = vpop.f32.mrb[33].mxu1  ;;  %v2602_v22 = vld [vmem:[#allocation11 + $0x18] sm:$0xff]  }
 0x3c2   :  { %v1186_v26 = vpop.f32.mrb[34].mxu1  ;;  %v2605_v25 = vld [vmem:[#allocation11 + $0x30] sm:$0xff]  }
 0x3c3   :  { %v2353_v27 = vpop.f32.mrb[35].mxu1  ;;  %v1219_v28 = vsel %vm1218_vm7, %v1217_v23, %v1216_v19  ;;  %v2600_v19 = vld [vmem:[#allocation11 + $0x8] sm:$0xff]   ;;  %v2606_v26 = vld [vmem:[#allocation11 + $0x38] sm:$0xff]  }
 0x3c4   :  { %v1221_v30 = vsel %vm1190_vm8, %v1219_v28, -1e+30  ;;  %v2604_v23 = vld [vmem:[#allocation11 + $0x28] sm:$0xff]   ;;  %v2607_v27 = vld [vmem:[#allocation14] sm:$0xff]  }
 0x3c5   :  { %v1223_v31 = vsel %vm1222_vm9, %v1221_v30, -inf  ;;  %v2608_v28 = vld [vmem:[#allocation14 + $0x8] sm:$0xff]  }
 0x3c6   :  { %1224 = vmax.xlane.f32.xlu0 %v1223_v31  ;;  %v2610_v31 = vld [vmem:[#allocation14 + $0x18] sm:$0xff]  }
 0x453   :  { %v1225_v33 = vpop.xlane.xlu0 %1224 }
 0x454   :  { %v1226_v34 = vsub.f32 %v1221_v30, %v1225_v33  ;;  %v2609_v30 = vld [vmem:[#allocation14 + $0x10] sm:$0xff]   ;;  %v2611_v33 = vld [vmem:[#allocation14 + $0x20] sm:$0xff]  }
 0x456   :  { %v1227_v35 = vmul.f32 1.442695, %v1226_v34 }
 0x458   :  { %2631 = vpow2.f32 %v1227_v35 }
 0x462   :  { %v2632_v36 = vpop.eup %2631 }
 0x463   :  { %v1229_v37 = vsel %vm1222_vm9, %v2632_v36, 0.0 }
 0x464   :  { %1230 = vadd.xlane.f32.xlu0 %v1229_v37 }
 0x4f1   :  { %v1231_v40 = vpop.xlane.xlu0 %1230 }
 0x4f2   :  { %2633 = vrcp.f32 %v1231_v40 }
 0x4fc   :  { %v2634_v41 = vpop.eup %2633 }
 0x4fd   :  { %v1233_v42 = vmul.f32 %v2634_v41, %v2632_v36 }
 0x4ff   :  { %v1235_v43 = vpack.c.bf16 %v1233_v42, %v1233_v42  ;;  %1234 = vst.msk [vmem:[#allocation19] sm:$0xff] %vm1222_vm9, %v1233_v42 }
 0x501   :  { %v1243_v44 = vrot.slane %v1235_v43, %v3172_v59 }
 0x503   :  { %v1244_v45 = vcombine.high %v1243_v44, %v1243_v44  ;;  %v1251_v55 = vrot.slane %v1243_v44, %v3172_v59 }
 0x505   :  { %v2181_v46 = vpack.i.b16 %v1251_v55, %v1251_v55  ;;  %v1262_v7 = vunpack.i.h.s16 %v1251_v55  ;;  %v1258_v47 = vrot.slane %v1244_v45, %v3172_v59  ;;  %v1259_v56 = vcombine.high %v1251_v55, %v1251_v55 }
 0x507   :  { %v1273_v48 = vrot.slane %v2181_v46, %v3157_v14  ;;  %v1321_v50 = vpack.i.b16 %v1262_v7, %v1262_v7  ;;  %v1264_v53 = vunpack.i.h.s16 %v1258_v47  ;;  %v2184_v59 = vpack.i.b16 %v1258_v47, %v1258_v47 }
 0x508   :  { %v1266_v61 = vunpack.i.h.s16 %v1259_v56  ;;  %v2187_v62 = vpack.i.b16 %v1259_v56, %v1259_v56  ;;  %v1260_v63 = vcombine.high %v1258_v47, %v1258_v47 }
 0x509   :  { %2357 = vmatmul.mubr.msk.bf16.vlgmr.msra.gmra.mrb[8].mxu0 %vm1222_vm9, %v1273_v48  ;;  %v1325_v51 = vrot.slane %v1321_v50, %v3157_v14  ;;  %v1423_v12 = vpack.i.b16 %v1264_v53, %v1264_v53  ;;  %v1376_v16 = vrot.slane %v2184_v59, %v3157_v14 }
 0x50a   :  { %2367 = vmatpush3.bf16.msra.mxu0 %v1381_v49  ;;  %2368 = vmatprep.mubr.msk.bf16.mxu0 %vm2930_vm0, %v2929_v4  ;;  %v1525_v21 = vpack.i.b16 %v1266_v61, %v1266_v61  ;;  %v1478_v24 = vrot.slane %v2187_v62, %v3157_v14  ;;  %v1268_v3 = vunpack.i.h.s16 %v1260_v63  ;;  %v2190_v5 = vpack.i.b16 %v1260_v63, %v1260_v63 }
 0x50b   :  { %2363 = vmatmul.mubr.msk.bf16.vlgmr.msra.gmra.mrb[36].mxu1 %vm1222_vm9, %v1325_v51  ;;  %2378 = vmatprep.subr.bf16.mxu0 %v2929_v4  ;;  %v1427_v58 = vrot.slane %v1423_v12, %v3157_v14 }
 0x50c   :  { %2373 = vmatpush3.bf16.msra.mxu1 %v1432_v52  ;;  %2374 = vmatprep.mubr.msk.bf16.mxu1 %vm2930_vm0, %v2929_v4  ;;  %v1529_v1 = vrot.slane %v1525_v21, %v3157_v14  ;;  %v1627_v29 = vpack.i.b16 %v1268_v3, %v1268_v3  ;;  %v1580_v32 = vrot.slane %v2190_v5, %v3157_v14 }
 0x50d   :  { %2384 = vmatprep.subr.bf16.mxu1 %v2929_v4 }
 0x50e   :  { %v1631_v8 = vrot.slane %v1627_v29, %v3157_v14  ;;  %v2595_v14 = vld [vmem:[#allocation13 + $0x20] sm:$0xff]  }
 0x511   :  { %2369 = vmatmul.mubr.msk.bf16.vlgmr.msra.gmra.mrb[12].mxu0 %vm1222_vm9, %v1376_v16 }
 0x512   :  { %2379 = vmatpush3.bf16.msra.mxu0 %v1483_v57  ;;  %2380 = vmatprep.mubr.msk.bf16.mxu0 %vm2930_vm0, %v2929_v4 }
 0x513   :  { %2375 = vmatmul.mubr.msk.bf16.vlgmr.msra.gmra.mrb[40].mxu1 %vm1222_vm9, %v1427_v58  ;;  %2390 = vmatprep.subr.bf16.mxu0 %v2929_v4 }
 0x514   :  { %2385 = vmatpush3.bf16.msra.mxu1 %v1534_v60  ;;  %2386 = vmatprep.mubr.msk.bf16.mxu1 %vm2930_vm0, %v2929_v4 }
 0x515   :  { %2396 = vmatprep.subr.bf16.mxu1 %v2929_v4 }
 0x519   :  { %2381 = vmatmul.mubr.msk.bf16.vlgmr.msra.gmra.mrb[16].mxu0 %vm1222_vm9, %v1478_v24 }
 0x51a   :  { %2391 = vmatpush3.bf16.msra.mxu0 %v1585_v0  ;;  %2392 = vmatprep.mubr.msk.bf16.mxu0 %vm2930_vm0, %v2929_v4 }
 0x51b   :  { %2387 = vmatmul.mubr.msk.bf16.vlgmr.msra.gmra.mrb[44].mxu1 %vm1222_vm9, %v1529_v1  ;;  %2402 = vmatprep.subr.bf16.mxu0 %v2929_v4 }
 0x51c   :  { %2397 = vmatpush3.bf16.msra.mxu1 %v1636_v2  ;;  %2398 = vmatprep.mubr.msk.bf16.mxu1 %vm2930_vm0, %v2929_v4 }
 0x51d   :  { %2442 = vmatprep.subr.bf16.mxu1 %v2929_v4 }
 0x521   :  { %2393 = vmatmul.mubr.msk.bf16.vlgmr.msra.gmra.mrb[20].mxu0 %vm1222_vm9, %v1580_v32 }
 0x522   :  { %2403 = vmatpush3.bf16.msra.mxu0 %v2591_v6  ;;  %2418 = vmatprep.mubr.msk.bf16.mxu0 %vm2930_vm0, %v2929_v4 }
 0x523   :  { %2399 = vmatmul.mubr.msk.bf16.vlgmr.msra.gmra.mrb[48].mxu1 %vm1222_vm9, %v1631_v8  ;;  %2404 = vmatprep.subr.bf16.mxu0 %v2929_v4 }
 0x524   :  { %2458 = vmatprep.mubr.msk.bf16.mxu1 %vm2930_vm0, %v2929_v4  ;;  %2443 = vmatpush3.bf16.msra.mxu1 %v2607_v27 }
 0x525   :  { %2444 = vmatprep.subr.bf16.mxu1 %v2929_v4 }
 0x526   :  { %2405 = vmatpush3.bf16.msra.mxu0 %v2592_v9 }
 0x527   :  { %2406 = vmatprep.subr.bf16.mxu0 %v2929_v4 }
 0x528   :  { %2445 = vmatpush3.bf16.msra.mxu1 %v2608_v28 }
 0x529   :  { %2446 = vmatprep.subr.bf16.mxu1 %v2929_v4 }
 0x52a   :  { %2407 = vmatpush3.bf16.msra.mxu0 %v2593_v10 }
 0x52b   :  { %2408 = vmatprep.subr.bf16.mxu0 %v2929_v4 }
 0x52c   :  { %2447 = vmatpush3.bf16.msra.mxu1 %v2609_v30 }
 0x52d   :  { %2448 = vmatprep.subr.bf16.mxu1 %v2929_v4 }
 0x52e   :  { %2409 = vmatpush3.bf16.msra.mxu0 %v2594_v11 }
 0x52f   :  { %2410 = vmatprep.subr.bf16.mxu0 %v2929_v4 }
 0x530   :  { %2449 = vmatpush3.bf16.msra.mxu1 %v2610_v31 }
 0x531   :  { %2450 = vmatprep.subr.bf16.mxu1 %v2929_v4 }
 0x532   :  { %2411 = vmatpush3.bf16.msra.mxu0 %v2595_v14 }
 0x533   :  { %2412 = vmatprep.subr.bf16.mxu0 %v2929_v4 }
 0x534   :  { %2451 = vmatpush3.bf16.msra.mxu1 %v2611_v33 }
 0x535   :  { %2452 = vmatprep.subr.bf16.mxu1 %v2929_v4 }
 0x536   :  { %2413 = vmatpush3.bf16.msra.mxu0 %v2596_v13 }
 0x537   :  { %2414 = vmatprep.subr.bf16.mxu0 %v2929_v4 }
 0x53a   :  { %2415 = vmatpush3.bf16.msra.mxu0 %v2597_v15 }
 0x53b   :  { %2416 = vmatprep.subr.bf16.mxu0 %v2929_v4 }
 0x53e   :  { %2417 = vmatpush3.bf16.msra.mxu0 %v2598_v17 }
 0x53f   :  { %2422 = vmatprep.subr.bf16.mxu0 %v2929_v4 }
 0x541   :  { %2419 = vmatmul.mubr.bf16.vlgmr.msra.gmra.mrb[24].mxu0 %v3163_v54  ;;  %v2603_v54 = vld [vmem:[#allocation11 + $0x20] sm:$0xff]  }
 0x542   :  { %2438 = vmatprep.mubr.msk.bf16.mxu0 %vm2930_vm0, %v2929_v4  ;;  %2423 = vmatpush3.bf16.msra.mxu0 %v2599_v18 }
 0x543   :  { %2424 = vmatprep.subr.bf16.mxu0 %v2929_v4 }
 0x546   :  { %2425 = vmatpush3.bf16.msra.mxu0 %v2600_v19 }
 0x547   :  { %2426 = vmatprep.subr.bf16.mxu0 %v2929_v4 }
 0x54a   :  { %2427 = vmatpush3.bf16.msra.mxu0 %v2601_v20 }
 0x54b   :  { %2428 = vmatprep.subr.bf16.mxu0 %v2929_v4 }
 0x54e   :  { %2429 = vmatpush3.bf16.msra.mxu0 %v2602_v22 }
 0x54f   :  { %2430 = vmatprep.subr.bf16.mxu0 %v2929_v4 }
 0x552   :  { %2431 = vmatpush3.bf16.msra.mxu0 %v2603_v54 }
 0x553   :  { %2432 = vmatprep.subr.bf16.mxu0 %v2929_v4 }
 0x556   :  { %2433 = vmatpush3.bf16.msra.mxu0 %v2604_v23 }
 0x557   :  { %2434 = vmatprep.subr.bf16.mxu0 %v2929_v4 }
 0x55a   :  { %2435 = vmatpush3.bf16.msra.mxu0 %v2605_v25 }
 0x55b   :  { %2436 = vmatprep.subr.bf16.mxu0 %v2929_v4 }
 0x55e   :  { %2437 = vmatpush3.bf16.msra.mxu0 %v2606_v26 }
 0x5dc   :  { %v1315_v34 = vpop.f32.mrb[8].mxu0 }
 0x5dd   :  { %v2358_v35 = vpop.f32.mrb[9].mxu0  ;;  %v1678_v38 = vpack.c.bf16 %v1315_v34, %v1315_v34  ;;  %v2612_v34 = vld [vmem:[#allocation14 + $0x28] sm:$0xff]  }
 0x5de   :  { %v1318_v36 = vpop.f32.mrb[10].mxu0  ;;  %v1366_v37 = vpop.f32.mrb[36].mxu1  ;;  %2453 = vmatpush3.bf16.msra.mxu1 %v2612_v34  ;;  %v2613_v35 = vld [vmem:[#allocation14 + $0x30] sm:$0xff]  }
 0x5df   :  { %v1679_v39 = vpack.c.bf16 %v1366_v37, %v1366_v37  ;;  %v2359_v40 = vpop.f32.mrb[11].mxu0  ;;  %v2364_v41 = vpop.f32.mrb[37].mxu1  ;;  %v1814_v45 = vunpack.c.l.b16 %v1678_v38  ;;  %2454 = vmatprep.subr.bf16.mxu1 %v2929_v4  ;;  %v2614_v36 = vld [vmem:[#allocation14 + $0x38] sm:$0xff]  }
 0x5e0   :  { %v1369_v42 = vpop.f32.mrb[38].mxu1 }
 0x5e1   :  { %v1815_v43 = vunpack.c.l.b16 %v1679_v39  ;;  %v2365_v44 = vpop.f32.mrb[39].mxu1 }
 0x5e2   :  { %2455 = vmatpush3.bf16.msra.mxu1 %v2613_v35 }
 0x5e3   :  { %v1822_v55 = vrot.slane %v1815_v43, 7  ;;  %2456 = vmatprep.subr.bf16.mxu1 %v2929_v4 }
 0x5e4   :  { %v1417_v46 = vpop.f32.mrb[12].mxu0 }
 0x5e5   :  { %v1823_v7 = vsel %vm1200_vm1, %v1822_v55, %v1814_v45  ;;  %v1680_v47 = vpack.c.bf16 %v1417_v46, %v1417_v46  ;;  %v2370_v48 = vpop.f32.mrb[13].mxu0 }
 0x5e6   :  { %v1420_v49 = vpop.f32.mrb[14].mxu0  ;;  %v1468_v50 = vpop.f32.mrb[40].mxu1  ;;  %2457 = vmatpush3.bf16.msra.mxu1 %v2614_v36 }
 0x5e7   :  { %v1816_v51 = vunpack.c.l.b16 %v1680_v47  ;;  %v1681_v52 = vpack.c.bf16 %v1468_v50, %v1468_v50  ;;  %v2371_v53 = vpop.f32.mrb[15].mxu0  ;;  %v2376_v59 = vpop.f32.mrb[41].mxu1 }
 0x5e8   :  { %v1471_v12 = vpop.f32.mrb[42].mxu1 }
 0x5e9   :  { %v1824_v56 = vrot.slane %v1816_v51, 6  ;;  %v1817_v16 = vunpack.c.l.b16 %v1681_v52  ;;  %v2377_v57 = vpop.f32.mrb[43].mxu1 }
 0x5eb   :  { %v1825_v58 = vsel %vm1203_vm2, %v1824_v56, %v1823_v7  ;;  %v1826_v60 = vrot.slane %v1817_v16, 5 }
 0x5ec   :  { %v1519_v61 = vpop.f32.mrb[16].mxu0 }
 0x5ed   :  { %v1827_v62 = vsel %vm1206_vm3, %v1826_v60, %v1825_v58  ;;  %v1682_v21 = vpack.c.bf16 %v1519_v61, %v1519_v61  ;;  %v2382_v63 = vpop.f32.mrb[17].mxu0 }
 0x5ee   :  { %v1522_v24 = vpop.f32.mrb[18].mxu0  ;;  %v1570_v0 = vpop.f32.mrb[44].mxu1 }
 0x5ef   :  { %v1818_v1 = vunpack.c.l.b16 %v1682_v21  ;;  %v1683_v2 = vpack.c.bf16 %v1570_v0, %v1570_v0  ;;  %v2383_v3 = vpop.f32.mrb[19].mxu0  ;;  %v2388_v5 = vpop.f32.mrb[45].mxu1 }
 0x5f0   :  { %v1573_v29 = vpop.f32.mrb[46].mxu1 }
 0x5f1   :  { %v1828_v6 = vrot.slane %v1818_v1, 4  ;;  %v1819_v32 = vunpack.c.l.b16 %v1683_v2  ;;  %v2389_v8 = vpop.f32.mrb[47].mxu1 }
 0x5f3   :  { %v1829_v9 = vsel %vm1209_vm4, %v1828_v6, %v1827_v62  ;;  %v1830_v10 = vrot.slane %v1819_v32, 3 }
 0x5f4   :  { %v1621_v11 = vpop.f32.mrb[20].mxu0 }
 0x5f5   :  { %v1831_v14 = vsel %vm1212_vm5, %v1830_v10, %v1829_v9  ;;  %v1684_v13 = vpack.c.bf16 %v1621_v11, %v1621_v11  ;;  %v2394_v15 = vpop.f32.mrb[21].mxu0 }
 0x5f6   :  { %v1624_v17 = vpop.f32.mrb[22].mxu0  ;;  %v1672_v18 = vpop.f32.mrb[48].mxu1 }
 0x5f7   :  { %v1820_v19 = vunpack.c.l.b16 %v1684_v13  ;;  %v1685_v20 = vpack.c.bf16 %v1672_v18, %v1672_v18  ;;  %v2395_v22 = vpop.f32.mrb[23].mxu0  ;;  %v2400_v54 = vpop.f32.mrb[49].mxu1 }
 0x5f8   :  { %v1675_v23 = vpop.f32.mrb[50].mxu1 }
 0x5f9   :  { %v1832_v25 = vrot.slane %v1820_v19, 2  ;;  %v1821_v26 = vunpack.c.l.b16 %v1685_v20  ;;  %v2401_v27 = vpop.f32.mrb[51].mxu1 }
 0x5fb   :  { %v1833_v28 = vsel %vm1215_vm6, %v1832_v25, %v1831_v14  ;;  %v1834_v30 = vrot.slane %v1821_v26, 1 }
 0x5fd   :  { %v1835_v31 = vsel %vm1218_vm7, %v1834_v30, %v1833_v28 }
 0x5fe   :  { %v1836_v33 = vpack.c.b16 %v1835_v31, %v1835_v31 }
 0x600   :  { %2439 = vmatmul.mubr.bf16.vlgmr.msra.gmra.mrb[24].mxu0 %v1836_v33 }
 0x6d3   :  { %v1920_v37 = vpop.f32.mrb[24].mxu0 }
 0x6d4   :  { %2635 = vtanh.f32 %v1920_v37  ;;  %v2440_v38 = vpop.f32.mrb[25].mxu0 }
 0x6d5   :  { %v1923_v39 = vpop.f32.mrb[26].mxu0 }
 0x6d6   :  { %v2441_v40 = vpop.f32.mrb[27].mxu0 }
 0x6de   :  { %v2636_v41 = vpop.eup %2635 }
 0x6df   :  { %v1927_v42 = vpack.c.bf16 %v2636_v41, %v2636_v41 }
 0x6e1   :  { %2459 = vmatmul.mubr.bf16.vlgmr.msra.gmra.mrb[52].mxu1 %v1927_v42 }
 0x6e2   :  { %2824 = shalt.err (!%p2821_p12)
}
 0x6e3   :  { %s2825_s15 = scalar_lea.hbm %s3396_s12, 128 }
 0x6e4   :  { %p2826_p13 = scmp.ne.s32.totalorder %s3396_s12, %s2825_s15  ;;  %p2829_p0 = scmp.lt.u32.totalorder %s2825_s15, %s3396_s12 }
 0x6e6   :  { %p2831_p1 = pnand %p2829_p0, %p2826_p13 }
 0x6e8   :  { %2834 = shalt.err (!%p2831_p1)
}
 0x6e9   :  { %2059 = dma.vmem_to_hbm [thread:$0]  %s2057_s25, 128, %s3396_s12, [#allocation18]  }
 0x6ea   :  { %s2835_s1 = scalar_lea.vmem %s2047_s0, 128  ;;  %p2840_p3 = scmp.lt.s32.totalorder %s2047_s0, %s2047_s0 }
 0x6eb   :  { %p2836_p2 = scmp.ne.s32.totalorder %s2047_s0, %s2835_s1  ;;  %p2841_p4 = scmp.lt.s32.totalorder %s2835_s1, %s2835_s1 }
 0x6ed   :  { %p2842_p5 = por %p2841_p4, %p2840_p3 }
 0x6ef   :  { %p2843_p6 = pnand %p2842_p5, %p2836_p2 }
 0x6f1   :  { %2846 = shalt.err (!%p2843_p6)
}
 0x6f2   :  { %s2847_s18 = scalar_lea.hbm %s3395_s11, 128 }
 0x6f3   :  { %p2848_p7 = scmp.ne.s32.totalorder %s3395_s11, %s2847_s18  ;;  %p2851_p8 = scmp.lt.u32.totalorder %s2847_s18, %s3395_s11 }
 0x6f5   :  { %p2853_p9 = pnand %p2851_p8, %p2848_p7 }
 0x6f7   :  { %2856 = shalt.err (!%p2853_p9)
}
 0x6f8   :  { %2049 = dma.vmem_to_hbm [thread:$0]  %s2047_s0, 128, %s3395_s11, [#allocation4]  }
 0x6f9   :  { %s2934_s16 = smov [#allocation19]  }
 0x6fa   :  { %s2066_s5 = sshll.u32 %s2934_s16, 4  ;;  %s2067_s5 = int_to_ptr.vmem [resolvable:$true] %s2066_s5 }
 0x6fb   :  { %s2857_s20 = scalar_lea.vmem %s2067_s5, 128  ;;  %p2862_p11 = scmp.lt.s32.totalorder %s2067_s5, %s2067_s5 }
 0x6fc   :  { %p2858_p10 = scmp.ne.s32.totalorder %s2067_s5, %s2857_s20  ;;  %p2863_p12 = scmp.lt.s32.totalorder %s2857_s20, %s2857_s20 }
 0x6fe   :  { %p2864_p13 = por %p2863_p12, %p2862_p11 }
 0x700   :  { %p2865_p0 = pnand %p2864_p13, %p2858_p10 }
 0x702   :  { %2868 = shalt.err (!%p2865_p0)
}
 0x703   :  { %s2869_s27 = scalar_lea.hbm %s3397_s13, 128 }
 0x704   :  { %p2870_p1 = scmp.ne.s32.totalorder %s3397_s13, %s2869_s27  ;;  %p2873_p2 = scmp.lt.u32.totalorder %s2869_s27, %s3397_s13 }
 0x706   :  { %p2875_p3 = pnand %p2873_p2, %p2870_p1 }
 0x708   :  { %2878 = shalt.err (!%p2875_p3)
}
 0x709   :  { %2069 = dma.vmem_to_hbm [thread:$0]  %s2067_s5, 128, %s3397_s13, [#allocation18]   ;;  %v2209_v4 = vld [vmem:[%s3394_s10] ss:$0 sm:$0xff] }
 0x70a   :  { %s2935_s4 = smov [#allocation20]  }
 0x70b   :  { %s2076_s24 = sshll.u32 %s2935_s4, 4  ;;  %s2077_s24 = int_to_ptr.vmem [resolvable:$true] %s2076_s24 }
 0x70c   :  { %s2879_s17 = scalar_lea.vmem %s2077_s24, 128  ;;  %p2884_p5 = scmp.lt.s32.totalorder %s2077_s24, %s2077_s24 }
 0x70d   :  { %p2880_p4 = scmp.ne.s32.totalorder %s2077_s24, %s2879_s17  ;;  %p2885_p6 = scmp.lt.s32.totalorder %s2879_s17, %s2879_s17 }
 0x70f   :  { %p2886_p7 = por %p2885_p6, %p2884_p5 }
 0x711   :  { %p2887_p8 = pnand %p2886_p7, %p2880_p4 }
 0x7b4   :  { %v2033_v43 = vpop.f32.mrb[52].mxu1 }
 0x7b5   :  { %v2034_v44 = vadd.f32 %v2209_v4, %v2033_v43  ;;  %v2460_v45 = vpop.f32.mrb[53].mxu1 }
 0x7b6   :  { %v2036_v55 = vpop.f32.mrb[54].mxu1 }
 0x7b7   :  { %2039 = vst [vmem:[#allocation20] sm:$0xff] %v2034_v44  ;;  %v2461_v46 = vpop.f32.mrb[55].mxu1 }
 0x7b8   :  { %2890 = shalt.err (!%p2887_p8)
}
 0x7b9   :  { %s2891_s10 = scalar_lea.hbm %s3398_s14, 128 }
 0x7ba   :  { %p2892_p9 = scmp.ne.s32.totalorder %s3398_s14, %s2891_s10  ;;  %p2895_p10 = scmp.lt.u32.totalorder %s2891_s10, %s3398_s14 }
 0x7bc   :  { %p2897_p11 = pnand %p2895_p10, %p2892_p9 }
 0x7be   :  { %2900 = shalt.err (!%p2897_p11)
}
 0x7bf   :  { %2079 = dma.vmem_to_hbm [thread:$0]  %s2077_s24, 128, %s3398_s14, [#allocation21]  }
 0x7c0   :  { %2911 = dma.done.wait [#allocation4], 128  }
 0x7c1   :  { %2912 = vsyncadd [#allocation4], 4294967168 }
 0x7c2   :  { %2913 = dma.done.wait [#allocation18], 256  }
 0x7c3   :  { %2914 = vsyncadd [#allocation18], 4294967040 }
 0x7c4   :  { %2915 = dma.done.wait [#allocation21], 128  }
 0x7c5   :  { %2916 = vsyncadd [#allocation21], 4294967168 }
 0x7c6   :  { %2092 = vsyncpa [#allocation3], 1 }
 0x7c7   :  { %2093 = vsyncpa [#allocation6], 1 }
 0x7c8   :  { %2094 = vsyncpa [#allocation9], 1 }
 0x7c9   :  { %2095 = vsyncpa [#allocation12], 1 }
 0x7ca   :  { %2096 = vsyncpa [#allocation15], 1 }
 0x7cb   :  { %2097 = vsyncpa [#allocation4], 1 }
 0x7cc   :  { %2098 = vsyncpa [#allocation18], 1 }
 0x7cd   :  { %2099 = vsyncpa [#allocation21], 1 }

// kernel: tpu_custom_call.1
= control target key start
LH: loop header
LB: loop body
LE: loop exit
PB: predicated region body
PF: predicated region fallthrough
CT: control target
= control target key end

     0   :  { %20 = vsyncpa [#allocation3], 0  ;;  %s3384_s0 = inlined_call_operand.hbm [shape: bf16[8,256], index: 0, kind: input, shape index: {}]   ;;  %s3385_s1 = inlined_call_operand.hbm [shape: f32[8,128], index: 1, kind: input, shape index: {}]   ;;  %s3386_s2 = inlined_call_operand.hbm [shape: bf16[8,8,128], index: 2, kind: input, shape index: {}]   ;;  %s3387_s3 = inlined_call_operand.vmem [shape: f32[8,8], index: 3, kind: input, shape index: {}]   ;;  %s3388_s4 = inlined_call_operand.hbm [shape: bf16[256,512], index: 4, kind: input, shape index: {}]   ;;  %s3389_s5 = inlined_call_operand.vmem [shape: f32[1,512], index: 5, kind: input, shape index: {}]   ;;  %s3390_s6 = inlined_call_operand.hbm [shape: bf16[128,128], index: 6, kind: input, shape index: {}]   ;;  %s3391_s7 = inlined_call_operand.hbm [shape: bf16[128,128], index: 7, kind: input, shape index: {}]   ;;  %s3392_s8 = inlined_call_operand.hbm [shape: bf16[128,128], index: 8, kind: input, shape index: {}]   ;;  %s3393_s9 = inlined_call_operand.hbm [shape: bf16[128,128], index: 9, kind: input, shape index: {}]   ;;  %s3394_s10 = inlined_call_operand.vmem [shape: f32[1,128], index: 10, kind: input, shape index: {}]   ;;  %s3395_s11 = inlined_call_operand.hbm [shape: f32[8,128], index: 11, kind: output, shape index: {0}]   ;;  %s3396_s12 = inlined_call_operand.hbm [shape: f32[8,128], index: 12, kind: output, shape index: {1}]   ;;  %s3397_s13 = inlined_call_operand.hbm [shape: f32[8,8], index: 13, kind: output, shape index: {2}]   ;;  %s3398_s14 = inlined_call_operand.hbm [shape: f32[8,128], index: 14, kind: output, shape index: {3}]  }
   0x1   :  { %21 = vsyncpa [#allocation6], 0 }
   0x2   :  { %22 = vsyncpa [#allocation9], 0 }
   0x3   :  { %23 = vsyncpa [#allocation12], 0 }
   0x4   :  { %24 = vsyncpa [#allocation15], 0 }
   0x5   :  { %25 = vsyncpa [#allocation4], 0 }
   0x6   :  { %26 = vsyncpa [#allocation18], 0 }
   0x7   :  { %27 = vsyncpa [#allocation21], 0  ;;  %s2917_s29 = smov [#allocation5]   ;;  %s2918_s15 = smov [#allocation8]  }
   0x8   :  { %s44_s30 = sshll.u32 %s2917_s29, 4  ;;  %s67_s16 = sshll.u32 %s2918_s15, 4  ;;  %s45_s30 = int_to_ptr.vmem [resolvable:$true] %s44_s30  ;;  %s3011_s16 = int_to_ptr.vmem [resolvable:$true] %s67_s16 }
   0x9   :  { %s2637_s19 = scalar_lea.hbm %s3385_s1, 128 }
   0xa   :  { %p2638_p0 = scmp.ne.s32.totalorder %s3385_s1, %s2637_s19  ;;  %p2641_p1 = scmp.lt.u32.totalorder %s2637_s19, %s3385_s1 }
   0xc   :  { %p2643_p2 = pnand %p2641_p1, %p2638_p0 }
   0xe   :  { %2646 = shalt.err (!%p2643_p2)
}
   0xf   :  { %s2647_s24 = scalar_lea.vmem %s45_s30, 128  ;;  %p2652_p4 = scmp.lt.s32.totalorder %s45_s30, %s45_s30 }
  0x10   :  { %p2648_p3 = scmp.ne.s32.totalorder %s45_s30, %s2647_s24  ;;  %p2653_p5 = scmp.lt.s32.totalorder %s2647_s24, %s2647_s24 }
  0x12   :  { %p2654_p6 = por %p2653_p5, %p2652_p4 }
  0x14   :  { %p2655_p7 = pnand %p2654_p6, %p2648_p3 }
  0x16   :  { %2658 = shalt.err (!%p2655_p7)
}
  0x17   :  { %47 = dma.hbm_to_vmem [thread:$0]  %s3385_s1, 128, %s45_s30, [#allocation6]  }
  0x18   :  { %s2659_s29 = scalar_lea.hbm %s3388_s4, 8192 }
  0x19   :  { %p2660_p8 = scmp.ne.s32.totalorder %s3388_s4, %s2659_s29  ;;  %p2663_p9 = scmp.lt.u32.totalorder %s2659_s29, %s3388_s4 }
  0x1b   :  { %p2665_p10 = pnand %p2663_p9, %p2660_p8 }
  0x1d   :  { %2668 = shalt.err (!%p2665_p10)
}
  0x1e   :  { %s2669_s20 = scalar_lea.vmem %s3011_s16, 8192  ;;  %p2674_p12 = scmp.lt.s32.totalorder %s3011_s16, %s3011_s16 }
  0x1f   :  { %p2670_p11 = scmp.ne.s32.totalorder %s3011_s16, %s2669_s20  ;;  %p2675_p13 = scmp.lt.s32.totalorder %s2669_s20, %s2669_s20 }
  0x21   :  { %p2676_p0 = por %p2675_p13, %p2674_p12 }
  0x23   :  { %p2677_p1 = pnand %p2676_p0, %p2670_p11 }
  0x25   :  { %2680 = shalt.err (!%p2677_p1)
}
  0x26   :  { %s2919_s1 = smov 256   ;;  %s2920_s30 = smov 16  }
  0x27   :  { %73 = dma.hbm_to_vmem [thread:$0]  %s3388_s4, 8192, %s3011_s16, [#allocation9], %s2919_s1, %s2919_s1, %s2920_s30  }
  0x28   :  { %s2921_s23 = smov [#allocation11]   ;;  %s2922_s25 = smov [#allocation2]  }
  0x29   :  { %s93_s24 = sshll.u32 %s2921_s23, 4  ;;  %s34_s26 = sshll.u32 %s2922_s25, 4  ;;  %s94_s24 = int_to_ptr.vmem [resolvable:$true] %s93_s24  ;;  %s35_s26 = int_to_ptr.vmem [resolvable:$true] %s34_s26 }
  0x2a   :  { %s2681_s29 = scalar_lea.hbm %s3391_s7, 1024 }
  0x2b   :  { %p2682_p2 = scmp.ne.s32.totalorder %s3391_s7, %s2681_s29  ;;  %p2685_p3 = scmp.lt.u32.totalorder %s2681_s29, %s3391_s7 }
  0x2d   :  { %p2687_p4 = pnand %p2685_p3, %p2682_p2 }
  0x2f   :  { %2690 = shalt.err (!%p2687_p4)
}
  0x30   :  { %s2691_s4 = scalar_lea.vmem %s94_s24, 1024  ;;  %p2696_p6 = scmp.lt.s32.totalorder %s94_s24, %s94_s24 }
  0x31   :  { %p2692_p5 = scmp.ne.s32.totalorder %s94_s24, %s2691_s4  ;;  %p2697_p7 = scmp.lt.s32.totalorder %s2691_s4, %s2691_s4 }
  0x33   :  { %p2698_p8 = por %p2697_p7, %p2696_p6 }
  0x35   :  { %p2699_p9 = pnand %p2698_p8, %p2692_p5 }
  0x37   :  { %2702 = shalt.err (!%p2699_p9)
}
  0x38   :  { %s2923_s16 = smov 64   ;;  %s2924_s20 = smov 4  }
  0x39   :  { %99 = dma.hbm_to_vmem [thread:$0]  %s3391_s7, 1024, %s94_s24, [#allocation12], %s2923_s16, %s2923_s16, %s2924_s20  }
  0x3a   :  { %s2703_s23 = scalar_lea.hbm %s3384_s0, 128 }
  0x3b   :  { %p2704_p10 = scmp.ne.s32.totalorder %s3384_s0, %s2703_s23  ;;  %p2707_p11 = scmp.lt.u32.totalorder %s2703_s23, %s3384_s0 }
  0x3d   :  { %p2709_p12 = pnand %p2707_p11, %p2704_p10 }
  0x3f   :  { %2712 = shalt.err (!%p2709_p12)
}
  0x40   :  { %s2713_s15 = scalar_lea.vmem %s35_s26, 128  ;;  %p2718_p0 = scmp.lt.s32.totalorder %s35_s26, %s35_s26 }
  0x41   :  { %p2714_p13 = scmp.ne.s32.totalorder %s35_s26, %s2713_s15  ;;  %p2719_p1 = scmp.lt.s32.totalorder %s2713_s15, %s2713_s15 }
  0x43   :  { %p2720_p2 = por %p2719_p1, %p2718_p0 }
  0x45   :  { %p2721_p3 = pnand %p2720_p2, %p2714_p13 }
  0x47   :  { %2724 = shalt.err (!%p2721_p3)
}
  0x48   :  { %37 = dma.hbm_to_vmem [thread:$0]  %s3384_s0, 128, %s35_s26, [#allocation3]  }
  0x49   :  { %s2925_s17 = smov [#allocation7]   ;;  %s2926_s19 = smov [#allocation10]  }
  0x4a   :  { %s53_s18 = sshll.u32 %s2925_s17, 4  ;;  %s81_s4 = sshll.u32 %s2926_s19, 4  ;;  %s54_s18 = int_to_ptr.vmem [resolvable:$true] %s53_s18  ;;  %s3069_s4 = int_to_ptr.vmem [resolvable:$true] %s81_s4 }
  0x4b   :  { %s2725_s21 = scalar_lea.hbm %s3386_s2, 512 }
  0x4c   :  { %p2726_p4 = scmp.ne.s32.totalorder %s3386_s2, %s2725_s21  ;;  %p2729_p5 = scmp.lt.u32.totalorder %s2725_s21, %s3386_s2 }
  0x4e   :  { %p2731_p6 = pnand %p2729_p5, %p2726_p4 }
  0x50   :  { %2734 = shalt.err (!%p2731_p6)
}
  0x51   :  { %s2735_s0 = scalar_lea.vmem %s54_s18, 512  ;;  %p2740_p8 = scmp.lt.s32.totalorder %s54_s18, %s54_s18 }
  0x52   :  { %p2736_p7 = scmp.ne.s32.totalorder %s54_s18, %s2735_s0  ;;  %p2741_p9 = scmp.lt.s32.totalorder %s2735_s0, %s2735_s0 }
  0x54   :  { %p2742_p10 = por %p2741_p9, %p2740_p8 }
  0x56   :  { %p2743_p11 = pnand %p2742_p10, %p2736_p7 }
  0x58   :  { %2746 = shalt.err (!%p2743_p11)
}
  0x59   :  { %59 = dma.hbm_to_vmem [thread:$0]  %s3386_s2, 512, %s54_s18, [#allocation6], %s2923_s16, %s2923_s16, %s2924_s20  }
  0x5a   :  { %s2747_s7 = scalar_lea.hbm %s3390_s6, 1024 }
  0x5b   :  { %p2748_p12 = scmp.ne.s32.totalorder %s3390_s6, %s2747_s7  ;;  %p2751_p13 = scmp.lt.u32.totalorder %s2747_s7, %s3390_s6 }
  0x5d   :  { %p2753_p0 = pnand %p2751_p13, %p2748_p12 }
  0x5f   :  { %2756 = shalt.err (!%p2753_p0)
}
  0x60   :  { %s2757_s30 = scalar_lea.vmem %s3069_s4, 1024  ;;  %p2762_p2 = scmp.lt.s32.totalorder %s3069_s4, %s3069_s4 }
  0x61   :  { %p2758_p1 = scmp.ne.s32.totalorder %s3069_s4, %s2757_s30  ;;  %p2763_p3 = scmp.lt.s32.totalorder %s2757_s30, %s2757_s30 }
  0x63   :  { %p2764_p4 = por %p2763_p3, %p2762_p2 }
  0x65   :  { %p2765_p5 = pnand %p2764_p4, %p2758_p1 }
  0x67   :  { %2768 = shalt.err (!%p2765_p5)
}
  0x68   :  { %87 = dma.hbm_to_vmem [thread:$0]  %s3390_s6, 1024, %s3069_s4, [#allocation9], %s2923_s16, %s2923_s16, %s2924_s20  }
  0x69   :  { %s2927_s21 = smov [#allocation13]   ;;  %s2928_s23 = smov [#allocation14]  }
  0x6a   :  { %s105_s22 = sshll.u32 %s2927_s21, 4  ;;  %s117_s25 = sshll.u32 %s2928_s23, 4  ;;  %s106_s22 = int_to_ptr.vmem [resolvable:$true] %s105_s22  ;;  %s3106_s25 = int_to_ptr.vmem [resolvable:$true] %s117_s25 }
  0x6b   :  { %s2769_s26 = scalar_lea.hbm %s3392_s8, 1024 }
  0x6c   :  { %p2770_p6 = scmp.ne.s32.totalorder %s3392_s8, %s2769_s26  ;;  %p2773_p7 = scmp.lt.u32.totalorder %s2769_s26, %s3392_s8 }
  0x6e   :  { %p2775_p8 = pnand %p2773_p7, %p2770_p6 }
  0x70   :  { %2778 = shalt.err (!%p2775_p8)
}
  0x71   :  { %s2779_s6 = scalar_lea.vmem %s106_s22, 1024  ;;  %p2784_p10 = scmp.lt.s32.totalorder %s106_s22, %s106_s22 }
  0x72   :  { %p2780_p9 = scmp.ne.s32.totalorder %s106_s22, %s2779_s6  ;;  %p2785_p11 = scmp.lt.s32.totalorder %s2779_s6, %s2779_s6 }
  0x74   :  { %p2786_p12 = por %p2785_p11, %p2784_p10 }
  0x76   :  { %p2787_p13 = pnand %p2786_p12, %p2780_p9 }
  0x78   :  { %2790 = shalt.err (!%p2787_p13)
}
  0x79   :  { %111 = dma.hbm_to_vmem [thread:$0]  %s3392_s8, 1024, %s106_s22, [#allocation12], %s2923_s16, %s2923_s16, %s2924_s20  }
  0x7a   :  { %s2791_s1 = scalar_lea.hbm %s3393_s9, 1024 }
  0x7b   :  { %p2792_p0 = scmp.ne.s32.totalorder %s3393_s9, %s2791_s1  ;;  %p2795_p1 = scmp.lt.u32.totalorder %s2791_s1, %s3393_s9 }
  0x7d   :  { %p2797_p2 = pnand %p2795_p1, %p2792_p0 }
  0x7f   :  { %2800 = shalt.err (!%p2797_p2)
}
  0x80   :  { %s2801_s23 = scalar_lea.vmem %s3106_s25, 1024  ;;  %p2806_p4 = scmp.lt.s32.totalorder %s3106_s25, %s3106_s25 }
  0x81   :  { %p2802_p3 = scmp.ne.s32.totalorder %s3106_s25, %s2801_s23  ;;  %p2807_p5 = scmp.lt.s32.totalorder %s2801_s23, %s2801_s23 }
  0x83   :  { %p2808_p6 = por %p2807_p5, %p2806_p4 }
  0x85   :  { %p2809_p7 = pnand %p2808_p6, %p2802_p3 }
  0x87   :  { %2812 = shalt.err (!%p2809_p7)
}
  0x88   :  { %123 = dma.hbm_to_vmem [thread:$0]  %s3393_s9, 1024, %s3106_s25, [#allocation15], %s2923_s16, %s2923_s16, %s2924_s20  }
  0x89   :  { %2901 = dma.done.wait [#allocation3], 128  }
  0x8a   :  { %2902 = vsyncadd [#allocation3], 4294967168 }
  0x8b   :  { %2903 = dma.done.wait [#allocation6], 640  }
  0x8c   :  { %2904 = vsyncadd [#allocation6], 4294966656 }
  0x8d   :  { %2905 = dma.done.wait [#allocation9], 9216  }
  0x8e   :  { %2906 = vsyncadd [#allocation9], 4294958080 }
  0x8f   :  { %2907 = dma.done.wait [#allocation12], 2048  }
  0x90   :  { %2908 = vsyncadd [#allocation12], 4294965248 }
  0x91   :  { %2909 = dma.done.wait [#allocation15], 1024  }
  0x92   :  { %2910 = vsyncadd [#allocation15], 4294966272  ;;  %v2485_v0 = vld [vmem:[#allocation8 + $0x4] ss:$16 sps:$4 sm:$0xff]   ;;  %v2487_v1 = vld [vmem:[#allocation8] ss:$16 sps:$4 sm:$0xff]  }
  0x93   :  { %566 = vmatprep.subr.bf16.mxu0 %v2485_v0  ;;  %v2488_v2 = vld [vmem:[#allocation8 + $0x24] ss:$16 sps:$4 sm:$0xff]   ;;  %v2490_v3 = vld [vmem:[#allocation8 + $0x20] ss:$16 sps:$4 sm:$0xff]   ;;  %v2496_v5 = vld [vmem:[#allocation8 + $0xc] ss:$16 sps:$4 sm:$0xff]  }
  0x94   :  { %567 = vmatpush1.bf16.msra.mxu0 %v2487_v1  ;;  %v2491_v4 = vld [vmem:[#allocation8 + $0x44] ss:$16 sps:$4 sm:$0xff]   ;;  %v2499_v6 = vld [vmem:[#allocation8 + $0x8] ss:$16 sps:$4 sm:$0xff]   ;;  %v2493_v7 = vld [vmem:[#allocation8 + $0x40] ss:$16 sps:$4 sm:$0xff]   ;;  %607 = vmatprep.subr.bf16.mxu1 %v2496_v5 }
  0x95   :  { %568 = vmatprep.subr.bf16.mxu0 %v2488_v2  ;;  %v2494_v8 = vld [vmem:[#allocation8 + $0x64] ss:$16 sps:$4 sm:$0xff]   ;;  %608 = vmatpush1.bf16.msra.mxu1 %v2499_v6  ;;  %v2502_v9 = vld [vmem:[#allocation8 + $0x2c] ss:$16 sps:$4 sm:$0xff]   ;;  %v2505_v10 = vld [vmem:[#allocation8 + $0x28] ss:$16 sps:$4 sm:$0xff]  }
  0x96   :  { %609 = vmatprep.subr.bf16.mxu1 %v2502_v9  ;;  %v2498_v11 = vld [vmem:[#allocation8 + $0x60] ss:$16 sps:$4 sm:$0xff]   ;;  %v2500_v12 = vld [vmem:[#allocation8 + $0x84] ss:$16 sps:$4 sm:$0xff]   ;;  %v2508_v13 = vld [vmem:[#allocation8 + $0x4c] ss:$16 sps:$4 sm:$0xff]  }
  0x97   :  { %v2511_v14 = vld [vmem:[#allocation8 + $0x48] ss:$16 sps:$4 sm:$0xff]   ;;  %v2514_v15 = vld [vmem:[#allocation8 + $0x6c] ss:$16 sps:$4 sm:$0xff]   ;;  %v2504_v16 = vld [vmem:[#allocation8 + $0x80] ss:$16 sps:$4 sm:$0xff]  }
  0x98   :  { %569 = vmatpush1.bf16.msra.mxu0 %v2490_v3  ;;  %v2506_v17 = vld [vmem:[#allocation8 + $0xa4] ss:$16 sps:$4 sm:$0xff]   ;;  %v2517_v18 = vld [vmem:[#allocation8 + $0x68] ss:$16 sps:$4 sm:$0xff]   ;;  %v2520_v19 = vld [vmem:[#allocation8 + $0x8c] ss:$16 sps:$4 sm:$0xff]  }
  0x99   :  { %570 = vmatprep.subr.bf16.mxu0 %v2491_v4  ;;  %610 = vmatpush1.bf16.msra.mxu1 %v2505_v10  ;;  %v2510_v20 = vld [vmem:[#allocation8 + $0xa0] ss:$16 sps:$4 sm:$0xff]   ;;  %v2512_v21 = vld [vmem:[#allocation8 + $0xc4] ss:$16 sps:$4 sm:$0xff]   ;;  %v2523_v22 = vld [vmem:[#allocation8 + $0x88] ss:$16 sps:$4 sm:$0xff]  }
  0x9a   :  { %611 = vmatprep.subr.bf16.mxu1 %v2508_v13  ;;  %v2526_v23 = vld [vmem:[#allocation8 + $0xac] ss:$16 sps:$4 sm:$0xff]   ;;  %v2516_v24 = vld [vmem:[#allocation8 + $0xc0] ss:$16 sps:$4 sm:$0xff]   ;;  %v2518_v25 = vld [vmem:[#allocation8 + $0xe4] ss:$16 sps:$4 sm:$0xff]  }
  0x9b   :  { %v2529_v26 = vld [vmem:[#allocation8 + $0xa8] ss:$16 sps:$4 sm:$0xff]   ;;  %v2532_v27 = vld [vmem:[#allocation8 + $0xcc] ss:$16 sps:$4 sm:$0xff]   ;;  %v2522_v28 = vld [vmem:[#allocation8 + $0xe0] ss:$16 sps:$4 sm:$0xff]  }
  0x9c   :  { %571 = vmatpush1.bf16.msra.mxu0 %v2493_v7  ;;  %v2524_v29 = vld [vmem:[#allocation8 + $0x104] ss:$16 sps:$4 sm:$0xff]   ;;  %v2535_v30 = vld [vmem:[#allocation8 + $0xc8] ss:$16 sps:$4 sm:$0xff]   ;;  %v2538_v31 = vld [vmem:[#allocation8 + $0xec] ss:$16 sps:$4 sm:$0xff]  }
  0x9d   :  { %572 = vmatprep.subr.bf16.mxu0 %v2494_v8  ;;  %612 = vmatpush1.bf16.msra.mxu1 %v2511_v14  ;;  %v2528_v32 = vld [vmem:[#allocation8 + $0x100] ss:$16 sps:$4 sm:$0xff]   ;;  %v2530_v33 = vld [vmem:[#allocation8 + $0x124] ss:$16 sps:$4 sm:$0xff]   ;;  %v2541_v34 = vld [vmem:[#allocation8 + $0xe8] ss:$16 sps:$4 sm:$0xff]  }
  0x9e   :  { %613 = vmatprep.subr.bf16.mxu1 %v2514_v15  ;;  %v2544_v35 = vld [vmem:[#allocation8 + $0x10c] ss:$16 sps:$4 sm:$0xff]   ;;  %v2534_v36 = vld [vmem:[#allocation8 + $0x120] ss:$16 sps:$4 sm:$0xff]   ;;  %v2536_v37 = vld [vmem:[#allocation8 + $0x144] ss:$16 sps:$4 sm:$0xff]  }
  0x9f   :  { %v2547_v38 = vld [vmem:[#allocation8 + $0x108] ss:$16 sps:$4 sm:$0xff]   ;;  %v2550_v39 = vld [vmem:[#allocation8 + $0x12c] ss:$16 sps:$4 sm:$0xff]   ;;  %v2540_v40 = vld [vmem:[#allocation8 + $0x140] ss:$16 sps:$4 sm:$0xff]  }
  0xa0   :  { %573 = vmatpush1.bf16.msra.mxu0 %v2498_v11  ;;  %v151_v41 = vld [vmem:[#allocation2] sm:$0xff]  ;;  %v2553_v44 = vld [vmem:[#allocation8 + $0x128] ss:$16 sps:$4 sm:$0xff]   ;;  %v2556_v46 = vld [vmem:[#allocation8 + $0x14c] ss:$16 sps:$4 sm:$0xff]   ;;  %v2929_v4 = vmov 0.0  }
  0xa1   :  { %574 = vmatprep.subr.bf16.mxu0 %v2500_v12  ;;  %614 = vmatpush1.bf16.msra.mxu1 %v2517_v18  ;;  %v2542_v42 = vld [vmem:[#allocation8 + $0x164] ss:$16 sps:$4 sm:$0xff]   ;;  %v2101_v43 = vcombine.high %v151_v41, %v151_v41  ;;  %v2546_v45 = vld [vmem:[#allocation8 + $0x160] ss:$16 sps:$4 sm:$0xff]   ;;  %v2559_v48 = vld [vmem:[#allocation8 + $0x148] ss:$16 sps:$4 sm:$0xff]   ;;  %v2100_v1 = vcombine.low %v151_v41, %v151_v41  ;;  %v219_v12 = vlaneseq }
  0xa2   :  { %615 = vmatprep.subr.bf16.mxu1 %v2520_v19  ;;  %v2548_v47 = vld [vmem:[#allocation8 + $0x184] ss:$16 sps:$4 sm:$0xff]   ;;  %v2562_v49 = vld [vmem:[#allocation8 + $0x16c] ss:$16 sps:$4 sm:$0xff]   ;;  %v2552_v50 = vld [vmem:[#allocation8 + $0x180] ss:$16 sps:$4 sm:$0xff]  }
  0xa3   :  { %598 = vmatprep.mubr.bf16.mxu0 %v2101_v43  ;;  %639 = vmatprep.mubr.bf16.mxu1 %v2101_v43  ;;  %v2554_v51 = vld [vmem:[#allocation8 + $0x1a4] ss:$16 sps:$4 sm:$0xff]   ;;  %v2565_v52 = vld [vmem:[#allocation8 + $0x168] ss:$16 sps:$4 sm:$0xff]   ;;  %v2568_v53 = vld [vmem:[#allocation8 + $0x18c] ss:$16 sps:$4 sm:$0xff]  }
  0xa4   :  { %575 = vmatpush1.bf16.msra.mxu0 %v2504_v16  ;;  %v2558_v54 = vld [vmem:[#allocation8 + $0x1a0] ss:$16 sps:$4 sm:$0xff]   ;;  %v2560_v55 = vld [vmem:[#allocation8 + $0x1c4] ss:$16 sps:$4 sm:$0xff]   ;;  %v2571_v56 = vld [vmem:[#allocation8 + $0x188] ss:$16 sps:$4 sm:$0xff]  }
  0xa5   :  { %576 = vmatprep.subr.bf16.mxu0 %v2506_v17  ;;  %616 = vmatpush1.bf16.msra.mxu1 %v2523_v22  ;;  %v2574_v57 = vld [vmem:[#allocation8 + $0x1ac] ss:$16 sps:$4 sm:$0xff]   ;;  %v2564_v58 = vld [vmem:[#allocation8 + $0x1c0] ss:$16 sps:$4 sm:$0xff]   ;;  %v2566_v59 = vld [vmem:[#allocation8 + $0x1e4] ss:$16 sps:$4 sm:$0xff]  }
  0xa6   :  { %617 = vmatprep.subr.bf16.mxu1 %v2526_v23  ;;  %v2576_v60 = vld [vmem:[#allocation8 + $0x1a8] ss:$16 sps:$4 sm:$0xff]   ;;  %v2577_v61 = vld [vmem:[#allocation8 + $0x1cc] ss:$16 sps:$4 sm:$0xff]   ;;  %v2570_v62 = vld [vmem:[#allocation8 + $0x1e0] ss:$16 sps:$4 sm:$0xff]  }
  0xa7   :  { %v2579_v63 = vld [vmem:[#allocation8 + $0x1c8] ss:$16 sps:$4 sm:$0xff]   ;;  %v2580_v0 = vld [vmem:[#allocation8 + $0x1ec] ss:$16 sps:$4 sm:$0xff]   ;;  %v2583_v3 = vld [vmem:[#allocation10] sm:$0xff]   ;;  %vm2930_vm0 = vmmov 0  }
  0xa8   :  { %577 = vmatpush1.bf16.msra.mxu0 %v2510_v20  ;;  %v2582_v2 = vld [vmem:[#allocation8 + $0x1e8] ss:$16 sps:$4 sm:$0xff]   ;;  %v2585_v6 = vld [vmem:[#allocation10 + $0x10] sm:$0xff]   ;;  %v2587_v8 = vld [vmem:[#allocation10 + $0x20] sm:$0xff]   ;;  %v220_v13 = vshrl.u32 %v219_v12, 7  ;;  %vm1200_vm1 = vcmask 1041409  }
  0xa9   :  { %578 = vmatprep.subr.bf16.mxu0 %v2512_v21  ;;  %618 = vmatpush1.bf16.msra.mxu1 %v2529_v26  ;;  %v2584_v5 = vld [vmem:[#allocation10 + $0x8] sm:$0xff]   ;;  %v2586_v7 = vld [vmem:[#allocation10 + $0x18] sm:$0xff]   ;;  %v2589_v10 = vld [vmem:[#allocation10 + $0x30] sm:$0xff]   ;;  %vm1203_vm2 = vcmask 1042434   ;;  %vm1206_vm3 = vcmask 1043459   ;;  %vm1209_vm4 = vcmask 1044484  }
  0xaa   :  { %619 = vmatprep.subr.bf16.mxu1 %v2532_v27  ;;  %v2588_v9 = vld [vmem:[#allocation10 + $0x28] sm:$0xff]   ;;  %v2590_v11 = vld [vmem:[#allocation10 + $0x38] sm:$0xff]   ;;  %v3157_v14 = vsub.s32 0, %v220_v13  ;;  %v217_v15 = vld [vmem:[%s3389_s5] sm:$0xf]  ;;  %v225_v16 = vsub.s32 1, %v220_v13 }
  0xab   :  { %v233_v19 = vsub.s32 3, %v220_v13  ;;  %v3185_v12 = vld [vmem:[#allocation7 + $0x8] sm:$0xf]  ;;  %vm1212_vm5 = vcmask 1045509   ;;  %vm1215_vm6 = vcmask 1046534   ;;  %vm1218_vm7 = vcmask 1047559  }
  0xac   :  { %579 = vmatpush1.bf16.msra.mxu0 %v2516_v24  ;;  %v222_v17 = vrot.slane %v217_v15, %v3157_v14  ;;  %v226_v18 = vrot.slane %v217_v15, %v225_v16  ;;  %v3192_v16 = vld [vmem:[#allocation7 + $0xc] sm:$0xf]  ;;  %vm1222_vm9 = vcmask 64512   ;;  %vm1277_vm10 = vcmask 1043456   ;;  %s2933_s27 = smov [#allocation16]  }
  0xad   :  { %580 = vmatprep.subr.bf16.mxu0 %v2518_v25  ;;  %620 = vmatpush1.bf16.msra.mxu1 %v2535_v30  ;;  %v234_v27 = vrot.slane %v217_v15, %v233_v19  ;;  %s2046_s0 = sshll.u32 %s2933_s27, 4  ;;  %s2047_s0 = int_to_ptr.vmem [resolvable:$true] %s2046_s0 }
  0xae   :  { %621 = vmatprep.subr.bf16.mxu1 %v2538_v31 }
  0xb0   :  { %581 = vmatpush1.bf16.msra.mxu0 %v2522_v28 }
  0xb1   :  { %582 = vmatprep.subr.bf16.mxu0 %v2524_v29  ;;  %622 = vmatpush1.bf16.msra.mxu1 %v2541_v34  ;;  %v229_v29 = vsub.s32 2, %v220_v13 }
  0xb2   :  { %623 = vmatprep.subr.bf16.mxu1 %v2544_v35 }
  0xb3   :  { %v230_v34 = vrot.slane %v217_v15, %v229_v29  ;;  %v3213_v29 = vld [vmem:[#allocation7 + $0x18] sm:$0xf] }
  0xb4   :  { %583 = vmatpush1.bf16.msra.mxu0 %v2528_v32 }
  0xb5   :  { %584 = vmatprep.subr.bf16.mxu0 %v2530_v33  ;;  %624 = vmatpush1.bf16.msra.mxu1 %v2547_v38 }
  0xb6   :  { %625 = vmatprep.subr.bf16.mxu1 %v2550_v39 }
  0xb8   :  { %585 = vmatpush1.bf16.msra.mxu0 %v2534_v36 }
  0xb9   :  { %586 = vmatprep.subr.bf16.mxu0 %v2536_v37  ;;  %626 = vmatpush1.bf16.msra.mxu1 %v2553_v44  ;;  %v152_v44 = vld [vmem:[#allocation5] sm:$0xff] }
  0xba   :  { %627 = vmatprep.subr.bf16.mxu1 %v2556_v46 }
  0xbc   :  { %587 = vmatpush1.bf16.msra.mxu0 %v2540_v40 }
  0xbd   :  { %588 = vmatprep.subr.bf16.mxu0 %v2542_v42  ;;  %628 = vmatpush1.bf16.msra.mxu1 %v2559_v48 }
  0xbe   :  { %629 = vmatprep.subr.bf16.mxu1 %v2562_v49 }
  0xc0   :  { %589 = vmatpush1.bf16.msra.mxu0 %v2546_v45 }
  0xc1   :  { %590 = vmatprep.subr.bf16.mxu0 %v2548_v47  ;;  %630 = vmatpush1.bf16.msra.mxu1 %v2565_v52 }
  0xc2   :  { %631 = vmatprep.subr.bf16.mxu1 %v2568_v53 }
  0xc4   :  { %591 = vmatpush1.bf16.msra.mxu0 %v2552_v50 }
  0xc5   :  { %592 = vmatprep.subr.bf16.mxu0 %v2554_v51  ;;  %632 = vmatpush1.bf16.msra.mxu1 %v2571_v56  ;;  %v2931_v56 = vmov 1966171168  }
  0xc6   :  { %633 = vmatprep.subr.bf16.mxu1 %v2574_v57  ;;  %v790_v57 = vunpack.c.l.s4 %v2931_v56 }
  0xc8   :  { %593 = vmatpush1.bf16.msra.mxu0 %v2558_v54 }
  0xc9   :  { %594 = vmatprep.subr.bf16.mxu0 %v2560_v55  ;;  %634 = vmatpush1.bf16.msra.mxu1 %v2576_v60  ;;  %v3168_v55 = vld [vmem:[#allocation7] sm:$0xf] }
  0xca   :  { %635 = vmatprep.subr.bf16.mxu1 %v2577_v61 }
  0xcc   :  { %595 = vmatpush1.bf16.msra.mxu0 %v2564_v58  ;;  %v791_v58 = vunpack.c.0.s8 %v790_v57 }
  0xcd   :  { %596 = vmatprep.subr.bf16.mxu0 %v2566_v59  ;;  %636 = vmatpush1.bf16.msra.mxu1 %v2579_v63 }
  0xce   :  { %637 = vmatprep.subr.bf16.mxu1 %v2580_v0  ;;  %v3172_v59 = vsub.s32 %v791_v58, %v220_v13 }
  0xd0   :  { %597 = vmatpush1.bf16.msra.mxu0 %v2570_v62 }
  0xd1   :  { %638 = vmatpush1.bf16.msra.mxu1 %v2582_v2  ;;  %2286 = vmatprep.subr.bf16.mxu0 %v2929_v4 }
  0xd2   :  { %2306 = vmatprep.subr.bf16.mxu1 %v2929_v4 }
  0xd3   :  { %599 = vmatmul.mubr.bf16.vlgmr.msra.gmra.mrb[0].mxu0 %v2100_v1 }
  0xd4   :  { %640 = vmatmul.mubr.bf16.vlgmr.msra.gmra.mrb[0].mxu1 %v2100_v1  ;;  %2287 = vmatpush3.bf16.msra.mxu0 %v2583_v3 }
  0xd5   :  { %2288 = vmatprep.subr.bf16.mxu0 %v2929_v4  ;;  %2302 = vmatprep.mubr.msk.bf16.mxu0 %vm2930_vm0, %v2929_v4 }
  0xd6   :  { %2308 = vmatprep.mubr.msk.bf16.mxu1 %vm2930_vm0, %v2929_v4 }
  0xd8   :  { %2289 = vmatpush3.bf16.msra.mxu0 %v2584_v5 }
  0xd9   :  { %2290 = vmatprep.subr.bf16.mxu0 %v2929_v4 }
  0xda   :  { %2307 = vmatpush3.bf16.xpose.msra.mxu1 %v3168_v55 }
  0xdb   :  { %2312 = vmatprep.subr.bf16.mxu1 %v2929_v4 }
  0xdc   :  { %2291 = vmatpush3.bf16.msra.mxu0 %v2585_v6 }
  0xdd   :  { %2292 = vmatprep.subr.bf16.mxu0 %v2929_v4 }
  0xe0   :  { %2293 = vmatpush3.bf16.msra.mxu0 %v2586_v7  ;;  %v3177_v7 = vld [vmem:[#allocation7 + $0x4] sm:$0xf] }
  0xe1   :  { %2294 = vmatprep.subr.bf16.mxu0 %v2929_v4 }
  0xe4   :  { %2295 = vmatpush3.bf16.msra.mxu0 %v2587_v8 }
  0xe5   :  { %2296 = vmatprep.subr.bf16.mxu0 %v2929_v4 }
  0xe8   :  { %2297 = vmatpush3.bf16.msra.mxu0 %v2588_v9 }
  0xe9   :  { %2298 = vmatprep.subr.bf16.mxu0 %v2929_v4 }
  0xec   :  { %2299 = vmatpush3.bf16.msra.mxu0 %v2589_v10 }
  0xed   :  { %2300 = vmatprep.subr.bf16.mxu0 %v2929_v4 }
  0xf0   :  { %2301 = vmatpush3.bf16.msra.mxu0 %v2590_v11 }
  0xf1   :  { %2354 = vmatprep.subr.bf16.mxu0 %v2929_v4 }
 0x1a6   :  { %v600_v20 = vpop.f32.mrb[0].mxu0 }
 0x1a7   :  { %v601_v21 = vadd.f32 %v600_v20, %v222_v17  ;;  %v602_v22 = vpop.f32.mrb[1].mxu0  ;;  %v641_v30 = vpop.f32.mrb[0].mxu1 }
 0x1a8   :  { %v603_v23 = vadd.f32 %v602_v22, %v226_v18  ;;  %v604_v24 = vpop.f32.mrb[2].mxu0  ;;  %v643_v31 = vpop.f32.mrb[1].mxu1  ;;  %v642_v37 = vadd.f32 %v641_v30, %v230_v34 }
 0x1a9   :  { %v2166_v25 = vmul.f32 -1.442695, %v601_v21  ;;  %v605_v26 = vpop.f32.mrb[3].mxu0  ;;  %v644_v32 = vadd.f32 %v643_v31, %v234_v27  ;;  %v645_v33 = vpop.f32.mrb[2].mxu1  ;;  %v3199_v21 = vld [vmem:[#allocation7 + $0x10] sm:$0xf] }
 0x1aa   :  { %v2167_v28 = vmul.f32 -1.442695, %v603_v23  ;;  %v646_v35 = vpop.f32.mrb[3].mxu1  ;;  %v3206_v24 = vld [vmem:[#allocation7 + $0x14] sm:$0xf] }
 0x1ab   :  { %2615 = vpow2.f32 %v2166_v25  ;;  %v2168_v36 = vmul.f32 -1.442695, %v644_v32  ;;  %v3220_v32 = vld [vmem:[#allocation7 + $0x1c] sm:$0xf] }
 0x1ac   :  { %2617 = vpow2.f32 %v2167_v28 }
 0x1ad   :  { %2619 = vpow2.f32 %v2168_v36 }
 0x1ae   :  { %2621 = vtanh.f32 %v642_v37 }
 0x1b5   :  { %v2616_v38 = vpop.eup %2615 }
 0x1b6   :  { %v2618_v39 = vpop.eup %2617  ;;  %v651_v40 = vadd.f32 1.0, %v2616_v38 }
 0x1b7   :  { %v657_v41 = vadd.f32 1.0, %v2618_v39  ;;  %v2620_v42 = vpop.eup %2619 }
 0x1b8   :  { %2623 = vrcp.f32 %v651_v40  ;;  %v2622_v43 = vpop.eup %2621  ;;  %v664_v46 = vadd.f32 1.0, %v2620_v42 }
 0x1b9   :  { %2625 = vrcp.f32 %v657_v41 }
 0x1ba   :  { %2627 = vrcp.f32 %v664_v46 }
 0x1c2   :  { %v2624_v45 = vpop.eup %2623 }
 0x1c3   :  { %v2626_v47 = vpop.eup %2625  ;;  %v668_v48 = vmul.f32 %v2624_v45, %v2622_v43 }
 0x1c4   :  { %v667_v49 = vmul.f32 %v2626_v47, %v152_v44  ;;  %v2628_v51 = vpop.eup %2627 }
 0x1c6   :  { %v669_v50 = vadd.f32 %v668_v48, %v667_v49 }
 0x1c8   :  { %2629 = vtanh.f32 %v669_v50  ;;  %673 = vst [vmem:[#allocation17] sm:$0xff] %v669_v50 }
 0x1d2   :  { %v2630_v52 = vpop.eup %2629 }
 0x1d3   :  { %v671_v53 = vmul.f32 %v2630_v52, %v2628_v51 }
 0x1d5   :  { %v3163_v54 = vpack.c.bf16 %v671_v53, %v671_v53  ;;  %672 = vst [vmem:[#allocation16] sm:$0xff] %v671_v53 }
 0x1d7   :  { %2303 = vmatmul.mubr.bf16.vlgmr.msra.gmra.mrb[4].mxu0 %v3163_v54 }
 0x1d8   :  { %2356 = vmatprep.mubr.msk.bf16.mxu0 %vm2930_vm0, %v2929_v4 }
 0x2aa   :  { %v781_v60 = vpop.f32.mrb[4].mxu0 }
 0x2ab   :  { %v787_v61 = vpack.c.bf16 %v781_v60, %v781_v60  ;;  %v2304_v62 = vpop.f32.mrb[5].mxu0 }
 0x2ac   :  { %v784_v63 = vpop.f32.mrb[6].mxu0 }
 0x2ad   :  { %v795_v0 = vrot.slane %v787_v61, %v3172_v59  ;;  %v2305_v1 = vpop.f32.mrb[7].mxu0 }
 0x2af   :  { %v803_v2 = vrot.slane %v795_v0, %v3172_v59  ;;  %v796_v8 = vcombine.high %v795_v0, %v795_v0 }
 0x2b1   :  { %v2177_v3 = vpack.i.b16 %v803_v2, %v803_v2  ;;  %v814_v5 = vunpack.i.h.s16 %v803_v2  ;;  %v810_v10 = vrot.slane %v796_v8, %v3172_v59  ;;  %v811_v19 = vcombine.high %v803_v2, %v803_v2 }
 0x2b3   :  { %v825_v6 = vrot.slane %v2177_v3, %v3157_v14  ;;  %v867_v9 = vpack.i.b16 %v814_v5, %v814_v5  ;;  %v2178_v13 = vpack.i.b16 %v810_v10, %v810_v10  ;;  %v816_v17 = vunpack.i.h.s16 %v810_v10 }
 0x2b4   :  { %v2179_v22 = vpack.i.b16 %v811_v19, %v811_v19  ;;  %v818_v25 = vunpack.i.h.s16 %v811_v19  ;;  %v812_v27 = vcombine.high %v810_v10, %v810_v10 }
 0x2b5   :  { %2309 = vmatmul.mubr.bf16.vlgmr.msra.gmra.mrb[4].mxu1 %v825_v6  ;;  %v871_v11 = vrot.slane %v867_v9, %v3157_v14  ;;  %v917_v15 = vrot.slane %v2178_v13, %v3157_v14  ;;  %v959_v18 = vpack.i.b16 %v816_v17, %v816_v17 }
 0x2b6   :  { %2313 = vmatpush3.bf16.xpose.msra.mxu1 %v3177_v7  ;;  %2314 = vmatprep.mubr.msk.bf16.mxu1 %vm2930_vm0, %v2929_v4  ;;  %v1009_v23 = vrot.slane %v2179_v22, %v3157_v14  ;;  %v1051_v26 = vpack.i.b16 %v818_v25, %v818_v25  ;;  %v2180_v30 = vpack.i.b16 %v812_v27, %v812_v27  ;;  %v820_v33 = vunpack.i.h.s16 %v812_v27 }
 0x2b7   :  { %2318 = vmatprep.subr.bf16.mxu1 %v2929_v4  ;;  %v963_v20 = vrot.slane %v959_v18, %v3157_v14 }
 0x2b8   :  { %v1055_v28 = vrot.slane %v1051_v26, %v3157_v14  ;;  %v1101_v31 = vrot.slane %v2180_v30, %v3157_v14  ;;  %v1143_v34 = vpack.i.b16 %v820_v33, %v820_v33 }
 0x2ba   :  { %v1147_v35 = vrot.slane %v1143_v34, %v3157_v14 }
 0x2bd   :  { %2315 = vmatmul.mubr.bf16.vlgmr.msra.gmra.mrb[8].mxu1 %v871_v11 }
 0x2be   :  { %2319 = vmatpush3.bf16.xpose.msra.mxu1 %v3185_v12  ;;  %2320 = vmatprep.mubr.msk.bf16.mxu1 %vm2930_vm0, %v2929_v4 }
 0x2bf   :  { %2324 = vmatprep.subr.bf16.mxu1 %v2929_v4 }
 0x2c5   :  { %2321 = vmatmul.mubr.bf16.vlgmr.msra.gmra.mrb[12].mxu1 %v917_v15 }
 0x2c6   :  { %2325 = vmatpush3.bf16.xpose.msra.mxu1 %v3192_v16  ;;  %2326 = vmatprep.mubr.msk.bf16.mxu1 %vm2930_vm0, %v2929_v4 }
 0x2c7   :  { %2330 = vmatprep.subr.bf16.mxu1 %v2929_v4 }
 0x2cd   :  { %2327 = vmatmul.mubr.bf16.vlgmr.msra.gmra.mrb[16].mxu1 %v963_v20  ;;  %v1189_v20 = vld [vmem:[%s3387_s3] sm:$0xff]  ;;  %s2932_s3 = smov [#allocation17]  }
 0x2ce   :  { %2331 = vmatpush3.bf16.xpose.msra.mxu1 %v3199_v21  ;;  %2332 = vmatprep.mubr.msk.bf16.mxu1 %vm2930_vm0, %v2929_v4  ;;  %vm1190_vm8 = vcmp.gt.f32.partialorder %v1189_v20, 0.0  ;;  %v2601_v20 = vld [vmem:[#allocation11 + $0x10] sm:$0xff]   ;;  %s2056_s25 = sshll.u32 %s2932_s3, 4  ;;  %s2057_s25 = int_to_ptr.vmem [resolvable:$true] %s2056_s25 }
 0x2cf   :  { %2336 = vmatprep.subr.bf16.mxu1 %v2929_v4  ;;  %s2813_s26 = scalar_lea.vmem %s2057_s25, 128  ;;  %p2818_p9 = scmp.lt.s32.totalorder %s2057_s25, %s2057_s25 }
 0x2d0   :  { %p2814_p8 = scmp.ne.s32.totalorder %s2057_s25, %s2813_s26  ;;  %p2819_p10 = scmp.lt.s32.totalorder %s2813_s26, %s2813_s26 }
 0x2d2   :  { %p2820_p11 = por %p2819_p10, %p2818_p9 }
 0x2d4   :  { %p2821_p12 = pnand %p2820_p11, %p2814_p8 }
 0x2d5   :  { %2333 = vmatmul.mubr.bf16.vlgmr.msra.gmra.mrb[20].mxu1 %v1009_v23 }
 0x2d6   :  { %2337 = vmatpush3.bf16.xpose.msra.mxu1 %v3206_v24  ;;  %2338 = vmatprep.mubr.msk.bf16.mxu1 %vm2930_vm0, %v2929_v4 }
 0x2d7   :  { %2342 = vmatprep.subr.bf16.mxu1 %v2929_v4 }
 0x2dd   :  { %2339 = vmatmul.mubr.bf16.vlgmr.msra.gmra.mrb[24].mxu1 %v1055_v28 }
 0x2de   :  { %2343 = vmatpush3.bf16.xpose.msra.mxu1 %v3213_v29  ;;  %2344 = vmatprep.mubr.msk.bf16.mxu1 %vm2930_vm0, %v2929_v4 }
 0x2df   :  { %2348 = vmatprep.subr.bf16.mxu1 %v2929_v4 }
 0x2e5   :  { %2345 = vmatmul.mubr.bf16.vlgmr.msra.gmra.mrb[28].mxu1 %v1101_v31 }
 0x2e6   :  { %2349 = vmatpush3.bf16.xpose.msra.mxu1 %v3220_v32  ;;  %2350 = vmatprep.mubr.msk.bf16.mxu1 %vm2930_vm0, %v2929_v4 }
 0x2e7   :  { %2360 = vmatprep.subr.bf16.mxu1 %v2929_v4 }
 0x2ed   :  { %2351 = vmatmul.mubr.bf16.vlgmr.msra.gmra.mrb[32].mxu1 %v1147_v35 }
 0x2ee   :  { %2362 = vmatprep.mubr.msk.bf16.mxu1 %vm2930_vm0, %v2929_v4 }
 0x388   :  { %v861_v36 = vpop.f32.mrb[4].mxu1 }
 0x389   :  { %v2310_v37 = vpop.f32.mrb[5].mxu1 }
 0x38a   :  { %v864_v38 = vpop.f32.mrb[6].mxu1 }
 0x38b   :  { %v2311_v39 = vpop.f32.mrb[7].mxu1  ;;  %v1279_v38 = vsel %vm1277_vm10, %v3168_v55, 0 }
 0x38c   :  { %v1330_v39 = vsel %vm1277_vm10, %v3177_v7, 0  ;;  %2355 = vmatpush3.bf16.msra.mxu0 %v1279_v38 }
 0x38d   :  { %2361 = vmatpush3.bf16.msra.mxu1 %v1330_v39  ;;  %2366 = vmatprep.subr.bf16.mxu0 %v2929_v4 }
 0x38e   :  { %2372 = vmatprep.subr.bf16.mxu1 %v2929_v4 }
 0x390   :  { %v907_v40 = vpop.f32.mrb[8].mxu1 }
 0x391   :  { %v1199_v41 = vrot.slane %v907_v40, 7  ;;  %v2316_v42 = vpop.f32.mrb[9].mxu1 }
 0x392   :  { %v910_v43 = vpop.f32.mrb[10].mxu1 }
 0x393   :  { %v1201_v44 = vsel %vm1200_vm1, %v1199_v41, %v861_v36  ;;  %v2317_v45 = vpop.f32.mrb[11].mxu1 }
 0x398   :  { %v953_v46 = vpop.f32.mrb[12].mxu1 }
 0x399   :  { %v1202_v47 = vrot.slane %v953_v46, 6  ;;  %v2322_v48 = vpop.f32.mrb[13].mxu1 }
 0x39a   :  { %v956_v49 = vpop.f32.mrb[14].mxu1 }
 0x39b   :  { %v1204_v50 = vsel %vm1203_vm2, %v1202_v47, %v1201_v44  ;;  %v2323_v51 = vpop.f32.mrb[15].mxu1  ;;  %v1381_v49 = vsel %vm1277_vm10, %v3185_v12, 0 }
 0x3a0   :  { %v999_v52 = vpop.f32.mrb[16].mxu1 }
 0x3a1   :  { %v1205_v53 = vrot.slane %v999_v52, 5  ;;  %v2328_v56 = vpop.f32.mrb[17].mxu1  ;;  %v1432_v52 = vsel %vm1277_vm10, %v3192_v16, 0 }
 0x3a2   :  { %v1002_v57 = vpop.f32.mrb[18].mxu1 }
 0x3a3   :  { %v1207_v58 = vsel %vm1206_vm3, %v1205_v53, %v1204_v50  ;;  %v2329_v60 = vpop.f32.mrb[19].mxu1  ;;  %v1483_v57 = vsel %vm1277_vm10, %v3199_v21, 0 }
 0x3a4   :  { %v1534_v60 = vsel %vm1277_vm10, %v3206_v24, 0 }
 0x3a8   :  { %v1045_v61 = vpop.f32.mrb[20].mxu1 }
 0x3a9   :  { %v1208_v62 = vrot.slane %v1045_v61, 4  ;;  %v2334_v63 = vpop.f32.mrb[21].mxu1 }
 0x3aa   :  { %v1048_v0 = vpop.f32.mrb[22].mxu1 }
 0x3ab   :  { %v1210_v1 = vsel %vm1209_vm4, %v1208_v62, %v1207_v58  ;;  %v2335_v2 = vpop.f32.mrb[23].mxu1  ;;  %v1585_v0 = vsel %vm1277_vm10, %v3213_v29, 0 }
 0x3ac   :  { %v1636_v2 = vsel %vm1277_vm10, %v3220_v32, 0 }
 0x3b0   :  { %v1091_v3 = vpop.f32.mrb[24].mxu1 }
 0x3b1   :  { %v1211_v5 = vrot.slane %v1091_v3, 3  ;;  %v2340_v6 = vpop.f32.mrb[25].mxu1 }
 0x3b2   :  { %v1094_v8 = vpop.f32.mrb[26].mxu1  ;;  %v2591_v6 = vld [vmem:[#allocation13] sm:$0xff]  }
 0x3b3   :  { %v1213_v9 = vsel %vm1212_vm5, %v1211_v5, %v1210_v1  ;;  %v2341_v10 = vpop.f32.mrb[27].mxu1 }
 0x3b4   :  { %v2593_v10 = vld [vmem:[#allocation13 + $0x10] sm:$0xff]  }
 0x3b8   :  { %v1137_v11 = vpop.f32.mrb[28].mxu1 }
 0x3b9   :  { %v1214_v13 = vrot.slane %v1137_v11, 2  ;;  %v2346_v15 = vpop.f32.mrb[29].mxu1  ;;  %v2594_v11 = vld [vmem:[#allocation13 + $0x18] sm:$0xff]  }
 0x3ba   :  { %v1140_v17 = vpop.f32.mrb[30].mxu1  ;;  %v2597_v15 = vld [vmem:[#allocation13 + $0x30] sm:$0xff]  }
 0x3bb   :  { %v2347_v18 = vpop.f32.mrb[31].mxu1  ;;  %v1216_v19 = vsel %vm1215_vm6, %v1214_v13, %v1213_v9  ;;  %v2592_v9 = vld [vmem:[#allocation13 + $0x8] sm:$0xff]   ;;  %v2598_v17 = vld [vmem:[#allocation13 + $0x38] sm:$0xff]  }
 0x3bc   :  { %v2596_v13 = vld [vmem:[#allocation13 + $0x28] sm:$0xff]   ;;  %v2599_v18 = vld [vmem:[#allocation11] sm:$0xff]  }
 0x3c0   :  { %v1183_v22 = vpop.f32.mrb[32].mxu1 }
 0x3c1   :  { %v1217_v23 = vrot.slane %v1183_v22, 1  ;;  %v2352_v25 = vpop.f32.mrb[33].mxu1  ;;  %v2602_v22 = vld [vmem:[#allocation11 + $0x18] sm:$0xff]  }
 0x3c2   :  { %v1186_v26 = vpop.f32.mrb[34].mxu1  ;;  %v2605_v25 = vld [vmem:[#allocation11 + $0x30] sm:$0xff]  }
 0x3c3   :  { %v2353_v27 = vpop.f32.mrb[35].mxu1  ;;  %v1219_v28 = vsel %vm1218_vm7, %v1217_v23, %v1216_v19  ;;  %v2600_v19 = vld [vmem:[#allocation11 + $0x8] sm:$0xff]   ;;  %v2606_v26 = vld [vmem:[#allocation11 + $0x38] sm:$0xff]  }
 0x3c4   :  { %v1221_v30 = vsel %vm1190_vm8, %v1219_v28, -1e+30  ;;  %v2604_v23 = vld [vmem:[#allocation11 + $0x28] sm:$0xff]   ;;  %v2607_v27 = vld [vmem:[#allocation14] sm:$0xff]  }
 0x3c5   :  { %v1223_v31 = vsel %vm1222_vm9, %v1221_v30, -inf  ;;  %v2608_v28 = vld [vmem:[#allocation14 + $0x8] sm:$0xff]  }
 0x3c6   :  { %1224 = vmax.xlane.f32.xlu0 %v1223_v31  ;;  %v2610_v31 = vld [vmem:[#allocation14 + $0x18] sm:$0xff]  }
 0x453   :  { %v1225_v33 = vpop.xlane.xlu0 %1224 }
 0x454   :  { %v1226_v34 = vsub.f32 %v1221_v30, %v1225_v33  ;;  %v2609_v30 = vld [vmem:[#allocation14 + $0x10] sm:$0xff]   ;;  %v2611_v33 = vld [vmem:[#allocation14 + $0x20] sm:$0xff]  }
 0x456   :  { %v1227_v35 = vmul.f32 1.442695, %v1226_v34 }
 0x458   :  { %2631 = vpow2.f32 %v1227_v35 }
 0x462   :  { %v2632_v36 = vpop.eup %2631 }
 0x463   :  { %v1229_v37 = vsel %vm1222_vm9, %v2632_v36, 0.0 }
 0x464   :  { %1230 = vadd.xlane.f32.xlu0 %v1229_v37 }
 0x4f1   :  { %v1231_v40 = vpop.xlane.xlu0 %1230 }
 0x4f2   :  { %2633 = vrcp.f32 %v1231_v40 }
 0x4fc   :  { %v2634_v41 = vpop.eup %2633 }
 0x4fd   :  { %v1233_v42 = vmul.f32 %v2634_v41, %v2632_v36 }
 0x4ff   :  { %v1235_v43 = vpack.c.bf16 %v1233_v42, %v1233_v42  ;;  %1234 = vst.msk [vmem:[#allocation19] sm:$0xff] %vm1222_vm9, %v1233_v42 }
 0x501   :  { %v1243_v44 = vrot.slane %v1235_v43, %v3172_v59 }
 0x503   :  { %v1244_v45 = vcombine.high %v1243_v44, %v1243_v44  ;;  %v1251_v55 = vrot.slane %v1243_v44, %v3172_v59 }
 0x505   :  { %v2181_v46 = vpack.i.b16 %v1251_v55, %v1251_v55  ;;  %v1262_v7 = vunpack.i.h.s16 %v1251_v55  ;;  %v1258_v47 = vrot.slane %v1244_v45, %v3172_v59  ;;  %v1259_v56 = vcombine.high %v1251_v55, %v1251_v55 }
 0x507   :  { %v1273_v48 = vrot.slane %v2181_v46, %v3157_v14  ;;  %v1321_v50 = vpack.i.b16 %v1262_v7, %v1262_v7  ;;  %v1264_v53 = vunpack.i.h.s16 %v1258_v47  ;;  %v2184_v59 = vpack.i.b16 %v1258_v47, %v1258_v47 }
 0x508   :  { %v1266_v61 = vunpack.i.h.s16 %v1259_v56  ;;  %v2187_v62 = vpack.i.b16 %v1259_v56, %v1259_v56  ;;  %v1260_v63 = vcombine.high %v1258_v47, %v1258_v47 }
 0x509   :  { %2357 = vmatmul.mubr.msk.bf16.vlgmr.msra.gmra.mrb[8].mxu0 %vm1222_vm9, %v1273_v48  ;;  %v1325_v51 = vrot.slane %v1321_v50, %v3157_v14  ;;  %v1423_v12 = vpack.i.b16 %v1264_v53, %v1264_v53  ;;  %v1376_v16 = vrot.slane %v2184_v59, %v3157_v14 }
 0x50a   :  { %2367 = vmatpush3.bf16.msra.mxu0 %v1381_v49  ;;  %2368 = vmatprep.mubr.msk.bf16.mxu0 %vm2930_vm0, %v2929_v4  ;;  %v1525_v21 = vpack.i.b16 %v1266_v61, %v1266_v61  ;;  %v1478_v24 = vrot.slane %v2187_v62, %v3157_v14  ;;  %v1268_v3 = vunpack.i.h.s16 %v1260_v63  ;;  %v2190_v5 = vpack.i.b16 %v1260_v63, %v1260_v63 }
 0x50b   :  { %2363 = vmatmul.mubr.msk.bf16.vlgmr.msra.gmra.mrb[36].mxu1 %vm1222_vm9, %v1325_v51  ;;  %2378 = vmatprep.subr.bf16.mxu0 %v2929_v4  ;;  %v1427_v58 = vrot.slane %v1423_v12, %v3157_v14 }
 0x50c   :  { %2373 = vmatpush3.bf16.msra.mxu1 %v1432_v52  ;;  %2374 = vmatprep.mubr.msk.bf16.mxu1 %vm2930_vm0, %v2929_v4  ;;  %v1529_v1 = vrot.slane %v1525_v21, %v3157_v14  ;;  %v1627_v29 = vpack.i.b16 %v1268_v3, %v1268_v3  ;;  %v1580_v32 = vrot.slane %v2190_v5, %v3157_v14 }
 0x50d   :  { %2384 = vmatprep.subr.bf16.mxu1 %v2929_v4 }
 0x50e   :  { %v1631_v8 = vrot.slane %v1627_v29, %v3157_v14  ;;  %v2595_v14 = vld [vmem:[#allocation13 + $0x20] sm:$0xff]  }
 0x511   :  { %2369 = vmatmul.mubr.msk.bf16.vlgmr.msra.gmra.mrb[12].mxu0 %vm1222_vm9, %v1376_v16 }
 0x512   :  { %2379 = vmatpush3.bf16.msra.mxu0 %v1483_v57  ;;  %2380 = vmatprep.mubr.msk.bf16.mxu0 %vm2930_vm0, %v2929_v4 }
 0x513   :  { %2375 = vmatmul.mubr.msk.bf16.vlgmr.msra.gmra.mrb[40].mxu1 %vm1222_vm9, %v1427_v58  ;;  %2390 = vmatprep.subr.bf16.mxu0 %v2929_v4 }
 0x514   :  { %2385 = vmatpush3.bf16.msra.mxu1 %v1534_v60  ;;  %2386 = vmatprep.mubr.msk.bf16.mxu1 %vm2930_vm0, %v2929_v4 }
 0x515   :  { %2396 = vmatprep.subr.bf16.mxu1 %v2929_v4 }
 0x519   :  { %2381 = vmatmul.mubr.msk.bf16.vlgmr.msra.gmra.mrb[16].mxu0 %vm1222_vm9, %v1478_v24 }
 0x51a   :  { %2391 = vmatpush3.bf16.msra.mxu0 %v1585_v0  ;;  %2392 = vmatprep.mubr.msk.bf16.mxu0 %vm2930_vm0, %v2929_v4 }
 0x51b   :  { %2387 = vmatmul.mubr.msk.bf16.vlgmr.msra.gmra.mrb[44].mxu1 %vm1222_vm9, %v1529_v1  ;;  %2402 = vmatprep.subr.bf16.mxu0 %v2929_v4 }
 0x51c   :  { %2397 = vmatpush3.bf16.msra.mxu1 %v1636_v2  ;;  %2398 = vmatprep.mubr.msk.bf16.mxu1 %vm2930_vm0, %v2929_v4 }
 0x51d   :  { %2442 = vmatprep.subr.bf16.mxu1 %v2929_v4 }
 0x521   :  { %2393 = vmatmul.mubr.msk.bf16.vlgmr.msra.gmra.mrb[20].mxu0 %vm1222_vm9, %v1580_v32 }
 0x522   :  { %2403 = vmatpush3.bf16.msra.mxu0 %v2591_v6  ;;  %2418 = vmatprep.mubr.msk.bf16.mxu0 %vm2930_vm0, %v2929_v4 }
 0x523   :  { %2399 = vmatmul.mubr.msk.bf16.vlgmr.msra.gmra.mrb[48].mxu1 %vm1222_vm9, %v1631_v8  ;;  %2404 = vmatprep.subr.bf16.mxu0 %v2929_v4 }
 0x524   :  { %2458 = vmatprep.mubr.msk.bf16.mxu1 %vm2930_vm0, %v2929_v4  ;;  %2443 = vmatpush3.bf16.msra.mxu1 %v2607_v27 }
 0x525   :  { %2444 = vmatprep.subr.bf16.mxu1 %v2929_v4 }
 0x526   :  { %2405 = vmatpush3.bf16.msra.mxu0 %v2592_v9 }
 0x527   :  { %2406 = vmatprep.subr.bf16.mxu0 %v2929_v4 }
 0x528   :  { %2445 = vmatpush3.bf16.msra.mxu1 %v2608_v28 }
 0x529   :  { %2446 = vmatprep.subr.bf16.mxu1 %v2929_v4 }
 0x52a   :  { %2407 = vmatpush3.bf16.msra.mxu0 %v2593_v10 }
 0x52b   :  { %2408 = vmatprep.subr.bf16.mxu0 %v2929_v4 }
 0x52c   :  { %2447 = vmatpush3.bf16.msra.mxu1 %v2609_v30 }
 0x52d   :  { %2448 = vmatprep.subr.bf16.mxu1 %v2929_v4 }
 0x52e   :  { %2409 = vmatpush3.bf16.msra.mxu0 %v2594_v11 }
 0x52f   :  { %2410 = vmatprep.subr.bf16.mxu0 %v2929_v4 }
 0x530   :  { %2449 = vmatpush3.bf16.msra.mxu1 %v2610_v31 }
 0x531   :  { %2450 = vmatprep.subr.bf16.mxu1 %v2929_v4 }
 0x532   :  { %2411 = vmatpush3.bf16.msra.mxu0 %v2595_v14 }
 0x533   :  { %2412 = vmatprep.subr.bf16.mxu0 %v2929_v4 }
 0x534   :  { %2451 = vmatpush3.bf16.msra.mxu1 %v2611_v33 }
 0x535   :  { %2452 = vmatprep.subr.bf16.mxu1 %v2929_v4 }
 0x536   :  { %2413 = vmatpush3.bf16.msra.mxu0 %v2596_v13 }
 0x537   :  { %2414 = vmatprep.subr.bf16.mxu0 %v2929_v4 }
 0x53a   :  { %2415 = vmatpush3.bf16.msra.mxu0 %v2597_v15 }
 0x53b   :  { %2416 = vmatprep.subr.bf16.mxu0 %v2929_v4 }
 0x53e   :  { %2417 = vmatpush3.bf16.msra.mxu0 %v2598_v17 }
 0x53f   :  { %2422 = vmatprep.subr.bf16.mxu0 %v2929_v4 }
 0x541   :  { %2419 = vmatmul.mubr.bf16.vlgmr.msra.gmra.mrb[24].mxu0 %v3163_v54  ;;  %v2603_v54 = vld [vmem:[#allocation11 + $0x20] sm:$0xff]  }
 0x542   :  { %2438 = vmatprep.mubr.msk.bf16.mxu0 %vm2930_vm0, %v2929_v4  ;;  %2423 = vmatpush3.bf16.msra.mxu0 %v2599_v18 }
 0x543   :  { %2424 = vmatprep.subr.bf16.mxu0 %v2929_v4 }
 0x546   :  { %2425 = vmatpush3.bf16.msra.mxu0 %v2600_v19 }
 0x547   :  { %2426 = vmatprep.subr.bf16.mxu0 %v2929_v4 }
 0x54a   :  { %2427 = vmatpush3.bf16.msra.mxu0 %v2601_v20 }
 0x54b   :  { %2428 = vmatprep.subr.bf16.mxu0 %v2929_v4 }
 0x54e   :  { %2429 = vmatpush3.bf16.msra.mxu0 %v2602_v22 }
 0x54f   :  { %2430 = vmatprep.subr.bf16.mxu0 %v2929_v4 }
 0x552   :  { %2431 = vmatpush3.bf16.msra.mxu0 %v2603_v54 }
 0x553   :  { %2432 = vmatprep.subr.bf16.mxu0 %v2929_v4 }
 0x556   :  { %2433 = vmatpush3.bf16.msra.mxu0 %v2604_v23 }
 0x557   :  { %2434 = vmatprep.subr.bf16.mxu0 %v2929_v4 }
 0x55a   :  { %2435 = vmatpush3.bf16.msra.mxu0 %v2605_v25 }
 0x55b   :  { %2436 = vmatprep.subr.bf16.mxu0 %v2929_v4 }
 0x55e   :  { %2437 = vmatpush3.bf16.msra.mxu0 %v2606_v26 }
 0x5dc   :  { %v1315_v34 = vpop.f32.mrb[8].mxu0 }
 0x5dd   :  { %v2358_v35 = vpop.f32.mrb[9].mxu0  ;;  %v1678_v38 = vpack.c.bf16 %v1315_v34, %v1315_v34  ;;  %v2612_v34 = vld [vmem:[#allocation14 + $0x28] sm:$0xff]  }
 0x5de   :  { %v1318_v36 = vpop.f32.mrb[10].mxu0  ;;  %v1366_v37 = vpop.f32.mrb[36].mxu1  ;;  %2453 = vmatpush3.bf16.msra.mxu1 %v2612_v34  ;;  %v2613_v35 = vld [vmem:[#allocation14 + $0x30] sm:$0xff]  }
 0x5df   :  { %v1679_v39 = vpack.c.bf16 %v1366_v37, %v1366_v37  ;;  %v2359_v40 = vpop.f32.mrb[11].mxu0  ;;  %v2364_v41 = vpop.f32.mrb[37].mxu1  ;;  %v1814_v45 = vunpack.c.l.b16 %v1678_v38  ;;  %2454 = vmatprep.subr.bf16.mxu1 %v2929_v4  ;;  %v2614_v36 = vld [vmem:[#allocation14 + $0x38] sm:$0xff]  }
 0x5e0   :  { %v1369_v42 = vpop.f32.mrb[38].mxu1 }
 0x5e1   :  { %v1815_v43 = vunpack.c.l.b16 %v1679_v39  ;;  %v2365_v44 = vpop.f32.mrb[39].mxu1 }
 0x5e2   :  { %2455 = vmatpush3.bf16.msra.mxu1 %v2613_v35 }
 0x5e3   :  { %v1822_v55 = vrot.slane %v1815_v43, 7  ;;  %2456 = vmatprep.subr.bf16.mxu1 %v2929_v4 }
 0x5e4   :  { %v1417_v46 = vpop.f32.mrb[12].mxu0 }
 0x5e5   :  { %v1823_v7 = vsel %vm1200_vm1, %v1822_v55, %v1814_v45  ;;  %v1680_v47 = vpack.c.bf16 %v1417_v46, %v1417_v46  ;;  %v2370_v48 = vpop.f32.mrb[13].mxu0 }
 0x5e6   :  { %v1420_v49 = vpop.f32.mrb[14].mxu0  ;;  %v1468_v50 = vpop.f32.mrb[40].mxu1  ;;  %2457 = vmatpush3.bf16.msra.mxu1 %v2614_v36 }
 0x5e7   :  { %v1816_v51 = vunpack.c.l.b16 %v1680_v47  ;;  %v1681_v52 = vpack.c.bf16 %v1468_v50, %v1468_v50  ;;  %v2371_v53 = vpop.f32.mrb[15].mxu0  ;;  %v2376_v59 = vpop.f32.mrb[41].mxu1 }
 0x5e8   :  { %v1471_v12 = vpop.f32.mrb[42].mxu1 }
 0x5e9   :  { %v1824_v56 = vrot.slane %v1816_v51, 6  ;;  %v1817_v16 = vunpack.c.l.b16 %v1681_v52  ;;  %v2377_v57 = vpop.f32.mrb[43].mxu1 }
 0x5eb   :  { %v1825_v58 = vsel %vm1203_vm2, %v1824_v56, %v1823_v7  ;;  %v1826_v60 = vrot.slane %v1817_v16, 5 }
 0x5ec   :  { %v1519_v61 = vpop.f32.mrb[16].mxu0 }
 0x5ed   :  { %v1827_v62 = vsel %vm1206_vm3, %v1826_v60, %v1825_v58  ;;  %v1682_v21 = vpack.c.bf16 %v1519_v61, %v1519_v61  ;;  %v2382_v63 = vpop.f32.mrb[17].mxu0 }
 0x5ee   :  { %v1522_v24 = vpop.f32.mrb[18].mxu0  ;;  %v1570_v0 = vpop.f32.mrb[44].mxu1 }
 0x5ef   :  { %v1818_v1 = vunpack.c.l.b16 %v1682_v21  ;;  %v1683_v2 = vpack.c.bf16 %v1570_v0, %v1570_v0  ;;  %v2383_v3 = vpop.f32.mrb[19].mxu0  ;;  %v2388_v5 = vpop.f32.mrb[45].mxu1 }
 0x5f0   :  { %v1573_v29 = vpop.f32.mrb[46].mxu1 }
 0x5f1   :  { %v1828_v6 = vrot.slane %v1818_v1, 4  ;;  %v1819_v32 = vunpack.c.l.b16 %v1683_v2  ;;  %v2389_v8 = vpop.f32.mrb[47].mxu1 }
 0x5f3   :  { %v1829_v9 = vsel %vm1209_vm4, %v1828_v6, %v1827_v62  ;;  %v1830_v10 = vrot.slane %v1819_v32, 3 }
 0x5f4   :  { %v1621_v11 = vpop.f32.mrb[20].mxu0 }
 0x5f5   :  { %v1831_v14 = vsel %vm1212_vm5, %v1830_v10, %v1829_v9  ;;  %v1684_v13 = vpack.c.bf16 %v1621_v11, %v1621_v11  ;;  %v2394_v15 = vpop.f32.mrb[21].mxu0 }
 0x5f6   :  { %v1624_v17 = vpop.f32.mrb[22].mxu0  ;;  %v1672_v18 = vpop.f32.mrb[48].mxu1 }
 0x5f7   :  { %v1820_v19 = vunpack.c.l.b16 %v1684_v13  ;;  %v1685_v20 = vpack.c.bf16 %v1672_v18, %v1672_v18  ;;  %v2395_v22 = vpop.f32.mrb[23].mxu0  ;;  %v2400_v54 = vpop.f32.mrb[49].mxu1 }
 0x5f8   :  { %v1675_v23 = vpop.f32.mrb[50].mxu1 }
 0x5f9   :  { %v1832_v25 = vrot.slane %v1820_v19, 2  ;;  %v1821_v26 = vunpack.c.l.b16 %v1685_v20  ;;  %v2401_v27 = vpop.f32.mrb[51].mxu1 }
 0x5fb   :  { %v1833_v28 = vsel %vm1215_vm6, %v1832_v25, %v1831_v14  ;;  %v1834_v30 = vrot.slane %v1821_v26, 1 }
 0x5fd   :  { %v1835_v31 = vsel %vm1218_vm7, %v1834_v30, %v1833_v28 }
 0x5fe   :  { %v1836_v33 = vpack.c.b16 %v1835_v31, %v1835_v31 }
 0x600   :  { %2439 = vmatmul.mubr.bf16.vlgmr.msra.gmra.mrb[24].mxu0 %v1836_v33 }
 0x6d3   :  { %v1920_v37 = vpop.f32.mrb[24].mxu0 }
 0x6d4   :  { %2635 = vtanh.f32 %v1920_v37  ;;  %v2440_v38 = vpop.f32.mrb[25].mxu0 }
 0x6d5   :  { %v1923_v39 = vpop.f32.mrb[26].mxu0 }
 0x6d6   :  { %v2441_v40 = vpop.f32.mrb[27].mxu0 }
 0x6de   :  { %v2636_v41 = vpop.eup %2635 }
 0x6df   :  { %v1927_v42 = vpack.c.bf16 %v2636_v41, %v2636_v41 }
 0x6e1   :  { %2459 = vmatmul.mubr.bf16.vlgmr.msra.gmra.mrb[52].mxu1 %v1927_v42 }
 0x6e2   :  { %2824 = shalt.err (!%p2821_p12)
}
 0x6e3   :  { %s2825_s15 = scalar_lea.hbm %s3396_s12, 128 }
 0x6e4   :  { %p2826_p13 = scmp.ne.s32.totalorder %s3396_s12, %s2825_s15  ;;  %p2829_p0 = scmp.lt.u32.totalorder %s2825_s15, %s3396_s12 }
 0x6e6   :  { %p2831_p1 = pnand %p2829_p0, %p2826_p13 }
 0x6e8   :  { %2834 = shalt.err (!%p2831_p1)
}
 0x6e9   :  { %2059 = dma.vmem_to_hbm [thread:$0]  %s2057_s25, 128, %s3396_s12, [#allocation18]  }
 0x6ea   :  { %s2835_s1 = scalar_lea.vmem %s2047_s0, 128  ;;  %p2840_p3 = scmp.lt.s32.totalorder %s2047_s0, %s2047_s0 }
 0x6eb   :  { %p2836_p2 = scmp.ne.s32.totalorder %s2047_s0, %s2835_s1  ;;  %p2841_p4 = scmp.lt.s32.totalorder %s2835_s1, %s2835_s1 }
 0x6ed   :  { %p2842_p5 = por %p2841_p4, %p2840_p3 }
 0x6ef   :  { %p2843_p6 = pnand %p2842_p5, %p2836_p2 }
 0x6f1   :  { %2846 = shalt.err (!%p2843_p6)
}
 0x6f2   :  { %s2847_s18 = scalar_lea.hbm %s3395_s11, 128 }
 0x6f3   :  { %p2848_p7 = scmp.ne.s32.totalorder %s3395_s11, %s2847_s18  ;;  %p2851_p8 = scmp.lt.u32.totalorder %s2847_s18, %s3395_s11 }
 0x6f5   :  { %p2853_p9 = pnand %p2851_p8, %p2848_p7 }
 0x6f7   :  { %2856 = shalt.err (!%p2853_p9)
}
 0x6f8   :  { %2049 = dma.vmem_to_hbm [thread:$0]  %s2047_s0, 128, %s3395_s11, [#allocation4]  }
 0x6f9   :  { %s2934_s16 = smov [#allocation19]  }
 0x6fa   :  { %s2066_s5 = sshll.u32 %s2934_s16, 4  ;;  %s2067_s5 = int_to_ptr.vmem [resolvable:$true] %s2066_s5 }
 0x6fb   :  { %s2857_s20 = scalar_lea.vmem %s2067_s5, 128  ;;  %p2862_p11 = scmp.lt.s32.totalorder %s2067_s5, %s2067_s5 }
 0x6fc   :  { %p2858_p10 = scmp.ne.s32.totalorder %s2067_s5, %s2857_s20  ;;  %p2863_p12 = scmp.lt.s32.totalorder %s2857_s20, %s2857_s20 }
 0x6fe   :  { %p2864_p13 = por %p2863_p12, %p2862_p11 }
 0x700   :  { %p2865_p0 = pnand %p2864_p13, %p2858_p10 }
 0x702   :  { %2868 = shalt.err (!%p2865_p0)
}
 0x703   :  { %s2869_s27 = scalar_lea.hbm %s3397_s13, 128 }
 0x704   :  { %p2870_p1 = scmp.ne.s32.totalorder %s3397_s13, %s2869_s27  ;;  %p2873_p2 = scmp.lt.u32.totalorder %s2869_s27, %s3397_s13 }
 0x706   :  { %p2875_p3 = pnand %p2873_p2, %p2870_p1 }
 0x708   :  { %2878 = shalt.err (!%p2875_p3)
}
 0x709   :  { %2069 = dma.vmem_to_hbm [thread:$0]  %s2067_s5, 128, %s3397_s13, [#allocation18]   ;;  %v2209_v4 = vld [vmem:[%s3394_s10] ss:$0 sm:$0xff] }
 0x70a   :  { %s2935_s4 = smov [#allocation20]  }
 0x70b   :  { %s2076_s24 = sshll.u32 %s2935_s4, 4  ;;  %s2077_s24 = int_to_ptr.vmem [resolvable:$true] %s2076_s24 }
 0x70c   :  { %s2879_s17 = scalar_lea.vmem %s2077_s24, 128  ;;  %p2884_p5 = scmp.lt.s32.totalorder %s2077_s24, %s2077_s24 }
 0x70d   :  { %p2880_p4 = scmp.ne.s32.totalorder %s2077_s24, %s2879_s17  ;;  %p2885_p6 = scmp.lt.s32.totalorder %s2879_s17, %s2879_s17 }
 0x70f   :  { %p2886_p7 = por %p2885_p6, %p2884_p5 }
 0x711   :  { %p2887_p8 = pnand %p2886_p7, %p2880_p4 }
 0x7b4   :  { %v2033_v43 = vpop.f32.mrb[52].mxu1 }
 0x7b5   :  { %v2034_v44 = vadd.f32 %v2209_v4, %v2033_v43  ;;  %v2460_v45 = vpop.f32.mrb[53].mxu1 }
 0x7b6   :  { %v2036_v55 = vpop.f32.mrb[54].mxu1 }
 0x7b7   :  { %2039 = vst [vmem:[#allocation20] sm:$0xff] %v2034_v44  ;;  %v2461_v46 = vpop.f32.mrb[55].mxu1 }
 0x7b8   :  { %2890 = shalt.err (!%p2887_p8)
}
 0x7b9   :  { %s2891_s10 = scalar_lea.hbm %s3398_s14, 128 }
 0x7ba   :  { %p2892_p9 = scmp.ne.s32.totalorder %s3398_s14, %s2891_s10  ;;  %p2895_p10 = scmp.lt.u32.totalorder %s2891_s10, %s3398_s14 }
 0x7bc   :  { %p2897_p11 = pnand %p2895_p10, %p2892_p9 }
 0x7be   :  { %2900 = shalt.err (!%p2897_p11)
}
 0x7bf   :  { %2079 = dma.vmem_to_hbm [thread:$0]  %s2077_s24, 128, %s3398_s14, [#allocation21]  }
 0x7c0   :  { %2911 = dma.done.wait [#allocation4], 128  }
 0x7c1   :  { %2912 = vsyncadd [#allocation4], 4294967168 }
 0x7c2   :  { %2913 = dma.done.wait [#allocation18], 256  }
 0x7c3   :  { %2914 = vsyncadd [#allocation18], 4294967040 }
 0x7c4   :  { %2915 = dma.done.wait [#allocation21], 128  }
 0x7c5   :  { %2916 = vsyncadd [#allocation21], 4294967168 }
 0x7c6   :  { %2092 = vsyncpa [#allocation3], 1 }
 0x7c7   :  { %2093 = vsyncpa [#allocation6], 1 }
 0x7c8   :  { %2094 = vsyncpa [#allocation9], 1 }
 0x7c9   :  { %2095 = vsyncpa [#allocation12], 1 }
 0x7ca   :  { %2096 = vsyncpa [#allocation15], 1 }
 0x7cb   :  { %2097 = vsyncpa [#allocation4], 1 }
 0x7cc   :  { %2098 = vsyncpa [#allocation18], 1 }
 0x7cd   :  { %2099 = vsyncpa [#allocation21], 1 }

</bundles_post_ra>
